<compile_context>
chip_gen: v7x
topology: tpu7x:2x2x1
jax: 0.10.0
libtpu: 0.0.40
codegen_flags: <defaults>
</compile_context>

<pallas_src>
import functools

import jax
import jax.numpy as jnp
from jax.experimental import pallas as pl
from jax.experimental.pallas import tpu as pltpu


# ---------------------------------------------------------------------------
# Kernel
# ---------------------------------------------------------------------------

def _block_kernel(*refs, th, w, stride, has_proj):
    """Full Block on one (TH rows x W) strip of one batch element."""
    if has_proj:
        (xt_ref, xm_ref, xb_ref, w1_ref, s1_ref, b1_ref, w2_ref, s2_ref,
         b2_ref, w3_ref, s3_ref, b3_ref, wsc_ref, ssc_ref, bsc_ref,
         o_ref) = refs
    else:
        (xt_ref, xm_ref, xb_ref, w1_ref, s1_ref, b1_ref, w2_ref, s2_ref,
         b2_ref, w3_ref, s3_ref, b3_ref, o_ref) = refs

    f32 = jnp.float32
    bf16 = jnp.bfloat16
    cin = xm_ref.shape[-1]
    cmid = w1_ref.shape[-1]
    cexp = w3_ref.shape[-1]
    hs = th + 2                                   # strip rows incl. 1-row halos
    tho, wo = th // stride, w // stride

    i = pl.program_id(1)
    last = pl.num_programs(1) - 1

    # ---- conv1 (1x1) + bn1 + relu.  Halos done separately so the image-edge
    # zeroing only touches one row each (scalar-gated multiply), not a
    # full-strip select.
    def conv1(x2d):
        h = jnp.dot(x2d, w1_ref[...], preferred_element_type=f32)
        return jnp.maximum(h * s1_ref[...] + b1_ref[...], 0.0)

    x_mid = xm_ref[...].reshape(th, w, cin)                       # bf16
    h1_mid = conv1(x_mid.reshape(th * w, cin)).astype(bf16).reshape(
        th, w, cmid)
    top_live = (i > 0).astype(f32)
    bot_live = (i < last).astype(f32)
    h1_top = (conv1(xt_ref[...].reshape(w, cin)) * top_live).astype(bf16)
    h1_bot = (conv1(xb_ref[...].reshape(w, cin)) * bot_live).astype(bf16)
    h1 = jnp.concatenate(
        [h1_top.reshape(1, w, cmid), h1_mid, h1_bot.reshape(1, w, cmid)],
        axis=0)                                                   # (hs, w, cmid)

    # ---- grouped 3x3 conv expressed as block-diagonal dense weights.
    # dx = -1 / +1 taps via shifted copies + channel concat -> K = 3*cmid.
    zcol = jnp.zeros((hs, 1, cmid), bf16)
    h1_m = jnp.concatenate([zcol, h1[:, :w - 1, :]], axis=1)      # h1[.., c-1]
    h1_p = jnp.concatenate([h1[:, 1:, :], zcol], axis=1)          # h1[.., c+1]
    taps = jnp.concatenate([h1_m, h1, h1_p], axis=2)              # (hs,w,3cmid)

    if stride == 1:
        bands = [taps[dy:dy + th] for dy in range(3)]             # (th,w,3cmid)
    else:
        # stride 2: evaluate conv2 only at the strided output rows.
        pairs = taps.reshape(hs // 2, 2, w, 3 * cmid)
        bands = [pairs[0:tho, 0], pairs[0:tho, 1], pairs[1:tho + 1, 0]]

    # SSA accumulation over the 3 dy bands (no scratch read-modify-write).
    acc = jnp.dot(bands[0].reshape(tho * w, 3 * cmid), w2_ref[0],
                  preferred_element_type=f32)
    acc = acc + jnp.dot(bands[1].reshape(tho * w, 3 * cmid), w2_ref[1],
                        preferred_element_type=f32)
    acc = acc + jnp.dot(bands[2].reshape(tho * w, 3 * cmid), w2_ref[2],
                        preferred_element_type=f32)

    if stride != 1:
        # W subsample via reshape + static slice (no selection matmul).
        acc = acc.reshape(tho, wo, stride, cmid)[:, :, 0, :]
    h2 = jnp.maximum(acc.reshape(tho * wo, cmid) * s2_ref[...] + b2_ref[...],
                     0.0).astype(bf16)

    # ---- conv3 (1x1) + bn3 + relu.
    y = jnp.dot(h2, w3_ref[...], preferred_element_type=f32)
    y = jnp.maximum(y * s3_ref[...] + b3_ref[...], 0.0)

    # ---- shortcut from the x strip already resident in VMEM, then add + relu.
    if has_proj:
        if stride == 1:
            xs = x_mid.reshape(th * w, cin)
        else:
            xs = x_mid.reshape(tho, stride, wo, stride, cin)[:, 0, :, 0, :]
            xs = xs.reshape(tho * wo, cin)
        z = jnp.dot(xs, wsc_ref[...], preferred_element_type=f32)
        z = z * ssc_ref[...] + bsc_ref[...]
    else:
        z = x_mid.reshape(th * w, cin).astype(f32)

    out = jnp.maximum(y + z, 0.0)
    # f32 output keeps parity with the PyTorch module; switch to bf16 here if
    # the consumer takes bf16 (halves the largest HBM write).
    o_ref[...] = out.reshape(1, tho, wo, cexp).astype(o_ref.dtype)


# ---------------------------------------------------------------------------
# Helpers
# ---------------------------------------------------------------------------

def _grouped_to_blockdiag(w2g):
    """(3, 3, G, Cg, Cg) grouped HWIO -> (3, 3, G*Cg, G*Cg) block-diag dense."""
    kh, kw, g, ci, co = w2g.shape
    eye = jnp.eye(g, dtype=w2g.dtype)
    dense = jnp.einsum("hwgio,gk->hwgiko", w2g, eye)
    return dense.reshape(kh, kw, g * ci, g * co)


def _pick_tile_rows(h, w, stride):
    """Largest row-strip height dividing H (multiple of stride) with strip
    area <= 4096 elements (within the v6e and v7x recommended VMEM budgets)."""
    valid = [t for t in range(h, 0, -1) if h % t == 0 and t % stride == 0]
    for t in valid:
        if t * w <= 4096:
            return t
    return valid[-1]


# ---------------------------------------------------------------------------
# Pallas wrapper
# ---------------------------------------------------------------------------

def _block_pallas(x_bf, params, stride, has_proj):
    n, h, w, cin = x_bf.shape
    cmid = params["w1"].shape[1]
    cexp = params["w3"].shape[1]
    th = _pick_tile_rows(h, w, stride)
    tho, wo, ho = th // stride, w // stride, h // stride

    w1 = params["w1"].astype(jnp.bfloat16)
    s1 = params["s1"].reshape(1, cmid)
    b1 = params["b1"].reshape(1, cmid)
    w2 = _grouped_to_blockdiag(params["w2g"]).reshape(
        3, 3 * cmid, cmid).astype(jnp.bfloat16)
    s2 = params["s2"].reshape(1, cmid)
    b2 = params["b2"].reshape(1, cmid)
    w3 = params["w3"].astype(jnp.bfloat16)
    s3 = params["s3"].reshape(1, cexp)
    b3 = params["b3"].reshape(1, cexp)

    in_specs = [
        # 1-row halo above / TH-row strip / 1-row halo below (clamped indices;
        # out-of-image halo rows are zeroed in-kernel).
        pl.BlockSpec((1, 1, w, cin),
                     lambda ni, i: (ni, jnp.maximum(i * th - 1, 0), 0, 0)),
        pl.BlockSpec((1, th, w, cin), lambda ni, i: (ni, i, 0, 0)),
        pl.BlockSpec((1, 1, w, cin),
                     lambda ni, i: (ni, jnp.minimum((i + 1) * th, h - 1), 0, 0)),
        pl.BlockSpec((cin, cmid), lambda ni, i: (0, 0)),
        pl.BlockSpec((1, cmid), lambda ni, i: (0, 0)),
        pl.BlockSpec((1, cmid), lambda ni, i: (0, 0)),
        pl.BlockSpec((3, 3 * cmid, cmid), lambda ni, i: (0, 0, 0)),
        pl.BlockSpec((1, cmid), lambda ni, i: (0, 0)),
        pl.BlockSpec((1, cmid), lambda ni, i: (0, 0)),
        pl.BlockSpec((cmid, cexp), lambda ni, i: (0, 0)),
        pl.BlockSpec((1, cexp), lambda ni, i: (0, 0)),
        pl.BlockSpec((1, cexp), lambda ni, i: (0, 0)),
    ]
    args = [x_bf, x_bf, x_bf, w1, s1, b1, w2, s2, b2, w3, s3, b3]

    if has_proj:
        wsc = params["wsc"].astype(jnp.bfloat16)
        ssc = params["ssc"].reshape(1, cexp)
        bsc = params["bsc"].reshape(1, cexp)
        in_specs += [
            pl.BlockSpec((cin, cexp), lambda ni, i: (0, 0)),
            pl.BlockSpec((1, cexp), lambda ni, i: (0, 0)),
            pl.BlockSpec((1, cexp), lambda ni, i: (0, 0)),
        ]
        args += [wsc, ssc, bsc]

    kernel = functools.partial(_block_kernel, th=th, w=w, stride=stride,
                               has_proj=has_proj)
    return pl.pallas_call(
        kernel,
        out_shape=jax.ShapeDtypeStruct((n, ho, wo, cexp), jnp.float32),
        grid=(n, h // th),
        in_specs=in_specs,
        out_specs=pl.BlockSpec((1, tho, wo, cexp), lambda ni, i: (ni, i, 0, 0)),
        compiler_params=pltpu.CompilerParams(
            dimension_semantics=("parallel", "parallel"),
            vmem_limit_bytes=64 * 1024 * 1024),
    )(*args)


# ---------------------------------------------------------------------------
# Block forward (Pallas) and pure-JAX reference
# ---------------------------------------------------------------------------

def block_forward(x_nchw, params, *, stride=1):
    # Single transpose + single bf16 cast at the block boundary.
    x = jnp.transpose(x_nchw, (0, 2, 3, 1)).astype(jnp.bfloat16)   # NHWC bf16
    n, h, w, cin = x.shape
    cexp = params["w3"].shape[1]
    assert h % stride == 0 and w % stride == 0
    has_proj = (stride != 1) or (cin != cexp)
    out = _block_pallas(x, params, stride, has_proj)     # (n, ho, wo, cexp) f32
    return jnp.transpose(out, (0, 3, 1, 2))              # NCHW


def ref_forward(x_nchw, params, *, cardinality, stride=1):
    """Pure-JAX reference mirroring the kernel's bf16-operand precision."""
    hp = jax.lax.Precision.HIGHEST
    bf = lambda a: a.astype(jnp.bfloat16).astype(jnp.float32)
    x = jnp.transpose(x_nchw, (0, 2, 3, 1)).astype(jnp.float32)
    cin = x.shape[-1]
    cexp = params["w3"].shape[1]
    xb = bf(x)

    h1 = jnp.maximum(
        jnp.einsum("nhwc,cd->nhwd", xb, bf(params["w1"]), precision=hp)
        * params["s1"] + params["b1"], 0.0)
    kh, kw, g, ci, co = params["w2g"].shape
    w2_hwio = jnp.transpose(params["w2g"], (0, 1, 3, 2, 4)).reshape(
        kh, kw, ci, g * co)
    h2 = jax.lax.conv_general_dilated(
        bf(h1), bf(w2_hwio), window_strides=(stride, stride),
        padding=[(1, 1), (1, 1)],
        dimension_numbers=("NHWC", "HWIO", "NHWC"),
        feature_group_count=cardinality, precision=hp)
    h2 = bf(jnp.maximum(h2 * params["s2"] + params["b2"], 0.0))
    h3 = jnp.maximum(
        jnp.einsum("nhwc,cd->nhwd", h2, bf(params["w3"]), precision=hp)
        * params["s3"] + params["b3"], 0.0)
    if stride != 1 or cin != cexp:
        xs = xb[:, ::stride, ::stride, :]
        sc = (jnp.einsum("nhwc,cd->nhwd", xs, bf(params["wsc"]), precision=hp)
              * params["ssc"] + params["bsc"])
    else:
        sc = xb                     # identity shortcut consumes bf16 x (as kernel)
    out = jnp.maximum(h3 + sc, 0.0)
    return jnp.transpose(out, (0, 3, 1, 2))


def bn_fold(key, c):
    k1, k2, k3, k4 = jax.random.split(key, 4)
    gamma = 1.0 + 0.1 * jax.random.normal(k1, (c,), jnp.float32)
    beta = 0.1 * jax.random.normal(k2, (c,), jnp.float32)
    mean = 0.1 * jax.random.normal(k3, (c,), jnp.float32)
    var = jnp.abs(jax.random.normal(k4, (c,), jnp.float32)) + 0.5
    scale = gamma / jnp.sqrt(var + 1e-5)
    bias = beta - mean * scale
    return scale, bias


def make_params(key, in_planes, cardinality, bottleneck_width, stride):
    expansion = 2
    gw = cardinality * bottleneck_width
    cexp = expansion * gw
    ks = jax.random.split(key, 8)
    p = {
        "w1": 0.1 * jax.random.normal(ks[0], (in_planes, gw), jnp.float32),
        "w2g": 0.2 * jax.random.normal(
            ks[1], (3, 3, cardinality, bottleneck_width, bottleneck_width),
            jnp.float32),
        "w3": 0.1 * jax.random.normal(ks[2], (gw, cexp), jnp.float32),
    }
    p["s1"], p["b1"] = bn_fold(ks[3], gw)
    p["s2"], p["b2"] = bn_fold(ks[4], gw)
    p["s3"], p["b3"] = bn_fold(ks[5], cexp)
    if stride != 1 or in_planes != cexp:
        p["wsc"] = 0.1 * jax.random.normal(ks[6], (in_planes, cexp),
                                           jnp.float32)
        p["ssc"], p["bsc"] = bn_fold(ks[7], cexp)
    return p


if __name__ == "__main__":
    key = jax.random.PRNGKey(0)
    cardinality, bottleneck_width = 32, 4
    gw = cardinality * bottleneck_width            # 128
    cexp = 2 * gw                                  # 256 (expansion = 2)
    n, hh, ww = 2, 16, 16

    configs = [
        ("proj_s1", 64, 1),        # projection shortcut, stride 1
        ("proj_s2", 64, 2),        # projection shortcut, stride 2
        ("identity", cexp, 1),     # identity shortcut
    ]

    fwd = jax.jit(block_forward, static_argnames=("stride",))
    for name, in_planes, stride in configs:
        kp, kx, key = jax.random.split(key, 3)
        params = make_params(kp, in_planes, cardinality, bottleneck_width,
                             stride)
        x = jax.random.normal(kx, (n, in_planes, hh, ww), jnp.float32)

        out = jax.block_until_ready(fwd(x, params, stride=stride))
        ref = ref_forward(x, params, cardinality=cardinality, stride=stride)

        assert out.shape == (n, cexp, hh // stride, ww // stride), \
            (name, out.shape)
        max_err = float(jnp.max(jnp.abs(out - ref)))
        assert jnp.allclose(out, ref, atol=2e-2, rtol=2e-2), (name, max_err)

    print("KERNEL_OK")
</pallas_src>

<mosaic_0001>
module attributes {stable_mosaic.version = 11 : i64} {
  func.func @_block_kernel(%arg0: i32, %arg1: i32, %arg2: memref<1x1x16x64xbf16, #tpu.memory_space<vmem>>, %arg3: memref<1x16x16x64xbf16, #tpu.memory_space<vmem>>, %arg4: memref<1x1x16x64xbf16, #tpu.memory_space<vmem>>, %arg5: memref<64x128xbf16, #tpu.memory_space<vmem>>, %arg6: memref<1x128xf32, #tpu.memory_space<vmem>>, %arg7: memref<1x128xf32, #tpu.memory_space<vmem>>, %arg8: memref<3x384x128xbf16, #tpu.memory_space<vmem>>, %arg9: memref<1x128xf32, #tpu.memory_space<vmem>>, %arg10: memref<1x128xf32, #tpu.memory_space<vmem>>, %arg11: memref<128x256xbf16, #tpu.memory_space<vmem>>, %arg12: memref<1x256xf32, #tpu.memory_space<vmem>>, %arg13: memref<1x256xf32, #tpu.memory_space<vmem>>, %arg14: memref<64x256xbf16, #tpu.memory_space<vmem>>, %arg15: memref<1x256xf32, #tpu.memory_space<vmem>>, %arg16: memref<1x256xf32, #tpu.memory_space<vmem>>, %arg17: memref<1x16x16x256xf32, #tpu.memory_space<vmem>>) attributes {dimension_semantics = [#tpu.dimension_semantics<parallel>, #tpu.dimension_semantics<parallel>], iteration_bounds = array<i64: 2, 1>, scalar_prefetch = 0 : i64, scratch_operands = 0 : i64, tpu.core_type = #tpu.core_type<tc>, window_params = [{transform_indices = @transform_0, window_bounds = array<i64: 1, 1, 16, 64>}, {transform_indices = @transform_1, window_bounds = array<i64: 1, 16, 16, 64>}, {transform_indices = @transform_2, window_bounds = array<i64: 1, 1, 16, 64>}, {pipeline_mode = #tpu.pipeline_mode<synchronous>, transform_indices = @transform_3, window_bounds = array<i64: 64, 128>}, {pipeline_mode = #tpu.pipeline_mode<synchronous>, transform_indices = @transform_4, window_bounds = array<i64: 1, 128>}, {pipeline_mode = #tpu.pipeline_mode<synchronous>, transform_indices = @transform_5, window_bounds = array<i64: 1, 128>}, {pipeline_mode = #tpu.pipeline_mode<synchronous>, transform_indices = @transform_6, window_bounds = array<i64: 3, 384, 128>}, {pipeline_mode = #tpu.pipeline_mode<synchronous>, transform_indices = @transform_7, window_bounds = array<i64: 1, 128>}, {pipeline_mode = #tpu.pipeline_mode<synchronous>, transform_indices = @transform_8, window_bounds = array<i64: 1, 128>}, {pipeline_mode = #tpu.pipeline_mode<synchronous>, transform_indices = @transform_9, window_bounds = array<i64: 128, 256>}, {pipeline_mode = #tpu.pipeline_mode<synchronous>, transform_indices = @transform_10, window_bounds = array<i64: 1, 256>}, {pipeline_mode = #tpu.pipeline_mode<synchronous>, transform_indices = @transform_11, window_bounds = array<i64: 1, 256>}, {pipeline_mode = #tpu.pipeline_mode<synchronous>, transform_indices = @transform_12, window_bounds = array<i64: 64, 256>}, {pipeline_mode = #tpu.pipeline_mode<synchronous>, transform_indices = @transform_13, window_bounds = array<i64: 1, 256>}, {pipeline_mode = #tpu.pipeline_mode<synchronous>, transform_indices = @transform_14, window_bounds = array<i64: 1, 256>}, {transform_indices = @transform_15, window_bounds = array<i64: 1, 16, 16, 256>}]} {
    %c0 = arith.constant 0 : index
    %c0_0 = arith.constant 0 : index
    %c0_1 = arith.constant 0 : index
    %c0_2 = arith.constant 0 : index
    %0 = vector.load %arg3[%c0, %c0_0, %c0_1, %c0_2] : memref<1x16x16x64xbf16, #tpu.memory_space<vmem>>, vector<1x16x16x64xbf16>
    %1 = vector.shape_cast %0 : vector<1x16x16x64xbf16> to vector<16x16x64xbf16>
    %2 = vector.shape_cast %1 : vector<16x16x64xbf16> to vector<256x64xbf16>
    %c0_3 = arith.constant 0 : index
    %c0_4 = arith.constant 0 : index
    %3 = vector.load %arg5[%c0_3, %c0_4] : memref<64x128xbf16, #tpu.memory_space<vmem>>, vector<64x128xbf16>
    %cst = arith.constant dense<0.000000e+00> : vector<256x128xf32>
    %4 = tpu.matmul %2, %3, %cst {dimension_numbers = #tpu.dot_dimension_numbers<[1], [0], [0], [1], [0, 0, 1, 1], [], []>} : vector<256x64xbf16>, vector<64x128xbf16>, vector<256x128xf32> -> vector<256x128xf32>
    %c0_5 = arith.constant 0 : index
    %c0_6 = arith.constant 0 : index
    %5 = vector.load %arg6[%c0_5, %c0_6] : memref<1x128xf32, #tpu.memory_space<vmem>>, vector<1x128xf32>
    %6 = vector.broadcast %5 : vector<1x128xf32> to vector<256x128xf32>
    %7 = arith.mulf %4, %6 : vector<256x128xf32>
    %c0_7 = arith.constant 0 : index
    %c0_8 = arith.constant 0 : index
    %8 = vector.load %arg7[%c0_7, %c0_8] : memref<1x128xf32, #tpu.memory_space<vmem>>, vector<1x128xf32>
    %9 = vector.broadcast %8 : vector<1x128xf32> to vector<256x128xf32>
    %10 = arith.addf %7, %9 : vector<256x128xf32>
    %cst_9 = arith.constant 0.000000e+00 : f32
    %11 = vector.broadcast %cst_9 : f32 to vector<256x128xf32>
    %12 = arith.maximumf %10, %11 : vector<256x128xf32>
    %13 = arith.truncf %12 : vector<256x128xf32> to vector<256x128xbf16>
    %14 = vector.shape_cast %13 : vector<256x128xbf16> to vector<16x16x128xbf16>
    %c0_i32 = arith.constant 0 : i32
    %15 = arith.cmpi sgt, %arg1, %c0_i32 : i32
    %16 = arith.extui %15 : i1 to i32
    %17 = arith.sitofp %16 : i32 to f32
    %c0_i32_10 = arith.constant 0 : i32
    %18 = arith.cmpi slt, %arg1, %c0_i32_10 : i32
    %19 = arith.extui %18 : i1 to i32
    %20 = arith.sitofp %19 : i32 to f32
    %c0_11 = arith.constant 0 : index
    %c0_12 = arith.constant 0 : index
    %c0_13 = arith.constant 0 : index
    %c0_14 = arith.constant 0 : index
    %21 = vector.load %arg2[%c0_11, %c0_12, %c0_13, %c0_14] : memref<1x1x16x64xbf16, #tpu.memory_space<vmem>>, vector<1x1x16x64xbf16>
    %22 = vector.shape_cast %21 : vector<1x1x16x64xbf16> to vector<16x64xbf16>
    %c0_15 = arith.constant 0 : index
    %c0_16 = arith.constant 0 : index
    %23 = vector.load %arg5[%c0_15, %c0_16] : memref<64x128xbf16, #tpu.memory_space<vmem>>, vector<64x128xbf16>
    %cst_17 = arith.constant dense<0.000000e+00> : vector<16x128xf32>
    %24 = tpu.matmul %22, %23, %cst_17 {dimension_numbers = #tpu.dot_dimension_numbers<[1], [0], [0], [1], [0, 0, 1, 1], [], []>} : vector<16x64xbf16>, vector<64x128xbf16>, vector<16x128xf32> -> vector<16x128xf32>
    %c0_18 = arith.constant 0 : index
    %c0_19 = arith.constant 0 : index
    %25 = vector.load %arg6[%c0_18, %c0_19] : memref<1x128xf32, #tpu.memory_space<vmem>>, vector<1x128xf32>
    %26 = vector.broadcast %25 : vector<1x128xf32> to vector<16x128xf32>
    %27 = arith.mulf %24, %26 : vector<16x128xf32>
    %c0_20 = arith.constant 0 : index
    %c0_21 = arith.constant 0 : index
    %28 = vector.load %arg7[%c0_20, %c0_21] : memref<1x128xf32, #tpu.memory_space<vmem>>, vector<1x128xf32>
    %29 = vector.broadcast %28 : vector<1x128xf32> to vector<16x128xf32>
    %30 = arith.addf %27, %29 : vector<16x128xf32>
    %cst_22 = arith.constant 0.000000e+00 : f32
    %31 = vector.broadcast %cst_22 : f32 to vector<16x128xf32>
    %32 = arith.maximumf %30, %31 : vector<16x128xf32>
    %33 = vector.broadcast %17 : f32 to vector<16x128xf32>
    %34 = arith.mulf %32, %33 : vector<16x128xf32>
    %35 = arith.truncf %34 : vector<16x128xf32> to vector<16x128xbf16>
    %c0_23 = arith.constant 0 : index
    %c0_24 = arith.constant 0 : index
    %c0_25 = arith.constant 0 : index
    %c0_26 = arith.constant 0 : index
    %36 = vector.load %arg4[%c0_23, %c0_24, %c0_25, %c0_26] : memref<1x1x16x64xbf16, #tpu.memory_space<vmem>>, vector<1x1x16x64xbf16>
    %37 = vector.shape_cast %36 : vector<1x1x16x64xbf16> to vector<16x64xbf16>
    %c0_27 = arith.constant 0 : index
    %c0_28 = arith.constant 0 : index
    %38 = vector.load %arg5[%c0_27, %c0_28] : memref<64x128xbf16, #tpu.memory_space<vmem>>, vector<64x128xbf16>
    %cst_29 = arith.constant dense<0.000000e+00> : vector<16x128xf32>
    %39 = tpu.matmul %37, %38, %cst_29 {dimension_numbers = #tpu.dot_dimension_numbers<[1], [0], [0], [1], [0, 0, 1, 1], [], []>} : vector<16x64xbf16>, vector<64x128xbf16>, vector<16x128xf32> -> vector<16x128xf32>
    %c0_30 = arith.constant 0 : index
    %c0_31 = arith.constant 0 : index
    %40 = vector.load %arg6[%c0_30, %c0_31] : memref<1x128xf32, #tpu.memory_space<vmem>>, vector<1x128xf32>
    %41 = vector.broadcast %40 : vector<1x128xf32> to vector<16x128xf32>
    %42 = arith.mulf %39, %41 : vector<16x128xf32>
    %c0_32 = arith.constant 0 : index
    %c0_33 = arith.constant 0 : index
    %43 = vector.load %arg7[%c0_32, %c0_33] : memref<1x128xf32, #tpu.memory_space<vmem>>, vector<1x128xf32>
    %44 = vector.broadcast %43 : vector<1x128xf32> to vector<16x128xf32>
    %45 = arith.addf %42, %44 : vector<16x128xf32>
    %cst_34 = arith.constant 0.000000e+00 : f32
    %46 = vector.broadcast %cst_34 : f32 to vector<16x128xf32>
    %47 = arith.maximumf %45, %46 : vector<16x128xf32>
    %48 = vector.broadcast %20 : f32 to vector<16x128xf32>
    %49 = arith.mulf %47, %48 : vector<16x128xf32>
    %50 = arith.truncf %49 : vector<16x128xf32> to vector<16x128xbf16>
    %51 = vector.shape_cast %35 : vector<16x128xbf16> to vector<1x16x128xbf16>
    %52 = vector.shape_cast %50 : vector<16x128xbf16> to vector<1x16x128xbf16>
    %53 = tpu.concatenate %51, %14, %52 in 0 : vector<1x16x128xbf16>, vector<16x16x128xbf16>, vector<1x16x128xbf16> -> vector<18x16x128xbf16>
    %cst_35 = arith.constant 0.000000e+00 : bf16
    %54 = vector.broadcast %cst_35 : bf16 to vector<18x1x128xbf16>
    %55 = vector.extract_strided_slice %53 {offsets = [0, 0, 0], sizes = [18, 15, 128], strides = [1, 1, 1]} : vector<18x16x128xbf16> to vector<18x15x128xbf16>
    %56 = tpu.concatenate %54, %55 in 1 : vector<18x1x128xbf16>, vector<18x15x128xbf16> -> vector<18x16x128xbf16>
    %57 = vector.extract_strided_slice %53 {offsets = [0, 1, 0], sizes = [18, 15, 128], strides = [1, 1, 1]} : vector<18x16x128xbf16> to vector<18x15x128xbf16>
    %58 = tpu.concatenate %57, %54 in 1 : vector<18x15x128xbf16>, vector<18x1x128xbf16> -> vector<18x16x128xbf16>
    %59 = tpu.concatenate %56, %53, %58 in 2 : vector<18x16x128xbf16>, vector<18x16x128xbf16>, vector<18x16x128xbf16> -> vector<18x16x384xbf16>
    %60 = vector.extract_strided_slice %59 {offsets = [0, 0, 0], sizes = [16, 16, 384], strides = [1, 1, 1]} : vector<18x16x384xbf16> to vector<16x16x384xbf16>
    %61 = vector.extract_strided_slice %59 {offsets = [1, 0, 0], sizes = [16, 16, 384], strides = [1, 1, 1]} : vector<18x16x384xbf16> to vector<16x16x384xbf16>
    %62 = vector.extract_strided_slice %59 {offsets = [2, 0, 0], sizes = [16, 16, 384], strides = [1, 1, 1]} : vector<18x16x384xbf16> to vector<16x16x384xbf16>
    %63 = vector.shape_cast %60 : vector<16x16x384xbf16> to vector<256x384xbf16>
    %c0_36 = arith.constant 0 : index
    %c0_37 = arith.constant 0 : index
    %c0_38 = arith.constant 0 : index
    %64 = vector.load %arg8[%c0_36, %c0_37, %c0_38] : memref<3x384x128xbf16, #tpu.memory_space<vmem>>, vector<1x384x128xbf16>
    %65 = vector.shape_cast %64 : vector<1x384x128xbf16> to vector<384x128xbf16>
    %cst_39 = arith.constant dense<0.000000e+00> : vector<256x128xf32>
    %66 = tpu.matmul %63, %65, %cst_39 {dimension_numbers = #tpu.dot_dimension_numbers<[1], [0], [0], [1], [0, 0, 1, 1], [], []>} : vector<256x384xbf16>, vector<384x128xbf16>, vector<256x128xf32> -> vector<256x128xf32>
    %67 = vector.shape_cast %61 : vector<16x16x384xbf16> to vector<256x384xbf16>
    %c1 = arith.constant 1 : index
    %c0_40 = arith.constant 0 : index
    %c0_41 = arith.constant 0 : index
    %68 = vector.load %arg8[%c1, %c0_40, %c0_41] : memref<3x384x128xbf16, #tpu.memory_space<vmem>>, vector<1x384x128xbf16>
    %69 = vector.shape_cast %68 : vector<1x384x128xbf16> to vector<384x128xbf16>
    %cst_42 = arith.constant dense<0.000000e+00> : vector<256x128xf32>
    %70 = tpu.matmul %67, %69, %cst_42 {dimension_numbers = #tpu.dot_dimension_numbers<[1], [0], [0], [1], [0, 0, 1, 1], [], []>} : vector<256x384xbf16>, vector<384x128xbf16>, vector<256x128xf32> -> vector<256x128xf32>
    %71 = arith.addf %66, %70 : vector<256x128xf32>
    %72 = vector.shape_cast %62 : vector<16x16x384xbf16> to vector<256x384xbf16>
    %c2 = arith.constant 2 : index
    %c0_43 = arith.constant 0 : index
    %c0_44 = arith.constant 0 : index
    %73 = vector.load %arg8[%c2, %c0_43, %c0_44] : memref<3x384x128xbf16, #tpu.memory_space<vmem>>, vector<1x384x128xbf16>
    %74 = vector.shape_cast %73 : vector<1x384x128xbf16> to vector<384x128xbf16>
    %cst_45 = arith.constant dense<0.000000e+00> : vector<256x128xf32>
    %75 = tpu.matmul %72, %74, %cst_45 {dimension_numbers = #tpu.dot_dimension_numbers<[1], [0], [0], [1], [0, 0, 1, 1], [], []>} : vector<256x384xbf16>, vector<384x128xbf16>, vector<256x128xf32> -> vector<256x128xf32>
    %76 = arith.addf %71, %75 : vector<256x128xf32>
    %c0_46 = arith.constant 0 : index
    %c0_47 = arith.constant 0 : index
    %77 = vector.load %arg9[%c0_46, %c0_47] : memref<1x128xf32, #tpu.memory_space<vmem>>, vector<1x128xf32>
    %78 = vector.broadcast %77 : vector<1x128xf32> to vector<256x128xf32>
    %79 = arith.mulf %76, %78 : vector<256x128xf32>
    %c0_48 = arith.constant 0 : index
    %c0_49 = arith.constant 0 : index
    %80 = vector.load %arg10[%c0_48, %c0_49] : memref<1x128xf32, #tpu.memory_space<vmem>>, vector<1x128xf32>
    %81 = vector.broadcast %80 : vector<1x128xf32> to vector<256x128xf32>
    %82 = arith.addf %79, %81 : vector<256x128xf32>
    %cst_50 = arith.constant 0.000000e+00 : f32
    %83 = vector.broadcast %cst_50 : f32 to vector<256x128xf32>
    %84 = arith.maximumf %82, %83 : vector<256x128xf32>
    %85 = arith.truncf %84 : vector<256x128xf32> to vector<256x128xbf16>
    %c0_51 = arith.constant 0 : index
    %c0_52 = arith.constant 0 : index
    %86 = vector.load %arg11[%c0_51, %c0_52] : memref<128x256xbf16, #tpu.memory_space<vmem>>, vector<128x256xbf16>
    %cst_53 = arith.constant dense<0.000000e+00> : vector<256x256xf32>
    %87 = tpu.matmul %85, %86, %cst_53 {dimension_numbers = #tpu.dot_dimension_numbers<[1], [0], [0], [1], [0, 0, 1, 1], [], []>} : vector<256x128xbf16>, vector<128x256xbf16>, vector<256x256xf32> -> vector<256x256xf32>
    %c0_54 = arith.constant 0 : index
    %c0_55 = arith.constant 0 : index
    %88 = vector.load %arg12[%c0_54, %c0_55] : memref<1x256xf32, #tpu.memory_space<vmem>>, vector<1x256xf32>
    %89 = vector.broadcast %88 : vector<1x256xf32> to vector<256x256xf32>
    %90 = arith.mulf %87, %89 : vector<256x256xf32>
    %c0_56 = arith.constant 0 : index
    %c0_57 = arith.constant 0 : index
    %91 = vector.load %arg13[%c0_56, %c0_57] : memref<1x256xf32, #tpu.memory_space<vmem>>, vector<1x256xf32>
    %92 = vector.broadcast %91 : vector<1x256xf32> to vector<256x256xf32>
    %93 = arith.addf %90, %92 : vector<256x256xf32>
    %cst_58 = arith.constant 0.000000e+00 : f32
    %94 = vector.broadcast %cst_58 : f32 to vector<256x256xf32>
    %95 = arith.maximumf %93, %94 : vector<256x256xf32>
    %96 = vector.shape_cast %1 : vector<16x16x64xbf16> to vector<256x64xbf16>
    %c0_59 = arith.constant 0 : index
    %c0_60 = arith.constant 0 : index
    %97 = vector.load %arg14[%c0_59, %c0_60] : memref<64x256xbf16, #tpu.memory_space<vmem>>, vector<64x256xbf16>
    %cst_61 = arith.constant dense<0.000000e+00> : vector<256x256xf32>
    %98 = tpu.matmul %96, %97, %cst_61 {dimension_numbers = #tpu.dot_dimension_numbers<[1], [0], [0], [1], [0, 0, 1, 1], [], []>} : vector<256x64xbf16>, vector<64x256xbf16>, vector<256x256xf32> -> vector<256x256xf32>
    %c0_62 = arith.constant 0 : index
    %c0_63 = arith.constant 0 : index
    %99 = vector.load %arg15[%c0_62, %c0_63] : memref<1x256xf32, #tpu.memory_space<vmem>>, vector<1x256xf32>
    %100 = vector.broadcast %99 : vector<1x256xf32> to vector<256x256xf32>
    %101 = arith.mulf %98, %100 : vector<256x256xf32>
    %c0_64 = arith.constant 0 : index
    %c0_65 = arith.constant 0 : index
    %102 = vector.load %arg16[%c0_64, %c0_65] : memref<1x256xf32, #tpu.memory_space<vmem>>, vector<1x256xf32>
    %103 = vector.broadcast %102 : vector<1x256xf32> to vector<256x256xf32>
    %104 = arith.addf %101, %103 : vector<256x256xf32>
    %105 = arith.addf %95, %104 : vector<256x256xf32>
    %cst_66 = arith.constant 0.000000e+00 : f32
    %106 = vector.broadcast %cst_66 : f32 to vector<256x256xf32>
    %107 = arith.maximumf %105, %106 : vector<256x256xf32>
    %108 = vector.shape_cast %107 : vector<256x256xf32> to vector<1x16x16x256xf32>
    %c0_67 = arith.constant 0 : index
    %c0_68 = arith.constant 0 : index
    %c0_69 = arith.constant 0 : index
    %c0_70 = arith.constant 0 : index
    %109 = vector.load %arg17[%c0_67, %c0_68, %c0_69, %c0_70] : memref<1x16x16x256xf32, #tpu.memory_space<vmem>>, vector<1x16x16x256xf32>
    tpu.vector_store %arg17[%c0_67, %c0_68, %c0_69, %c0_70], %108 {strides = array<i32>} : memref<1x16x16x256xf32, #tpu.memory_space<vmem>>, vector<1x16x16x256xf32>,
    return
  }
  func.func @transform_0(%arg0: i32, %arg1: i32) -> (i32, i32, i32, i32) {
    %c16_i32 = arith.constant 16 : i32
    %0 = arith.muli %arg1, %c16_i32 : i32
    %c1_i32 = arith.constant 1 : i32
    %1 = arith.subi %0, %c1_i32 : i32
    %c0_i32 = arith.constant 0 : i32
    %2 = arith.maxsi %1, %c0_i32 : i32
    %c0_i32_0 = arith.constant 0 : i32
    %c0_i32_1 = arith.constant 0 : i32
    %c0_i32_2 = arith.constant 0 : i32
    return %arg0, %2, %c0_i32_0, %c0_i32_1 : i32, i32, i32, i32
  }
  func.func @transform_1(%arg0: i32, %arg1: i32) -> (i32, i32, i32, i32) {
    %c0_i32 = arith.constant 0 : i32
    %c0_i32_0 = arith.constant 0 : i32
    %c0_i32_1 = arith.constant 0 : i32
    return %arg0, %arg1, %c0_i32, %c0_i32_0 : i32, i32, i32, i32
  }
  func.func @transform_2(%arg0: i32, %arg1: i32) -> (i32, i32, i32, i32) {
    %c1_i32 = arith.constant 1 : i32
    %0 = arith.addi %arg1, %c1_i32 : i32
    %c16_i32 = arith.constant 16 : i32
    %1 = arith.muli %0, %c16_i32 : i32
    %c15_i32 = arith.constant 15 : i32
    %2 = arith.minsi %1, %c15_i32 : i32
    %c0_i32 = arith.constant 0 : i32
    %c0_i32_0 = arith.constant 0 : i32
    %c0_i32_1 = arith.constant 0 : i32
    return %arg0, %2, %c0_i32, %c0_i32_0 : i32, i32, i32, i32
  }
  func.func @transform_3(%arg0: i32, %arg1: i32) -> (i32, i32) {
    %c0_i32 = arith.constant 0 : i32
    %c0_i32_0 = arith.constant 0 : i32
    %c0_i32_1 = arith.constant 0 : i32
    return %c0_i32, %c0_i32_0 : i32, i32
  }
  func.func @transform_4(%arg0: i32, %arg1: i32) -> (i32, i32) {
    %c0_i32 = arith.constant 0 : i32
    %c0_i32_0 = arith.constant 0 : i32
    %c0_i32_1 = arith.constant 0 : i32
    return %c0_i32, %c0_i32_0 : i32, i32
  }
  func.func @transform_5(%arg0: i32, %arg1: i32) -> (i32, i32) {
    %c0_i32 = arith.constant 0 : i32
    %c0_i32_0 = arith.constant 0 : i32
    %c0_i32_1 = arith.constant 0 : i32
    return %c0_i32, %c0_i32_0 : i32, i32
  }
  func.func @transform_6(%arg0: i32, %arg1: i32) -> (i32, i32, i32) {
    %c0_i32 = arith.constant 0 : i32
    %c0_i32_0 = arith.constant 0 : i32
    %c0_i32_1 = arith.constant 0 : i32
    %c0_i32_2 = arith.constant 0 : i32
    return %c0_i32, %c0_i32_0, %c0_i32_1 : i32, i32, i32
  }
  func.func @transform_7(%arg0: i32, %arg1: i32) -> (i32, i32) {
    %c0_i32 = arith.constant 0 : i32
    %c0_i32_0 = arith.constant 0 : i32
    %c0_i32_1 = arith.constant 0 : i32
    return %c0_i32, %c0_i32_0 : i32, i32
  }
  func.func @transform_8(%arg0: i32, %arg1: i32) -> (i32, i32) {
    %c0_i32 = arith.constant 0 : i32
    %c0_i32_0 = arith.constant 0 : i32
    %c0_i32_1 = arith.constant 0 : i32
    return %c0_i32, %c0_i32_0 : i32, i32
  }
  func.func @transform_9(%arg0: i32, %arg1: i32) -> (i32, i32) {
    %c0_i32 = arith.constant 0 : i32
    %c0_i32_0 = arith.constant 0 : i32
    %c0_i32_1 = arith.constant 0 : i32
    return %c0_i32, %c0_i32_0 : i32, i32
  }
  func.func @transform_10(%arg0: i32, %arg1: i32) -> (i32, i32) {
    %c0_i32 = arith.constant 0 : i32
    %c0_i32_0 = arith.constant 0 : i32
    %c0_i32_1 = arith.constant 0 : i32
    return %c0_i32, %c0_i32_0 : i32, i32
  }
  func.func @transform_11(%arg0: i32, %arg1: i32) -> (i32, i32) {
    %c0_i32 = arith.constant 0 : i32
    %c0_i32_0 = arith.constant 0 : i32
    %c0_i32_1 = arith.constant 0 : i32
    return %c0_i32, %c0_i32_0 : i32, i32
  }
  func.func @transform_12(%arg0: i32, %arg1: i32) -> (i32, i32) {
    %c0_i32 = arith.constant 0 : i32
    %c0_i32_0 = arith.constant 0 : i32
    %c0_i32_1 = arith.constant 0 : i32
    return %c0_i32, %c0_i32_0 : i32, i32
  }
  func.func @transform_13(%arg0: i32, %arg1: i32) -> (i32, i32) {
    %c0_i32 = arith.constant 0 : i32
    %c0_i32_0 = arith.constant 0 : i32
    %c0_i32_1 = arith.constant 0 : i32
    return %c0_i32, %c0_i32_0 : i32, i32
  }
  func.func @transform_14(%arg0: i32, %arg1: i32) -> (i32, i32) {
    %c0_i32 = arith.constant 0 : i32
    %c0_i32_0 = arith.constant 0 : i32
    %c0_i32_1 = arith.constant 0 : i32
    return %c0_i32, %c0_i32_0 : i32, i32
  }
  func.func @transform_15(%arg0: i32, %arg1: i32) -> (i32, i32, i32, i32) {
    %c0_i32 = arith.constant 0 : i32
    %c0_i32_0 = arith.constant 0 : i32
    %c0_i32_1 = arith.constant 0 : i32
    return %arg0, %arg1, %c0_i32, %c0_i32_0 : i32, i32, i32, i32
  }
}

</mosaic_0001>

<bundles_post_ra>
// kernel: block_forward.1
= control target key start
LH: loop header
LB: loop body
LE: loop exit
PB: predicated region body
PF: predicated region fallthrough
CT: control target
= control target key end

     0   :  { %s8821_s0 = inlined_call_operand.hbm [shape: bf16[2,16,16,64], index: 0, kind: input, shape index: {}, may-alias: {0,1,2}]   ;;  %s8822_s1 = inlined_call_operand.hbm [shape: bf16[2,16,16,64], index: 1, kind: input, shape index: {}, may-alias: {0,1,2}]   ;;  %s8823_s2 = inlined_call_operand.hbm [shape: bf16[2,16,16,64], index: 2, kind: input, shape index: {}, may-alias: {0,1,2}]   ;;  %s8824_s3 = inlined_call_operand.hbm [shape: bf16[64,128], index: 3, kind: input, shape index: {}]   ;;  %s8825_s4 = inlined_call_operand.hbm [shape: f32[1,128], index: 4, kind: input, shape index: {}]   ;;  %s8826_s5 = inlined_call_operand.hbm [shape: f32[1,128], index: 5, kind: input, shape index: {}]   ;;  %s8827_s6 = inlined_call_operand.hbm [shape: bf16[3,384,128], index: 6, kind: input, shape index: {}]   ;;  %s8828_s7 = inlined_call_operand.hbm [shape: f32[1,128], index: 7, kind: input, shape index: {}]   ;;  %s8829_s8 = inlined_call_operand.hbm [shape: f32[1,128], index: 8, kind: input, shape index: {}]   ;;  %s8830_s9 = inlined_call_operand.hbm [shape: bf16[128,256], index: 9, kind: input, shape index: {}]   ;;  %s8831_s10 = inlined_call_operand.hbm [shape: f32[1,256], index: 10, kind: input, shape index: {}]   ;;  %s8832_s11 = inlined_call_operand.hbm [shape: f32[1,256], index: 11, kind: input, shape index: {}]   ;;  %s8833_s12 = inlined_call_operand.hbm [shape: bf16[64,256], index: 12, kind: input, shape index: {}]   ;;  %s8834_s13 = inlined_call_operand.hbm [shape: f32[1,256], index: 13, kind: input, shape index: {}]   ;;  %s8835_s14 = inlined_call_operand.hbm [shape: f32[1,256], index: 14, kind: input, shape index: {}]   ;;  %s8836_s15 = inlined_call_operand.hbm [shape: f32[2,16,16,256], index: 15, kind: output, shape index: {}]  }
   0x1   :  { %8880 = sst [smem:[#allocation68_spill]] %s8821_s0 }
   0x2   :  { %8881 = sst [smem:[#allocation69_spill]] %s8822_s1 }
   0x3   :  { %8882 = sst [smem:[#allocation70_spill]] %s8823_s2 }
   0x4   :  { %8883 = sst [smem:[#allocation71_spill]] %s8824_s3 }
   0x5   :  { %8884 = sst [smem:[#allocation72_spill]] %s8825_s4 }
   0x6   :  { %8885 = sst [smem:[#allocation73_spill]] %s8826_s5 }
   0x7   :  { %8886 = sst [smem:[#allocation74_spill]] %s8827_s6 }
   0x8   :  { %8887 = sst [smem:[#allocation75_spill]] %s8828_s7 }
   0x9   :  { %8888 = sst [smem:[#allocation76_spill]] %s8829_s8 }
   0xa   :  { %8889 = sst [smem:[#allocation77_spill]] %s8830_s9 }
   0xb   :  { %8890 = sst [smem:[#allocation78_spill]] %s8831_s10 }
   0xc   :  { %8891 = sst [smem:[#allocation79_spill]] %s8832_s11 }
   0xd   :  { %8892 = sst [smem:[#allocation80_spill]] %s8833_s12 }
   0xe   :  { %8893 = sst [smem:[#allocation81_spill]] %s8834_s13 }
   0xf   :  { %8894 = sst [smem:[#allocation82_spill]] %s8835_s14 }
  0x10   :  { %8895 = sst [smem:[#allocation83_spill]] %s8836_s15 }
  0x11   :  { %20 = vsyncpa [#allocation3], 0 }
  0x12   :  { %22 = vsyncpa [#allocation3 + $0x1], 0 }
  0x13   :  { %23 = vsyncpa [#allocation6], 0 }
  0x14   :  { %25 = vsyncpa [#allocation6 + $0x1], 0 }
  0x15   :  { %26 = vsyncpa [#allocation9], 0 }
  0x16   :  { %27 = vsyncpa [#allocation12], 0 }
  0x17   :  { %28 = vsyncpa [#allocation15], 0 }
  0x18   :  { %29 = vsyncpa [#allocation18], 0 }
  0x19   :  { %30 = vsyncpa [#allocation21], 0 }
  0x1a   :  { %31 = vsyncpa [#allocation24], 0 }
  0x1b   :  { %32 = vsyncpa [#allocation4], 0 }
  0x1c   :  { %34 = vsyncpa [#allocation4 + $0x1], 0  ;;  %s6739_s18 = smov 0   ;;  %s6741_s19 = smov 0  }
  0x1d   :  { %s6743_s20 = smov 0   ;;  %s6745_s21 = smov 0  }
  0x1e   :  { %s6747_s22 = smov 0   ;;  %s6749_s23 = smov 0  }
  0x1f LB: > { %8896 = sst [smem:[#allocation36_spill]] %s6620_s20  ;;  %s6770_s24 = sadd.s32 4294967295, %s6632_s23   ;;  %s6632_s23 = sphi %s6749_s23, %s40_s23   ;;  %s6628_s22 = sphi %s6747_s22, %s9027_s22   ;;  %s6624_s21 = sphi %s6745_s21, %s9026_s21   ;;  %s6620_s20 = sphi %s6743_s20, %s9025_s20   ;;  %s6616_s19 = sphi %s6741_s19, %s9029_s19   ;;  %s6612_s18 = sphi %s6739_s18, %s9028_s18  }
  0x20   : > { %8897 = sst [smem:[#allocation37_spill]] %s6624_s21  ;;  %p4719_p0 = scmp.ge.s32.totalorder %s6632_s23, 1 }
  0x21   : > { %8898 = sst [smem:[#allocation38_spill]] %s6628_s22  ;;  %p8845_p1 = scmp.eq.s32.totalorder %s6770_s24, 0 }
  0x22   : > { %p437_p2 = scmp.lt.s32.totalorder %s6632_s23, 3  ;;  %s6634_s26 = smov [#allocation8]  }
  0x23   : > { %s449_s27 = sshll.u32 %s6634_s26, 4  ;;  %s6635_s29 = smov [#allocation11]   ;;  %s6779_s27 = int_to_ptr.vmem [resolvable:$true] %s449_s27 }
  0x24   : > { %p6775_p3 = pnand %p4719_p0, %p437_p2  ;;  %s474_s30 = sshll.u32 %s6635_s29, 4  ;;  %s6790_s30 = int_to_ptr.vmem [resolvable:$true] %s474_s30 }
  0x25   : > { %s6636_s16 = smov [#allocation14]   ;;  %s8902_s3 = sld [smem:[#allocation71_spill]] }
  0x26   : > { %s8899_s25 = scalar_select %p6775_p3, 1, 0 }
  0x27   : > { %p5804_p4 = pneg %p6775_p3  ;;  %s6792_s17 = sshll.u32 %s6636_s16, 4  ;;  %s499_s17 = int_to_ptr.vmem [resolvable:$true] %s6792_s17 }
  0x28   : > { %8900 = sst [smem:[#allocation39_spill]] %s8899_s25 }
  0x29   : > { %p6786_p6 = pnand %p5804_p4, %p8845_p1 }
  0x2b   : > { %s8901_s28 = scalar_select %p6786_p6, 1, 0 }
  0x2c   : > { %s6096_s21 = scalar_lea.hbm %s8902_s3, 512  ;;  %p6802_p8 = pneg %p6786_p6 }
  0x2d   : > { %p6097_p7 = scmp.ne.s32.totalorder %s8902_s3, %s6096_s21  ;;  %p6103_p11 = scmp.lt.u32.totalorder %s6096_s21, %s8902_s3 }
  0x2e   : > { %s8903_s0 = scalar_select %p6802_p8, 1, 0 }
  0x2f   : > { %p6099_p9 = pnand %p6802_p8, %p6097_p7 }
  0x31   : > { %p6100_p10 = pneg %p6099_p9 }
  0x33   : > { %p6105_p12 = pnand %p6103_p11, %p6100_p10 }
  0x35   : > { %6108 = shalt.err (!%p6105_p12)
}
  0x36   : > { %s6109_s2 = scalar_lea.vmem %s6779_s27, 512  ;;  %p6117_p4 = scmp.lt.s32.totalorder %s6779_s27, %s6779_s27 }
  0x37   : > { %p6110_p13 = scmp.ne.s32.totalorder %s6779_s27, %s6109_s2  ;;  %p6118_p5 = scmp.lt.s32.totalorder %s6109_s2, %s6109_s2 }
  0x39   : > { %p6112_p0 = pnand %p6110_p13, %p6802_p8  ;;  %p6119_p7 = por %p6118_p5, %p6117_p4 }
  0x3b   : > { %p6113_p2 = pneg %p6112_p0 }
  0x3d   : > { %p6120_p9 = pnand %p6119_p7, %p6113_p2 }
  0x3f   : > { %6123 = shalt.err (!%p6120_p9)
}
  0x40   : > { %s8847_s15 = smov 64   ;;  %s8849_s21 = smov 4  }
  0x41   : > { %5807 = dma.hbm_to_vmem [thread:$0]  (!%p6786_p6), %s8902_s3, 512, %s6779_s27, [#allocation9], %s8847_s15, %s8847_s15, %s8849_s21  }
  0x42   : > { %s8904_s5 = sld [smem:[#allocation73_spill]] }
  0x48   : > { %s6124_s2 = scalar_lea.hbm %s8904_s5, 16 }
  0x49   : > { %p6125_p5 = scmp.ne.s32.totalorder %s8904_s5, %s6124_s2  ;;  %p6131_p12 = scmp.lt.u32.totalorder %s6124_s2, %s8904_s5 }
  0x4b   : > { %p6127_p10 = pnand %p6125_p5, %p6802_p8 }
  0x4d   : > { %p6128_p11 = pneg %p6127_p10 }
  0x4f   : > { %p6133_p13 = pnand %p6131_p12, %p6128_p11 }
  0x51   : > { %6136 = shalt.err (!%p6133_p13)
}
  0x52   : > { %s6137_s27 = scalar_lea.vmem %s6790_s30, 16  ;;  %s6144_s12 = scalar_lea.vmem %s6790_s30, 32 }
  0x53   : > { %p6138_p0 = scmp.ne.s32.totalorder %s6790_s30, %s6137_s27  ;;  %p6145_p7 = scmp.lt.s32.totalorder %s6790_s30, %s6790_s30 }
  0x54   : > { %p6146_p9 = scmp.lt.s32.totalorder %s6144_s12, %s6137_s27 }
  0x55   : > { %p6140_p2 = pnand %p6138_p0, %p6802_p8 }
  0x56   : > { %p6147_p5 = por %p6146_p9, %p6145_p7 }
  0x57   : > { %p6141_p4 = pneg %p6140_p2 }
  0x59   : > { %p6148_p10 = pnand %p6147_p5, %p6141_p4 }
  0x5b   : > { %6151 = shalt.err (!%p6148_p10)
}
  0x5c   : > { %5813 = dma.hbm_to_vmem [thread:$0]  (!%p6786_p6), %s8904_s5, 16, %s6790_s30, [#allocation12]  }
  0x5d   : > { %s8905_s7 = sld [smem:[#allocation75_spill]] }
  0x63   : > { %s6152_s26 = scalar_lea.hbm %s8905_s7, 16 }
  0x64   : > { %p6153_p11 = scmp.ne.s32.totalorder %s8905_s7, %s6152_s26  ;;  %p6159_p0 = scmp.lt.u32.totalorder %s6152_s26, %s8905_s7 }
  0x66   : > { %p6155_p12 = pnand %p6153_p11, %p6802_p8 }
  0x68   : > { %p6156_p13 = pneg %p6155_p12 }
  0x6a   : > { %p6161_p2 = pnand %p6159_p0, %p6156_p13 }
  0x6c   : > { %6164 = shalt.err (!%p6161_p2)
}
  0x6d   : > { %s6165_s12 = scalar_lea.vmem %s499_s17, 16  ;;  %s6172_s30 = scalar_lea.vmem %s499_s17, 32 }
  0x6e   : > { %p6166_p4 = scmp.ne.s32.totalorder %s499_s17, %s6165_s12  ;;  %p6173_p5 = scmp.lt.s32.totalorder %s499_s17, %s499_s17 }
  0x6f   : > { %p6174_p10 = scmp.lt.s32.totalorder %s6172_s30, %s6165_s12 }
  0x70   : > { %p6168_p7 = pnand %p6166_p4, %p6802_p8 }
  0x71   : > { %p6175_p1 = por %p6174_p10, %p6173_p5 }
  0x72   : > { %p6169_p9 = pneg %p6168_p7 }
  0x74   : > { %p6176_p3 = pnand %p6175_p1, %p6169_p9 }
  0x76   : > { %6179 = shalt.err (!%p6176_p3)
}
  0x77   : > { %5819 = dma.hbm_to_vmem [thread:$0]  (!%p6786_p6), %s8905_s7, 16, %s499_s17, [#allocation15]  }
  0x78   : > { %s6639_s14 = smov [#allocation17]   ;;  %s8906_s9 = sld [smem:[#allocation77_spill]] }
  0x79   : > { %s519_s25 = sshll.u32 %s6639_s14, 4  ;;  %s520_s25 = int_to_ptr.vmem [resolvable:$true] %s519_s25 }
  0x7e   : > { %s6180_s16 = scalar_lea.hbm %s8906_s9, 2048 }
  0x7f   : > { %p6181_p11 = scmp.ne.s32.totalorder %s8906_s9, %s6180_s16  ;;  %p6187_p12 = scmp.lt.u32.totalorder %s6180_s16, %s8906_s9 }
  0x81   : > { %p6183_p1 = pnand %p6181_p11, %p6802_p8 }
  0x83   : > { %p6184_p3 = pneg %p6183_p1 }
  0x85   : > { %p6189_p13 = pnand %p6187_p12, %p6184_p3 }
  0x87   : > { %6192 = shalt.err (!%p6189_p13)
}
  0x88   : > { %s6193_s17 = scalar_lea.vmem %s520_s25, 2048  ;;  %p6201_p7 = scmp.lt.s32.totalorder %s520_s25, %s520_s25 }
  0x89   : > { %p6194_p0 = scmp.ne.s32.totalorder %s520_s25, %s6193_s17  ;;  %p6202_p9 = scmp.lt.s32.totalorder %s6193_s17, %s6193_s17 }
  0x8b   : > { %p6196_p2 = pnand %p6194_p0, %p6802_p8  ;;  %p6203_p5 = por %p6202_p9, %p6201_p7 }
  0x8d   : > { %p6197_p4 = pneg %p6196_p2 }
  0x8f   : > { %p6204_p10 = pnand %p6203_p5, %p6197_p4 }
  0x91   : > { %6207 = shalt.err (!%p6204_p10)
}
  0x92   : > { %s8851_s8 = smov 128   ;;  %s8852_s10 = smov 8  }
  0x93   : > { %5825 = dma.hbm_to_vmem [thread:$0]  (!%p6786_p6), %s8906_s9, 2048, %s520_s25, [#allocation18], %s8851_s8, %s8851_s8, %s8852_s10  }
  0x94   : > { %s6642_s29 = smov [#allocation20]   ;;  %s6643_s2 = smov [#allocation23]  }
  0x95   : > { %s544_s16 = sshll.u32 %s6642_s29, 4  ;;  %s568_s27 = sshll.u32 %s6643_s2, 4  ;;  %s545_s16 = int_to_ptr.vmem [resolvable:$true] %s544_s16  ;;  %s6890_s27 = int_to_ptr.vmem [resolvable:$true] %s568_s27 }
  0x96   : > { %s8907_s11 = sld [smem:[#allocation79_spill]] }
  0x9c   : > { %s6208_s17 = scalar_lea.hbm %s8907_s11, 32 }
  0x9d   : > { %p6209_p11 = scmp.ne.s32.totalorder %s8907_s11, %s6208_s17  ;;  %p6215_p12 = scmp.lt.u32.totalorder %s6208_s17, %s8907_s11 }
  0x9f   : > { %p6211_p1 = pnand %p6209_p11, %p6802_p8 }
  0xa1   : > { %p6212_p3 = pneg %p6211_p1 }
  0xa3   : > { %p6217_p13 = pnand %p6215_p12, %p6212_p3 }
  0xa5   : > { %6220 = shalt.err (!%p6217_p13)
}
  0xa6   : > { %s6221_s26 = scalar_lea.vmem %s545_s16, 32  ;;  %p6229_p7 = scmp.lt.s32.totalorder %s545_s16, %s545_s16 }
  0xa7   : > { %p6222_p0 = scmp.ne.s32.totalorder %s545_s16, %s6221_s26  ;;  %p6230_p9 = scmp.lt.s32.totalorder %s6221_s26, %s6221_s26 }
  0xa9   : > { %p6224_p2 = pnand %p6222_p0, %p6802_p8  ;;  %p6231_p5 = por %p6230_p9, %p6229_p7 }
  0xab   : > { %p6225_p4 = pneg %p6224_p2 }
  0xad   : > { %p6232_p10 = pnand %p6231_p5, %p6225_p4 }
  0xaf   : > { %6235 = shalt.err (!%p6232_p10)
}
  0xb0   : > { %5831 = dma.hbm_to_vmem [thread:$0]  (!%p6786_p6), %s8907_s11, 32, %s545_s16, [#allocation21]  }
  0xb1   : > { %s8908_s13 = sld [smem:[#allocation81_spill]] }
  0xb7   : > { %s6236_s12 = scalar_lea.hbm %s8908_s13, 32 }
  0xb8   : > { %p6237_p11 = scmp.ne.s32.totalorder %s8908_s13, %s6236_s12  ;;  %p6243_p12 = scmp.lt.u32.totalorder %s6236_s12, %s8908_s13 }
  0xba   : > { %p6239_p1 = pnand %p6237_p11, %p6802_p8 }
  0xbc   : > { %p6240_p3 = pneg %p6239_p1 }
  0xbe   : > { %p6245_p13 = pnand %p6243_p12, %p6240_p3 }
  0xc0   : > { %6248 = shalt.err (!%p6245_p13)
}
  0xc1   : > { %s6249_s16 = scalar_lea.vmem %s6890_s27, 32  ;;  %p6257_p7 = scmp.lt.s32.totalorder %s6890_s27, %s6890_s27 }
  0xc2   : > { %p6250_p0 = scmp.ne.s32.totalorder %s6890_s27, %s6249_s16  ;;  %p6258_p9 = scmp.lt.s32.totalorder %s6249_s16, %s6249_s16 }
  0xc4   : > { %p6252_p2 = pnand %p6250_p0, %p6802_p8  ;;  %p6259_p5 = por %p6258_p9, %p6257_p7 }
  0xc6   : > { %p6253_p4 = pneg %p6252_p2 }
  0xc8   : > { %p6260_p10 = pnand %p6259_p5, %p6253_p4 }
  0xca   : > { %6263 = shalt.err (!%p6260_p10)
}
  0xcb   : > { %5837 = dma.hbm_to_vmem [thread:$0]  (!%p6786_p6), %s8908_s13, 32, %s6890_s27, [#allocation24]  }
  0xcc   : > { %s4718_s21 = sadd.s32 4294967294, %s6632_s23   ;;  %s52_s29 = sadd.s32 1, %s6628_s22 }
  0xcd   : > { %p54_p11 = scmp.ge.s32.totalorder %s52_s29, 2  ;;  %s69_s2 = sadd.s32 1, %s6620_s20 }
  0xce   : > { %p76_p1 = scmp.ne.s32.totalorder %s6620_s20, %s6616_s19  ;;  %p77_p3 = scmp.eq.s32.totalorder %s6632_s23, 0 }
  0xcf   : > { %s9031_s29 = smov (%p54_p11, %s52_s29), 0  ;;  %p82_p13 = scmp.ne.s32.totalorder %s6616_s19, %s6612_s18 }
  0xd0   : > { %8909 = sst [smem:[#allocation40_spill]] %s9031_s29  ;;  %p6941_p12 = por %p77_p3, %p76_p1 }
  0xd1   : > { %s64_s27 = ssub.s32 %s6628_s22, %s9031_s29  ;;  %p424_p0 = scmp.eq.s32.totalorder %s6770_s24, 1 }
  0xd2   : > { %p67_p2 = scmp.eq.s32.totalorder %s64_s27, 0  ;;  %p8911_p4 = scmp.eq.s32.totalorder %s6770_s24, 0 }
  0xd3   : > { %p6956_p9 = por %p424_p0, %p76_p1  ;;  %p430_p5 = scmp.eq.s32.totalorder %s4718_s21, 1 }
  0xd4   : > { %p6952_p7 = por %p8911_p4, %p82_p13  ;;  %p5867_p11 = scmp.lt.s32.totalorder %s6632_s23, 2 }
  0xd5   : > { %s8913_s17 = scalar_select %p6956_p9, 1, 0 }
  0xd6   : > { %s8912_s30 = scalar_select %p6952_p7, 1, 0 }
  0xd7   : > { %s6961_s14 = scalar_select %p67_p2, %s6620_s20, %s69_s2  }
  0xd8   : > { %p6963_p10 = por %p430_p5, %p82_p13  ;;  %s6969_s16 = sand.u32 1, %s6620_s20  }
  0xd9   : > { %8914 = sst [smem:[#allocation41_spill]] %s6961_s14  ;;  %s6972_s26 = sshll.u32 %s6628_s22, 11 }
  0xda   : > { %s8915_s25 = scalar_select %p6963_p10, 1, 0 }
  0xdb   : > { %p6976_p3 = pnand %p5867_p11, %p6941_p12  ;;  %s617_s21 = sand.u32 1, %s6632_s23  }
  0xdc   : > { %s4736_s2 = sshll.u32 %s6969_s16, 7  ;;  %s8917_s1 = sld [smem:[#allocation69_spill]] }
  0xdd   : > { %s8916_s15 = scalar_select %p6976_p3, 1, 0 }
  0xde   : > { %s621_s3 = scalar_lea.vmem [#allocation5], %s4736_s2  ;;  %s6990_s12 = scalar_lea.sflag [#allocation6], %s617_s21 }
  0xdf   : > { %s631_s5 = sshll.u32 %s621_s3, 4  ;;  %p6996_p12 = pneg %p6976_p3  ;;  %s6988_s5 = int_to_ptr.vmem [resolvable:$true] %s631_s5 }
  0xe1   : > { %s8918_s9 = scalar_select %p6996_p12, 1, 0 }
  0xe2   : > { %s6986_s10 = scalar_lea.hbm %s8917_s1, %s6972_s26  ;;  %s6269_s2 = scalar_lea.hbm %s8917_s1, 4096 }
  0xe3   : > { %s6264_s7 = scalar_lea.hbm %s6986_s10, 2048  ;;  %p6270_p2 = scmp.lt.u32.totalorder %s6986_s10, %s8917_s1 }
  0xe4   : > { %p6265_p1 = scmp.ne.s32.totalorder %s6986_s10, %s6264_s7  ;;  %p6271_p4 = scmp.lt.u32.totalorder %s6269_s2, %s6264_s7 }
  0xe5   : > { %p6273_p11 = scmp.lt.u32.totalorder %s6264_s7, %s6986_s10 }
  0xe6   : > { %p6267_p13 = pnand %p6996_p12, %p6265_p1  ;;  %p6272_p5 = por %p6271_p4, %p6270_p2 }
  0xe8   : > { %p6268_p0 = pneg %p6267_p13  ;;  %p6274_p10 = por %p6273_p11, %p6272_p5 }
  0xea   : > { %p6275_p9 = pnand %p6274_p10, %p6268_p0 }
  0xec   : > { %6278 = shalt.err (!%p6275_p9)
}
  0xed   : > { %s6279_s21 = scalar_lea.vmem %s6988_s5, 2048  ;;  %s6644_s8 = smov [#allocation5]  }
  0xee   : > { %p6280_p1 = scmp.ne.s32.totalorder %s6988_s5, %s6279_s21  ;;  %s6284_s27 = sshll.u32 %s6644_s8, 4  ;;  %s6285_s27 = int_to_ptr.vmem [resolvable:$false] %s6284_s27 }
  0xef   : > { %s6286_s11 = scalar_lea.vmem %s6285_s27, 4096  ;;  %p6287_p6 = scmp.lt.s32.totalorder %s6988_s5, %s6285_s27 }
  0xf0   : > { %p6282_p13 = pnand %p6280_p1, %p6996_p12  ;;  %p6288_p8 = scmp.lt.s32.totalorder %s6286_s11, %s6279_s21 }
  0xf2   : > { %p6283_p7 = pneg %p6282_p13  ;;  %p6289_p2 = por %p6288_p8, %p6287_p6 }
  0xf4   : > { %p6290_p4 = pnand %p6289_p2, %p6283_p7 }
  0xf6   : > { %6293 = shalt.err (!%p6290_p4)
}
  0xf7   : > { %s8919_s7 = smov 4   ;;  %s8920_s2 = smov 64  }
  0xf8   : > { %5847 = dma.hbm_to_vmem [thread:$0]  (!%p6976_p3), %s6986_s10, 2048, %s6988_s5, %s6990_s12, %s8920_s2, %s8920_s2, %s8919_s7  }
  0xf9   : > { %s6645_s3 = smov [#allocation10]   ;;  %s6646_s8 = smov [#allocation13]  }
  0xfa   : > { %s463_s1 = sshll.u32 %s6645_s3, 4  ;;  %s484_s13 = sshll.u32 %s6646_s8, 4  ;;  %s464_s1 = int_to_ptr.vmem [resolvable:$true] %s463_s1  ;;  %s485_s13 = int_to_ptr.vmem [resolvable:$true] %s484_s13 }
  0xfb   : > { %s8921_s4 = sld [smem:[#allocation72_spill]]  ;;  %p8922_p8 = scmp.ne.s32.totalorder %s8903_s0, 0 }
 0x101   : > { %s6294_s11 = scalar_lea.hbm %s8921_s4, 16 }
 0x102   : > { %p6295_p6 = scmp.ne.s32.totalorder %s8921_s4, %s6294_s11  ;;  %p6301_p10 = scmp.lt.u32.totalorder %s6294_s11, %s8921_s4 }
 0x104   : > { %p6297_p7 = pnand %p6295_p6, %p8922_p8 }
 0x106   : > { %p6298_p9 = pneg %p6297_p7 }
 0x108   : > { %p6303_p0 = pnand %p6301_p10, %p6298_p9 }
 0x10a   : > { %6306 = shalt.err (!%p6303_p0)
}
 0x10b   : > { %s6307_s5 = scalar_lea.vmem %s464_s1, 16  ;;  %s6314_s10 = scalar_lea.vmem %s464_s1, 32 }
 0x10c   : > { %p6308_p5 = scmp.ne.s32.totalorder %s464_s1, %s6307_s5  ;;  %p6315_p13 = scmp.lt.s32.totalorder %s464_s1, %s464_s1 }
 0x10d   : > { %p6316_p2 = scmp.lt.s32.totalorder %s6314_s10, %s6307_s5 }
 0x10e   : > { %p6310_p11 = pnand %p6308_p5, %p8922_p8 }
 0x10f   : > { %p6317_p4 = por %p6316_p2, %p6315_p13 }
 0x110   : > { %p6311_p1 = pneg %p6310_p11 }
 0x112   : > { %p6318_p3 = pnand %p6317_p4, %p6311_p1 }
 0x114   : > { %6321 = shalt.err (!%p6318_p3)
}
 0x115   : > { %p8923_p6 = scmp.ne.s32.totalorder %s8901_s28, 0  ;;  %s8924_s6 = sld [smem:[#allocation74_spill]] }
 0x117   : > { %5810 = dma.hbm_to_vmem [thread:$0]  (!%p8923_p6), %s8921_s4, 16, %s464_s1, [#allocation9]  }
 0x11b   : > { %s6322_s3 = scalar_lea.hbm %s8924_s6, 9216 }
 0x11c   : > { %p6323_p7 = scmp.ne.s32.totalorder %s8924_s6, %s6322_s3  ;;  %p6329_p3 = scmp.lt.u32.totalorder %s6322_s3, %s8924_s6 }
 0x11e   : > { %p6325_p9 = pnand %p6323_p7, %p8922_p8 }
 0x120   : > { %p6326_p10 = pneg %p6325_p9 }
 0x122   : > { %p6331_p0 = pnand %p6329_p3, %p6326_p10 }
 0x124   : > { %6334 = shalt.err (!%p6331_p0)
}
 0x125   : > { %s6335_s5 = scalar_lea.vmem %s485_s13, 9216  ;;  %p6343_p13 = scmp.lt.s32.totalorder %s485_s13, %s485_s13 }
 0x126   : > { %p6336_p5 = scmp.ne.s32.totalorder %s485_s13, %s6335_s5  ;;  %p6344_p2 = scmp.lt.s32.totalorder %s6335_s5, %s6335_s5 }
 0x128   : > { %p6338_p11 = pnand %p6336_p5, %p8922_p8  ;;  %p6345_p4 = por %p6344_p2, %p6343_p13 }
 0x12a   : > { %p6339_p1 = pneg %p6338_p11 }
 0x12c   : > { %p6346_p12 = pnand %p6345_p4, %p6339_p1 }
 0x12e   : > { %6349 = shalt.err (!%p6346_p12)
}
 0x12f   : > { %5816 = dma.hbm_to_vmem [thread:$0]  (!%p8923_p6), %s8924_s6, 9216, %s485_s13, [#allocation12], %s8920_s2, %s8920_s2, %s8919_s7  }
 0x130   : > { %s6647_s22 = smov [#allocation16]   ;;  %s6648_s20 = smov [#allocation19]  }
 0x131   : > { %s509_s29 = sshll.u32 %s6647_s22, 4  ;;  %s533_s14 = sshll.u32 %s6648_s20, 4  ;;  %s510_s29 = int_to_ptr.vmem [resolvable:$true] %s509_s29  ;;  %s534_s14 = int_to_ptr.vmem [resolvable:$true] %s533_s14 }
 0x132   : > { %s8925_s27 = sld [smem:[#allocation76_spill]] }
 0x138   : > { %s6350_s21 = scalar_lea.hbm %s8925_s27, 16 }
 0x139   : > { %p6351_p12 = scmp.ne.s32.totalorder %s8925_s27, %s6350_s21  ;;  %p6357_p10 = scmp.lt.u32.totalorder %s6350_s21, %s8925_s27 }
 0x13b   : > { %p6353_p7 = pnand %p6351_p12, %p8922_p8 }
 0x13d   : > { %p6354_p9 = pneg %p6353_p7 }
 0x13f   : > { %p6359_p3 = pnand %p6357_p10, %p6354_p9 }
 0x141   : > { %6362 = shalt.err (!%p6359_p3)
}
 0x142   : > { %s6363_s13 = scalar_lea.vmem %s510_s29, 16  ;;  %s6370_s10 = scalar_lea.vmem %s510_s29, 32 }
 0x143   : > { %p6364_p0 = scmp.ne.s32.totalorder %s510_s29, %s6363_s13  ;;  %p6371_p1 = scmp.lt.s32.totalorder %s510_s29, %s510_s29 }
 0x144   : > { %p6372_p13 = scmp.lt.s32.totalorder %s6370_s10, %s6363_s13 }
 0x145   : > { %p6366_p5 = pnand %p6364_p0, %p8922_p8 }
 0x146   : > { %p6373_p2 = por %p6372_p13, %p6371_p1 }
 0x147   : > { %p6367_p11 = pneg %p6366_p5 }
 0x149   : > { %p6374_p4 = pnand %p6373_p2, %p6367_p11 }
 0x14b   : > { %6377 = shalt.err (!%p6374_p4)
}
 0x14c   : > { %5822 = dma.hbm_to_vmem [thread:$0]  (!%p8923_p6), %s8925_s27, 16, %s510_s29, [#allocation15]  }
 0x14d   : > { %s8926_s8 = sld [smem:[#allocation78_spill]] }
 0x153   : > { %s6378_s21 = scalar_lea.hbm %s8926_s8, 32 }
 0x154   : > { %p6379_p12 = scmp.ne.s32.totalorder %s8926_s8, %s6378_s21  ;;  %p6385_p10 = scmp.lt.u32.totalorder %s6378_s21, %s8926_s8 }
 0x156   : > { %p6381_p7 = pnand %p6379_p12, %p8922_p8 }
 0x158   : > { %p6382_p9 = pneg %p6381_p7 }
 0x15a   : > { %p6387_p3 = pnand %p6385_p10, %p6382_p9 }
 0x15c   : > { %6390 = shalt.err (!%p6387_p3)
}
 0x15d   : > { %s6391_s10 = scalar_lea.vmem %s534_s14, 32  ;;  %p6399_p1 = scmp.lt.s32.totalorder %s534_s14, %s534_s14 }
 0x15e   : > { %p6392_p0 = scmp.ne.s32.totalorder %s534_s14, %s6391_s10  ;;  %p6400_p13 = scmp.lt.s32.totalorder %s6391_s10, %s6391_s10 }
 0x160   : > { %p6394_p5 = pnand %p6392_p0, %p8922_p8  ;;  %p6401_p2 = por %p6400_p13, %p6399_p1 }
 0x162   : > { %p6395_p11 = pneg %p6394_p5 }
 0x164   : > { %p6402_p4 = pnand %p6401_p2, %p6395_p11 }
 0x166   : > { %6405 = shalt.err (!%p6402_p4)
}
 0x167   : > { %5828 = dma.hbm_to_vmem [thread:$0]  (!%p8923_p6), %s8926_s8, 32, %s534_s14, [#allocation18]  }
 0x168   : > { %s6649_s20 = smov [#allocation22]   ;;  %s6650_s3 = smov [#allocation25]  }
 0x169   : > { %s554_s4 = sshll.u32 %s6649_s20, 4  ;;  %s579_s21 = sshll.u32 %s6650_s3, 4  ;;  %s555_s4 = int_to_ptr.vmem [resolvable:$true] %s554_s4  ;;  %s580_s21 = int_to_ptr.vmem [resolvable:$true] %s579_s21 }
 0x16a   : > { %s8927_s1 = sld [smem:[#allocation80_spill]] }
 0x170   : > { %s6406_s13 = scalar_lea.hbm %s8927_s1, 1024 }
 0x171   : > { %p6407_p12 = scmp.ne.s32.totalorder %s8927_s1, %s6406_s13  ;;  %p6413_p10 = scmp.lt.u32.totalorder %s6406_s13, %s8927_s1 }
 0x173   : > { %p6409_p7 = pnand %p6407_p12, %p8922_p8 }
 0x175   : > { %p6410_p9 = pneg %p6409_p7 }
 0x177   : > { %p6415_p3 = pnand %p6413_p10, %p6410_p9 }
 0x179   : > { %6418 = shalt.err (!%p6415_p3)
}
 0x17a   : > { %s6419_s14 = scalar_lea.vmem %s555_s4, 1024  ;;  %p6427_p1 = scmp.lt.s32.totalorder %s555_s4, %s555_s4 }
 0x17b   : > { %p6420_p0 = scmp.ne.s32.totalorder %s555_s4, %s6419_s14  ;;  %p6428_p13 = scmp.lt.s32.totalorder %s6419_s14, %s6419_s14 }
 0x17d   : > { %p6422_p5 = pnand %p6420_p0, %p8922_p8  ;;  %p6429_p2 = por %p6428_p13, %p6427_p1 }
 0x17f   : > { %p6423_p11 = pneg %p6422_p5 }
 0x181   : > { %p6430_p4 = pnand %p6429_p2, %p6423_p11 }
 0x183   : > { %6433 = shalt.err (!%p6430_p4)
}
 0x184   : > { %s8928_s6 = smov 8   ;;  %s8929_s22 = smov 128  }
 0x185   : > { %5834 = dma.hbm_to_vmem [thread:$0]  (!%p8923_p6), %s8927_s1, 1024, %s555_s4, [#allocation21], %s8929_s22, %s8929_s22, %s8928_s6  }
 0x186   : > { %s8930_s5 = sld [smem:[#allocation82_spill]] }
 0x18c   : > { %s6434_s13 = scalar_lea.hbm %s8930_s5, 32 }
 0x18d   : > { %p6435_p12 = scmp.ne.s32.totalorder %s8930_s5, %s6434_s13  ;;  %p6441_p10 = scmp.lt.u32.totalorder %s6434_s13, %s8930_s5 }
 0x18f   : > { %p6437_p7 = pnand %p6435_p12, %p8922_p8 }
 0x191   : > { %p6438_p9 = pneg %p6437_p7 }
 0x193   : > { %p6443_p3 = pnand %p6441_p10, %p6438_p9 }
 0x195   : > { %6446 = shalt.err (!%p6443_p3)
}
 0x196   : > { %s6447_s27 = scalar_lea.vmem %s580_s21, 32  ;;  %p6455_p1 = scmp.lt.s32.totalorder %s580_s21, %s580_s21 }
 0x197   : > { %p6448_p0 = scmp.ne.s32.totalorder %s580_s21, %s6447_s27  ;;  %p6456_p13 = scmp.lt.s32.totalorder %s6447_s27, %s6447_s27 }
 0x199   : > { %p6450_p5 = pnand %p6448_p0, %p8922_p8  ;;  %p6457_p2 = por %p6456_p13, %p6455_p1 }
 0x19b   : > { %p6451_p11 = pneg %p6450_p5 }
 0x19d   : > { %p6458_p4 = pnand %p6457_p2, %p6451_p11 }
 0x19f   : > { %6461 = shalt.err (!%p6458_p4)
}
 0x1a0   : > { %5840 = dma.hbm_to_vmem [thread:$0]  (!%p8923_p6), %s8930_s5, 32, %s580_s21, [#allocation24]  }
 0x1a1   : > { %s4733_s8 = sshll.u32 %s6969_s16, 3  ;;  %s8931_s20 = sld [smem:[#allocation68_spill]] }
 0x1a2   : > { %s594_s13 = scalar_lea.vmem [#allocation2], %s4733_s8  ;;  %s645_s10 = scalar_lea.vmem [#allocation7], %s4733_s8 }
 0x1a3   : > { %s607_s28 = sshll.u32 %s594_s13, 4  ;;  %s658_s29 = sshll.u32 %s645_s10, 4  ;;  %s7144_s28 = int_to_ptr.vmem [resolvable:$true] %s607_s28  ;;  %s7146_s29 = int_to_ptr.vmem [resolvable:$true] %s658_s29 }
 0x1a4   : > { %s591_s14 = scalar_lea.sflag [#allocation3], %s6969_s16  ;;  %p8933_p6 = scmp.ne.s32.totalorder %s8918_s9, 0 }
 0x1a7   : > { %s8932_s3 = smov %s8931_s20  ;;  %s7142_s11 = scalar_lea.hbm %s8931_s20, %s6972_s26 }
 0x1a8   : > { %s6462_s21 = scalar_lea.hbm %s7142_s11, 128  ;;  %s6467_s6 = scalar_lea.hbm %s8932_s3, 4096 }
 0x1a9   : > { %p6463_p8 = scmp.ne.s32.totalorder %s7142_s11, %s6462_s21  ;;  %p6468_p9 = scmp.lt.u32.totalorder %s7142_s11, %s8932_s3 }
 0x1aa   : > { %p6469_p10 = scmp.lt.u32.totalorder %s6467_s6, %s6462_s21  ;;  %p6471_p0 = scmp.lt.u32.totalorder %s6462_s21, %s7142_s11 }
 0x1ab   : > { %p6465_p12 = pnand %p6463_p8, %p8933_p6 }
 0x1ac   : > { %p6470_p3 = por %p6469_p10, %p6468_p9 }
 0x1ad   : > { %p6466_p7 = pneg %p6465_p12 }
 0x1ae   : > { %p6472_p5 = por %p6471_p0, %p6470_p3 }
 0x1b0   : > { %p6473_p11 = pnand %p6472_p5, %p6466_p7 }
 0x1b2   : > { %6476 = shalt.err (!%p6473_p11)
}
 0x1b3   : > { %s6477_s8 = scalar_lea.vmem %s7144_s28, 128  ;;  %s6651_s20 = smov [#allocation2]  }
 0x1b4   : > { %p6478_p1 = scmp.ne.s32.totalorder %s7144_s28, %s6477_s8  ;;  %s6482_s13 = sshll.u32 %s6651_s20, 4  ;;  %s6483_s13 = int_to_ptr.vmem [resolvable:$false] %s6482_s13 }
 0x1b5   : > { %s6484_s10 = scalar_lea.vmem %s6483_s13, 256  ;;  %p6485_p4 = scmp.lt.s32.totalorder %s7144_s28, %s6483_s13 }
 0x1b6   : > { %p6480_p13 = pnand %p6478_p1, %p8933_p6  ;;  %p6486_p8 = scmp.lt.s32.totalorder %s6484_s10, %s6477_s8 }
 0x1b8   : > { %p6481_p2 = pneg %p6480_p13  ;;  %p6487_p12 = por %p6486_p8, %p6485_p4 }
 0x1ba   : > { %p6488_p9 = pnand %p6487_p12, %p6481_p2 }
 0x1bc   : > { %6491 = shalt.err (!%p6488_p9)
}
 0x1bd   : > { %p8934_p7 = scmp.ne.s32.totalorder %s8916_s15, 0  ;;  %s4923_s21 = sadd.s32 1920, %s6972_s26 }
 0x1be   : > { %s8935_s6 = sld [smem:[#allocation70_spill]] }
 0x1bf   : > { %5844 = dma.hbm_to_vmem [thread:$0]  (!%p8934_p7), %s7142_s11, 128, %s7144_s28, %s591_s14, %s8920_s2, %s8920_s2, %s8919_s7  }
 0x1c4   : > { %s7179_s22 = scalar_lea.hbm %s8935_s6, %s4923_s21  ;;  %s6497_s20 = scalar_lea.hbm %s8935_s6, 4096 }
 0x1c5   : > { %s6492_s0 = scalar_lea.hbm %s7179_s22, 128  ;;  %p6498_p5 = scmp.lt.u32.totalorder %s7179_s22, %s8935_s6 }
 0x1c6   : > { %p6493_p10 = scmp.ne.s32.totalorder %s7179_s22, %s6492_s0  ;;  %p6499_p11 = scmp.lt.u32.totalorder %s6497_s20, %s6492_s0 }
 0x1c7   : > { %p6501_p13 = scmp.lt.u32.totalorder %s6492_s0, %s7179_s22 }
 0x1c8   : > { %p6495_p3 = pnand %p6493_p10, %p8933_p6  ;;  %p6500_p1 = por %p6499_p11, %p6498_p5 }
 0x1ca   : > { %p6496_p0 = pneg %p6495_p3  ;;  %p6502_p2 = por %p6501_p13, %p6500_p1 }
 0x1cc   : > { %p6503_p4 = pnand %p6502_p2, %p6496_p0 }
 0x1ce   : > { %6506 = shalt.err (!%p6503_p4)
}
 0x1cf   : > { %s6507_s28 = scalar_lea.vmem %s7146_s29, 128  ;;  %s6652_s14 = smov [#allocation7]  }
 0x1d0   : > { %p6508_p8 = scmp.ne.s32.totalorder %s7146_s29, %s6507_s28  ;;  %s6512_s13 = sshll.u32 %s6652_s14, 4  ;;  %s6513_s13 = int_to_ptr.vmem [resolvable:$false] %s6512_s13 }
 0x1d1   : > { %s6514_s10 = scalar_lea.vmem %s6513_s13, 256  ;;  %p6515_p10 = scmp.lt.s32.totalorder %s7146_s29, %s6513_s13 }
 0x1d2   : > { %p6510_p12 = pnand %p6508_p8, %p8933_p6  ;;  %p6516_p3 = scmp.lt.s32.totalorder %s6514_s10, %s6507_s28 }
 0x1d4   : > { %p6511_p9 = pneg %p6510_p12  ;;  %p6517_p5 = por %p6516_p3, %p6515_p10 }
 0x1d6   : > { %p6518_p11 = pnand %p6517_p5, %p6511_p9 }
 0x1d8   : > { %6521 = shalt.err (!%p6518_p11)
}
 0x1d9   : > { %5850 = dma.hbm_to_vmem [thread:$0]  (!%p8934_p7), %s7179_s22, 128, %s7146_s29, %s6990_s12, %s8920_s2, %s8920_s2, %s8919_s7  }
 0x1da   : > { %s8936_s9 = sld [smem:[#allocation39_spill]] }
 0x1e0   : > { %p8937_p6 = scmp.ne.s32.totalorder %s8936_s9, 0 }
 0x1e2   : > { %670 = sbr.rel (%p8937_p6) target bundleno = 1565 (0x61d), region = 80 }
 0x1e9   : > { %s7209_s21 = sand.u32 1, %s6616_s19   ;;  %p8938_p0 = scmp.ne.s32.totalorder %s8912_s30, 0 }
 0x1ea   : > { %s4743_s27 = sshll.u32 %s7209_s21, 3  ;;  %s673_s4 = scalar_lea.sflag [#allocation3], %s7209_s21 }
 0x1eb   : > { %s7213_s0 = scalar_lea.vmem [#allocation2], %s4743_s27 }
 0x1ec   : > { %6575 = dma.done.wait (%p8938_p0), %s673_s4, 128  }
 0x1ed   : > { %6577 = vsyncadd (%p8938_p0), %s673_s4, 4294967168  ;;  %s681_s15 = sand.u32 1, %s6770_s24   ;;  %s4744_s12 = sshll.u32 %s7209_s21, 7 }
 0x1ee   : > { %s682_s7 = scalar_lea.sflag [#allocation6], %s681_s15  ;;  %s7221_s2 = scalar_lea.vmem [#allocation5], %s4744_s12 }
 0x1ef   : > { %6579 = dma.done.wait (%p8938_p0), %s682_s7, 2176  }
 0x1f0   : > { %6581 = vsyncadd (%p8938_p0), %s682_s7, 4294965120  ;;  %s7227_s29 = scalar_lea.vmem [#allocation7], %s4743_s27  ;;  %p8939_p7 = scmp.eq.s32.totalorder %s6770_s24, 0 }
 0x1f2   : > { %6583 = dma.done.wait (%p8939_p7), [#allocation9], 528   ;;  %p8940_p1 = pmov %p8939_p7 }
 0x1f4   : > { %6585 = vsyncadd (%p8940_p1), [#allocation9], 4294966768  ;;  %p8941_p13 = pmov %p8940_p1 }
 0x1f5   : > { %p8942_p2 = pmov %p8940_p1 }
 0x1f6   : > { %6587 = dma.done.wait (%p8941_p13), [#allocation12], 9232  }
 0x1f7   : > { %6589 = vsyncadd (%p8942_p2), [#allocation12], 4294958064  ;;  %p8943_p4 = pmov %p8940_p1 }
 0x1f8   : > { %p8944_p8 = pmov %p8940_p1 }
 0x1f9   : > { %6591 = dma.done.wait (%p8943_p4), [#allocation15], 32  }
 0x1fa   : > { %6593 = vsyncadd (%p8944_p8), [#allocation15], 4294967264  ;;  %p8945_p12 = pmov %p8940_p1 }
 0x1fb   : > { %p8946_p9 = pmov %p8940_p1 }
 0x1fc   : > { %6595 = dma.done.wait (%p8945_p12), [#allocation18], 2080  }
 0x1fd   : > { %6597 = vsyncadd (%p8946_p9), [#allocation18], 4294965216  ;;  %p8947_p10 = pmov %p8940_p1 }
 0x1fe   : > { %p8948_p3 = pmov %p8940_p1 }
 0x1ff   : > { %6599 = dma.done.wait (%p8947_p10), [#allocation21], 1056  }
 0x200   : > { %6601 = vsyncadd (%p8948_p3), [#allocation21], 4294966240  ;;  %p8949_p5 = pmov %p8940_p1 }
 0x201   : > { %p8950_p11 = pmov %p8940_p1 }
 0x202   : > { %6603 = dma.done.wait (%p8949_p5), [#allocation24], 64  }
 0x203   : > { %6605 = vsyncadd (%p8950_p11), [#allocation24], 4294967232  ;;  %v6653_v0 = vmov 0.0   ;;  %vm6654_vm0 = vmmov 0   ;;  %v5950_v1 = vld [vmem:[#allocation8] sm:$0xff]   ;;  %v5951_v2 = vld [vmem:[#allocation8 + $0x8] sm:$0xff]  }
 0x204   : > { %5404 = vmatprep.subr.bf16.mxu1 %v6653_v0  ;;  %5412 = vmatprep.mubr.msk.bf16.mxu1 %vm6654_vm0, %v6653_v0  ;;  %v5952_v3 = vld [vmem:[#allocation8 + $0x10] sm:$0xff]   ;;  %vm954_vm1 = vcmask 523264   ;;  %v5953_v5 = vld [vmem:[#allocation8 + $0x18] sm:$0xff]   ;;  %v5956_v7 = vld [vmem:[%s7221_s2 + $0x10] sm:$0xff]   ;;  %vm1562_vm2 = vcmask 1040384   ;;  %vm1637_vm4 = vcmask 1047552  }
 0x205   : > { %5364 = vmatprep.subr.bf16.mxu0 %v5950_v1  ;;  %5405 = vmatpush3.bf16.msra.mxu1 %v5950_v1  ;;  %v5954_v4 = vld [vmem:[%s7221_s2] sm:$0xff]   ;;  %v5955_v6 = vld [vmem:[%s7221_s2 + $0x8] sm:$0xff]   ;;  %v5957_v8 = vld [vmem:[%s7221_s2 + $0x18] sm:$0xff]   ;;  %vm1563_vm3 = vsmask.f32 256  ;;  %s4758_s24 = sshll.u32 %s7209_s21, 9 }
 0x206   : > { %5365 = vmatpush3.bf16.msra.mxu0 %v5950_v1  ;;  %5406 = vmatprep.subr.bf16.mxu1 %v6653_v0  ;;  %v5970_v9 = vld [vmem:[%s7213_s0] sm:$0xff]   ;;  %v5958_v12 = vld [vmem:[%s7221_s2 + $0x20] sm:$0xff]   ;;  %v5959_v14 = vld [vmem:[%s7221_s2 + $0x28] sm:$0xff]   ;;  %vm1638_vm5 = vsmask.f32 7424  ;;  %s8408_s30 = scalar_lea.vmem [#allocation26], %s4758_s24 }
 0x207   : > { %5366 = vmatprep.subr.bf16.mxu0 %v5951_v2  ;;  %5372 = vmatprep.mubr.msk.bf16.mxu0 %vm954_vm1, %v5954_v4  ;;  %v5971_v10 = vld [vmem:[#allocation13 + $0x140] sm:$0xff]   ;;  %v5972_v11 = vld [vmem:[#allocation13 + $0x148] sm:$0xff]   ;;  %v5973_v13 = vld [vmem:[#allocation13 + $0x150] sm:$0xff]   ;;  %s9019_s22 = sld [smem:[#allocation37_spill]]  ;;  %s4467_s8 = sshll.u32 %s8408_s30, 4  ;;  %s8769_s8 = int_to_ptr.vmem [resolvable:$true] %s4467_s8 }
 0x208   : > { %v5960_v15 = vld [vmem:[%s7221_s2 + $0x30] sm:$0xff]   ;;  %v5977_v19 = vld [vmem:[%s7227_s29] sm:$0xff]   ;;  %v5961_v23 = vld [vmem:[%s7221_s2 + $0x38] sm:$0xff]   ;;  %s9020_s26 = sld [smem:[#allocation83_spill]]  ;;  %s4451_s14 = scalar_lea.sflag [#allocation4], %s7209_s21 }
 0x209   : > { %5407 = vmatpush3.bf16.msra.mxu1 %v5951_v2  ;;  %v5974_v16 = vld [vmem:[#allocation13 + $0x158] sm:$0xff]   ;;  %v5975_v17 = vld [vmem:[#allocation13 + $0x100] sm:$0xff]   ;;  %v5979_v21 = vld [vmem:[#allocation13 + $0x108] sm:$0xff]   ;;  %s6522_s13 = scalar_lea.vmem %s8769_s8, 8192  ;;  %p9021_p0 = scmp.ne.s32.totalorder %s8913_s17, 0 }
 0x20a   : > { %5367 = vmatpush3.bf16.msra.mxu0 %v5951_v2  ;;  %5408 = vmatprep.subr.bf16.mxu1 %v6653_v0  ;;  %v5976_v18 = vld [vmem:[#allocation13 + $0x160] sm:$0xff]   ;;  %v5982_v22 = vld [vmem:[#allocation13 + $0x168] sm:$0xff]   ;;  %v5981_v26 = vld [vmem:[#allocation13 + $0x110] sm:$0xff]   ;;  %p6523_p6 = scmp.ne.s32.totalorder %s8769_s8, %s6522_s13  ;;  %s6656_s10 = smov [#allocation26]  }
 0x20b   : > { %5368 = vmatprep.subr.bf16.mxu0 %v5952_v3  ;;  %v5978_v20 = vld [vmem:[#allocation13 + $0xc0] sm:$0xff]   ;;  %v5962_v24 = vld [vmem:[%s7221_s2 + $0x40] sm:$0xff]   ;;  %v5984_v28 = vld [vmem:[#allocation13 + $0x118] sm:$0xff]   ;;  %s6526_s9 = sshll.u32 %s6656_s10, 4  ;;  %s6527_s9 = int_to_ptr.vmem [resolvable:$false] %s6526_s9 }
 0x20c   : > { %v5980_v25 = vld [vmem:[#allocation13 + $0xc8] sm:$0xff]   ;;  %v5983_v27 = vld [vmem:[#allocation13 + $0xd0] sm:$0xff]   ;;  %v5964_v30 = vld [vmem:[%s7221_s2 + $0x50] sm:$0xff]   ;;  %p6524_p7 = pnand %p6523_p6, %p9021_p0  ;;  %s6528_s27 = scalar_lea.vmem %s6527_s9, 16384 }
 0x20d   : > { %5409 = vmatpush3.bf16.msra.mxu1 %v5952_v3  ;;  %v5963_v29 = vld [vmem:[%s7221_s2 + $0x48] sm:$0xff]   ;;  %v5965_v31 = vld [vmem:[%s7221_s2 + $0x58] sm:$0xff]   ;;  %v5966_v32 = vld [vmem:[%s7221_s2 + $0x60] sm:$0xff]   ;;  %s4924_s16 = sshll.u32 %s9019_s22, 13  ;;  %p6529_p13 = scmp.lt.s32.totalorder %s8769_s8, %s6527_s9 }
 0x20e   : > { %5369 = vmatpush3.bf16.msra.mxu0 %v5952_v3  ;;  %5410 = vmatprep.subr.bf16.mxu1 %v6653_v0  ;;  %v5967_v33 = vld [vmem:[%s7221_s2 + $0x68] sm:$0xff]   ;;  %v5968_v34 = vld [vmem:[%s7221_s2 + $0x70] sm:$0xff]   ;;  %v5969_v35 = vld [vmem:[%s7221_s2 + $0x78] sm:$0xff]   ;;  %s8767_s28 = scalar_lea.hbm %s9020_s26, %s4924_s16  ;;  %p6525_p1 = pneg %p6524_p7 }
 0x20f   : > { %5370 = vmatprep.subr.bf16.mxu0 %v5953_v5  ;;  %v5985_v36 = vld [vmem:[#allocation13 + $0xd8] sm:$0xff]   ;;  %v5986_v37 = vld [vmem:[#allocation13 + $0x120] sm:$0xff]   ;;  %v5989_v39 = vld [vmem:[#allocation13 + $0x128] sm:$0xff]   ;;  %p6530_p2 = scmp.lt.s32.totalorder %s6528_s27, %s6522_s13 }
 0x210   : > { %v5988_v38 = vld [vmem:[#allocation13 + $0xe0] sm:$0xff]   ;;  %v5990_v40 = vld [vmem:[#allocation13 + $0xe8] sm:$0xff]   ;;  %v5991_v41 = vld [vmem:[#allocation13 + $0x130] sm:$0xff]  }
 0x211   : > { %5411 = vmatpush3.bf16.msra.mxu1 %v5953_v5  ;;  %v5987_v42 = vld [vmem:[#allocation13 + $0x170] sm:$0xff]   ;;  %v5994_v44 = vld [vmem:[#allocation13 + $0x138] sm:$0xff]   ;;  %v5996_v47 = vld [vmem:[#allocation13 + $0x40] sm:$0xff]   ;;  %p6531_p4 = por %p6530_p2, %p6529_p13 }
 0x212   : > { %5371 = vmatpush3.bf16.msra.mxu0 %v5953_v5  ;;  %5416 = vmatprep.subr.bf16.mxu1 %v6653_v0  ;;  %v5993_v43 = vld [vmem:[#allocation13 + $0xf0] sm:$0xff]   ;;  %v5992_v45 = vld [vmem:[#allocation13 + $0x178] sm:$0xff]   ;;  %vm7325_vm6 = vmand %vm1562_vm2, %vm1563_vm3 }
 0x213   : > { %5428 = vmatprep.subr.bf16.mxu0 %v5971_v10  ;;  %v5995_v46 = vld [vmem:[#allocation13 + $0xf8] sm:$0xff]   ;;  %vm7331_vm7 = vmand %vm1637_vm4, %vm1638_vm5  ;;  %p6532_p8 = pnand %p6531_p4, %p6525_p1 }
 0x214   : > { %5413 = vmatmul.mubr.msk.bf16.vlgmr.msra.gmra.mrb[0].mxu1 %vm954_vm1, %v5970_v9  ;;  %v7291_v48 = vld [vmem:[#allocation10] ss:$0 sm:$0xff]  ;;  %v7293_v50 = vld [vmem:[#allocation11] ss:$0 sm:$0xff] }
 0x215   : > { %5373 = vmatmul.mubr.msk.bf16.vlgmr.msra.gmra.mrb[0].mxu0 %vm954_vm1, %v5955_v6  ;;  %5417 = vmatpush3.bf16.msra.mxu1 %v5950_v1 }
 0x216   : > { %5376 = vmatprep.mubr.msk.bf16.mxu0 %vm954_vm1, %v5956_v7  ;;  %5429 = vmatpush3.bf16.msra.mxu0 %v5971_v10 }
 0x217   : > { %5418 = vmatprep.subr.bf16.mxu1 %v6653_v0  ;;  %5430 = vmatprep.subr.bf16.mxu0 %v5972_v11 }
 0x218   : > { %5424 = vmatprep.mubr.msk.bf16.mxu1 %vm6654_vm0, %v6653_v0 }
 0x219   : > { %5419 = vmatpush3.bf16.msra.mxu1 %v5951_v2 }
 0x21a   : > { %5431 = vmatpush3.bf16.msra.mxu0 %v5972_v11  ;;  %5420 = vmatprep.subr.bf16.mxu1 %v6653_v0 }
 0x21b   : > { %5432 = vmatprep.subr.bf16.mxu0 %v5973_v13 }
 0x21d   : > { %5377 = vmatmul.mubr.msk.bf16.gmra.mrb[4].mxu0 %vm954_vm1, %v5957_v8  ;;  %5421 = vmatpush3.bf16.msra.mxu1 %v5952_v3 }
 0x21e   : > { %5380 = vmatprep.mubr.msk.bf16.mxu0 %vm954_vm1, %v5958_v12  ;;  %5433 = vmatpush3.bf16.msra.mxu0 %v5973_v13 }
 0x21f   : > { %5422 = vmatprep.subr.bf16.mxu1 %v6653_v0  ;;  %5434 = vmatprep.subr.bf16.mxu0 %v5974_v16 }
 0x221   : > { %5423 = vmatpush3.bf16.msra.mxu1 %v5953_v5 }
 0x222   : > { %5435 = vmatpush3.bf16.msra.mxu0 %v5974_v16  ;;  %4956 = vmatprep.subr.bf16.mxu1 %v5975_v17 }
 0x223   : > { %5436 = vmatprep.subr.bf16.mxu0 %v5976_v18 }
 0x224   : > { %5425 = vmatmul.mubr.msk.bf16.vlgmr.msra.gmra.mrb[4].mxu1 %vm954_vm1, %v5977_v19 }
 0x225   : > { %5381 = vmatmul.mubr.msk.bf16.gmra.mrb[8].mxu0 %vm954_vm1, %v5959_v14  ;;  %4957 = vmatpush3.bf16.msra.mxu1 %v5978_v20 }
 0x226   : > { %5384 = vmatprep.mubr.msk.bf16.mxu0 %vm954_vm1, %v5960_v15  ;;  %5437 = vmatpush3.bf16.msra.mxu0 %v5976_v18 }
 0x227   : > { %4958 = vmatprep.subr.bf16.mxu1 %v5979_v21  ;;  %5438 = vmatprep.subr.bf16.mxu0 %v5982_v22 }
 0x229   : > { %4959 = vmatpush3.bf16.msra.mxu1 %v5980_v25 }
 0x22a   : > { %4960 = vmatprep.subr.bf16.mxu1 %v5981_v26  ;;  %5439 = vmatpush3.bf16.msra.mxu0 %v5982_v22 }
 0x22b   : > { %5440 = vmatprep.subr.bf16.mxu0 %v5987_v42 }
 0x22d   : > { %5385 = vmatmul.mubr.msk.bf16.gmra.mrb[12].mxu0 %vm954_vm1, %v5961_v23  ;;  %4961 = vmatpush3.bf16.msra.mxu1 %v5983_v27 }
 0x22e   : > { %5388 = vmatprep.mubr.msk.bf16.mxu0 %vm954_vm1, %v5962_v24  ;;  %4962 = vmatprep.subr.bf16.mxu1 %v5984_v28 }
 0x22f   : > { %5441 = vmatpush3.bf16.msra.mxu0 %v5987_v42 }
 0x230   : > { %5442 = vmatprep.subr.bf16.mxu0 %v5992_v45 }
 0x231   : > { %4963 = vmatpush3.bf16.msra.mxu1 %v5985_v36 }
 0x232   : > { %4964 = vmatprep.subr.bf16.mxu1 %v5986_v37 }
 0x233   : > { %5443 = vmatpush3.bf16.msra.mxu0 %v5992_v45 }
 0x234   : > { %5092 = vmatprep.subr.bf16.mxu0 %v5996_v47 }
 0x235   : > { %5389 = vmatmul.mubr.msk.bf16.gmra.mrb[16].mxu0 %vm954_vm1, %v5963_v29  ;;  %4965 = vmatpush3.bf16.msra.mxu1 %v5988_v38 }
 0x236   : > { %5392 = vmatprep.mubr.msk.bf16.mxu0 %vm954_vm1, %v5964_v30  ;;  %4966 = vmatprep.subr.bf16.mxu1 %v5989_v39 }
 0x239   : > { %4967 = vmatpush3.bf16.msra.mxu1 %v5990_v40 }
 0x23a   : > { %4968 = vmatprep.subr.bf16.mxu1 %v5991_v41 }
 0x23d   : > { %5393 = vmatmul.mubr.msk.bf16.gmra.mrb[20].mxu0 %vm954_vm1, %v5965_v31  ;;  %4969 = vmatpush3.bf16.msra.mxu1 %v5993_v43 }
 0x23e   : > { %5396 = vmatprep.mubr.msk.bf16.mxu0 %vm954_vm1, %v5966_v32  ;;  %4970 = vmatprep.subr.bf16.mxu1 %v5994_v44  ;;  %v5997_v44 = vld [vmem:[#allocation13] sm:$0xff]  }
 0x241   : > { %4971 = vmatpush3.bf16.msra.mxu1 %v5995_v46 }
 0x242   : > { %5572 = vmatprep.subr.bf16.mxu1 %v5996_v47 }
 0x245   : > { %5397 = vmatmul.mubr.msk.bf16.gmra.mrb[24].mxu0 %vm954_vm1, %v5967_v33  ;;  %v6070_v33 = vld [vmem:[#allocation17 + $0x64] ss:$8 sps:$4 sm:$0xff]  }
 0x246   : > { %5400 = vmatprep.mubr.msk.bf16.mxu0 %vm954_vm1, %v5968_v34 }
 0x24d   : > { %5401 = vmatmul.mubr.msk.bf16.gmra.mrb[28].mxu0 %vm954_vm1, %v5969_v35 }
 0x2e7   : > { %v1340_v60 = vpop.f32.mrb[0].mxu1 }
 0x2e8   : > { %v5374_v49 = vpop.f32.mrb[0].mxu0  ;;  %v5414_v62 = vpop.f32.mrb[1].mxu1  ;;  %v1347_v10 = vmul.f32 %v7291_v48, %v1340_v60 }
 0x2e9   : > { %v1173_v51 = vmul.f32 %v5374_v49, %v7291_v48  ;;  %v1037_v52 = vpop.f32.mrb[1].mxu0  ;;  %v1343_v0 = vpop.f32.mrb[2].mxu1 }
 0x2ea   : > { %v1171_v53 = vmul.f32 %v7291_v48, %v1037_v52  ;;  %v5375_v54 = vpop.f32.mrb[2].mxu0  ;;  %v5415_v3 = vpop.f32.mrb[3].mxu1  ;;  %v1349_v25 = vadd.f32 %v7293_v50, %v1347_v10  ;;  %v1348_v26 = vmul.f32 %v7291_v48, %v1343_v0 }
 0x2eb   : > { %v1212_v55 = vadd.f32 %v7293_v50, %v1173_v51  ;;  %v1174_v56 = vmul.f32 %v5375_v54, %v7291_v48  ;;  %v1040_v57 = vpop.f32.mrb[3].mxu0  ;;  %v5998_v54 = vld [vmem:[#allocation13 + $0x48] sm:$0xff]  }
 0x2ec   : > { %v1210_v58 = vadd.f32 %v7293_v50, %v1171_v53  ;;  %v1172_v59 = vmul.f32 %v7291_v48, %v1040_v57  ;;  %v1351_v45 = vmax.f32 %v1349_v25, 0.0  ;;  %v1350_v46 = vadd.f32 %v7293_v50, %v1348_v26 }
 0x2ed   : > { %v1213_v61 = vadd.f32 %v7293_v50, %v1174_v56  ;;  %v1244_v1 = vmax.f32 %v1212_v55, 0.0 }
 0x2ee   : > { %v1211_v63 = vadd.f32 %v7293_v50, %v1172_v59  ;;  %v1242_v4 = vmax.f32 %v1210_v58, 0.0 }
 0x2ef   : > { %v1245_v2 = vmax.f32 %v1213_v61, 0.0 }
 0x2f0   : > { %v1243_v5 = vmax.f32 %v1211_v63, 0.0  ;;  %v5378_v6 = vpop.f32.mrb[4].mxu0 }
 0x2f1   : > { %v7303_v7 = vpack.c.bf16 %v1245_v2, %v1244_v1  ;;  %v1177_v8 = vmul.f32 %v5378_v6, %v7291_v48  ;;  %v1053_v9 = vpop.f32.mrb[5].mxu0 }
 0x2f2   : > { %v7307_v11 = vpack.c.bf16 %v1243_v5, %v1242_v4  ;;  %v1175_v12 = vmul.f32 %v7291_v48, %v1053_v9  ;;  %v5379_v13 = vpop.f32.mrb[6].mxu0  ;;  %v5999_v4 = vld [vmem:[#allocation13 + $0x8] sm:$0xff]   ;;  %v1352_v9 = vmax.f32 %v1350_v46, 0.0 }
 0x2f3   : > { %v1216_v14 = vadd.f32 %v7293_v50, %v1177_v8  ;;  %v1178_v15 = vmul.f32 %v5379_v13, %v7291_v48  ;;  %v1056_v16 = vpop.f32.mrb[7].mxu0  ;;  %v1433_v17 = vshrl.u32 %v7303_v7, 16  ;;  %v1436_v18 = vshll.u32 %v7303_v7, 16  ;;  %v6000_v8 = vld [vmem:[#allocation13 + $0x50] sm:$0xff]  }
 0x2f4   : > { %v1214_v19 = vadd.f32 %v7293_v50, %v1175_v12  ;;  %v1176_v20 = vmul.f32 %v7291_v48, %v1056_v16  ;;  %1931 = vmatprep.mubr.bf16.mxu1 %v7307_v11  ;;  %v1426_v21 = vshrl.u32 %v7307_v11, 16  ;;  %v1429_v22 = vshll.u32 %v7307_v11, 16 }
 0x2f5   : > { %v1217_v23 = vadd.f32 %v7293_v50, %v1178_v15  ;;  %v1587_v24 = vrot.slane %v1436_v18, 1  ;;  %v1248_v31 = vmax.f32 %v1216_v14, 0.0  ;;  %v1435_v35 = vrot.slane %v1433_v17, 7 }
 0x2f6   : > { %v1215_v27 = vadd.f32 %v7293_v50, %v1176_v20  ;;  %v1428_v28 = vrot.slane %v1426_v21, 7  ;;  %v1585_v30 = vrot.slane %v1429_v22, 1  ;;  %v1246_v36 = vmax.f32 %v1214_v19, 0.0 }
 0x2f7   : > { %v1249_v32 = vmax.f32 %v1217_v23, 0.0  ;;  %v1588_v34 = vor.u32 %v1587_v24, %v1433_v17  ;;  %v1438_v62 = vor.u32 %v1436_v18, %v1435_v35  ;;  %v1354_v18 = vmul.f32 0.0, %v1351_v45  ;;  %v6001_v24 = vld [vmem:[#allocation13 + $0x10] sm:$0xff]   ;;  %v6003_v45 = vld [vmem:[#allocation13 + $0x18] sm:$0xff]  }
 0x2f8   : > { %v1247_v37 = vmax.f32 %v1215_v27, 0.0  ;;  %v5382_v38 = vpop.f32.mrb[8].mxu0  ;;  %v1431_v39 = vor.u32 %v1429_v22, %v1428_v28  ;;  %v1586_v40 = vor.u32 %v1585_v30, %v1426_v21  ;;  %v6002_v30 = vld [vmem:[#allocation13 + $0x58] sm:$0xff]  }
 0x2f9   : > { %v7335_v41 = vpack.c.bf16 %v1249_v32, %v1248_v31  ;;  %v1181_v42 = vmul.f32 %v5382_v38, %v7291_v48  ;;  %v1069_v43 = vpop.f32.mrb[9].mxu0  ;;  %v7356_v58 = vsel %vm7331_vm7, %v1588_v34, 0  ;;  %v7377_v22 = vsel %vm7325_vm6, 0, %v1438_v62 }
 0x2fa   : > { %v7339_v47 = vpack.c.bf16 %v1247_v37, %v1246_v36  ;;  %v1179_v49 = vmul.f32 %v7291_v48, %v1069_v43  ;;  %v5383_v51 = vpop.f32.mrb[10].mxu0  ;;  %v7344_v52 = vsel %vm7325_vm6, 0, %v1431_v39  ;;  %v7348_v53 = vsel %vm7331_vm7, %v1586_v40, 0 }
 0x2fb   : > { %v1220_v55 = vadd.f32 %v7293_v50, %v1181_v42  ;;  %v1182_v56 = vmul.f32 %v5383_v51, %v7291_v48  ;;  %v1072_v57 = vpop.f32.mrb[11].mxu0  ;;  %1932 = vmatmul.mubr.bf16.vlgmr.msra.gmra.mrb[8].mxu1 %v7344_v52  ;;  %5444 = vmatprep.mubr.bf16.mxu0 %v7348_v53  ;;  %v1450_v59 = vshll.u32 %v7335_v41, 16  ;;  %v1447_v2 = vshrl.u32 %v7335_v41, 16 }
 0x2fc   : > { %v1218_v60 = vadd.f32 %v7293_v50, %v1179_v49  ;;  %v1180_v61 = vmul.f32 %v7291_v48, %v1072_v57  ;;  %1939 = vmatprep.mubr.bf16.mxu1 %v7303_v7  ;;  %5445 = vmatmul.mubr.bf16.vlgmr.msra.gmra.mrb[32].mxu0 %v7356_v58  ;;  %v1443_v63 = vshll.u32 %v7339_v47, 16  ;;  %v1440_v1 = vshrl.u32 %v7339_v47, 16 }
 0x2fd   : > { %v1221_v0 = vadd.f32 %v7293_v50, %v1182_v56  ;;  %5093 = vmatpush3.bf16.msra.mxu0 %v5997_v44  ;;  %v1591_v3 = vrot.slane %v1450_v59, 1  ;;  %5580 = vmatpush3.bf16.msra.mxu1 %v5997_v44  ;;  %v1252_v10 = vmax.f32 %v1220_v55, 0.0  ;;  %v1355_v31 = vmul.f32 0.0, %v1352_v9  ;;  %v6004_v55 = vld [vmem:[#allocation13 + $0x60] sm:$0xff]  }
 0x2fe   : > { %v1219_v5 = vadd.f32 %v7293_v50, %v1180_v61  ;;  %v1589_v6 = vrot.slane %v1443_v63, 1  ;;  %5094 = vmatprep.subr.bf16.mxu0 %v5998_v54  ;;  %5573 = vmatprep.subr.bf16.mxu1 %v5998_v54  ;;  %v1250_v14 = vmax.f32 %v1218_v60, 0.0  ;;  %v1442_v23 = vrot.slane %v1440_v1, 7 }
 0x2ff   : > { %v1253_v12 = vmax.f32 %v1221_v0, 0.0  ;;  %v1592_v13 = vor.u32 %v1591_v3, %v1447_v2  ;;  %v7410_v61 = vpack.c.bf16 %v1355_v31, %v1354_v18 }
 0x300   : > { %v1251_v15 = vmax.f32 %v1219_v5, 0.0  ;;  %v5386_v16 = vpop.f32.mrb[12].mxu0  ;;  %v1590_v17 = vor.u32 %v1589_v6, %v1440_v1  ;;  %v1445_v49 = vor.u32 %v1443_v63, %v1442_v23  ;;  %v1449_v6 = vrot.slane %v1447_v2, 7 }
 0x301   : > { %v7372_v19 = vpack.c.bf16 %v1253_v12, %v1252_v10  ;;  %v1185_v20 = vmul.f32 %v5386_v16, %v7291_v48  ;;  %v1085_v21 = vpop.f32.mrb[13].mxu0  ;;  %5095 = vmatpush3.bf16.msra.mxu0 %v5999_v4  ;;  %5581 = vmatpush3.bf16.msra.mxu1 %v5999_v4  ;;  %v7392_v36 = vsel %vm7331_vm7, %v1592_v13, 0 }
 0x302   : > { %v7379_v25 = vpack.c.bf16 %v1251_v15, %v1250_v14  ;;  %v1183_v26 = vmul.f32 %v7291_v48, %v1085_v21  ;;  %v5387_v27 = vpop.f32.mrb[14].mxu0  ;;  %v7384_v28 = vsel %vm7331_vm7, %v1590_v17, 0  ;;  %5096 = vmatprep.subr.bf16.mxu0 %v6000_v8  ;;  %5574 = vmatprep.subr.bf16.mxu1 %v6000_v8  ;;  %v6005_v8 = vld [vmem:[#allocation13 + $0x20] sm:$0xff]   ;;  %v7424_v13 = vsel %vm7325_vm6, 0, %v1445_v49  ;;  %v6006_v15 = vld [vmem:[#allocation13 + $0x68] sm:$0xff]  }
 0x303   : > { %v1224_v32 = vadd.f32 %v7293_v50, %v1185_v20  ;;  %v1186_v34 = vmul.f32 %v5387_v27, %v7291_v48  ;;  %v1088_v35 = vpop.f32.mrb[15].mxu0  ;;  %1940 = vmatmul.mubr.bf16.gmra.mrb[12].mxu1 %v7377_v22  ;;  %5448 = vmatprep.mubr.bf16.mxu0 %v7384_v28  ;;  %v1464_v37 = vshll.u32 %v7372_v19, 16  ;;  %v1461_v43 = vshrl.u32 %v7372_v19, 16 }
 0x304   : > { %v1222_v38 = vadd.f32 %v7293_v50, %v1183_v26  ;;  %v1184_v39 = vmul.f32 %v7291_v48, %v1088_v35  ;;  %1947 = vmatprep.mubr.bf16.mxu1 %v7339_v47  ;;  %5449 = vmatmul.mubr.bf16.gmra.mrb[36].mxu0 %v7392_v36  ;;  %v1457_v40 = vshll.u32 %v7379_v25, 16  ;;  %v1454_v51 = vshrl.u32 %v7379_v25, 16 }
 0x305   : > { %v1225_v42 = vadd.f32 %v7293_v50, %v1186_v34  ;;  %v1595_v44 = vrot.slane %v1464_v37, 1  ;;  %5097 = vmatpush3.bf16.msra.mxu0 %v6001_v24  ;;  %5582 = vmatpush3.bf16.msra.mxu1 %v6001_v24  ;;  %v1256_v56 = vmax.f32 %v1224_v32, 0.0  ;;  %v1452_v27 = vor.u32 %v1450_v59, %v1449_v6  ;;  %v6007_v32 = vld [vmem:[#allocation13 + $0x28] sm:$0xff]   ;;  %v6010_v6 = vld [vmem:[#allocation13 + $0x78] sm:$0xff]  }
 0x306   : > { %v1223_v46 = vadd.f32 %v7293_v50, %v1184_v39  ;;  %v1593_v54 = vrot.slane %v1457_v40, 1  ;;  %5098 = vmatprep.subr.bf16.mxu0 %v6002_v30  ;;  %5575 = vmatprep.subr.bf16.mxu1 %v6002_v30  ;;  %v1254_v62 = vmax.f32 %v1222_v38, 0.0  ;;  %v6008_v39 = vld [vmem:[#allocation13 + $0x70] sm:$0xff]  }
 0x307   : > { %v1257_v57 = vmax.f32 %v1225_v42, 0.0  ;;  %v1596_v60 = vor.u32 %v1595_v44, %v1461_v43 }
 0x308   : > { %v1255_v0 = vmax.f32 %v1223_v46, 0.0  ;;  %v5390_v1 = vpop.f32.mrb[16].mxu0  ;;  %v1594_v63 = vor.u32 %v1593_v54, %v1454_v51 }
 0x309   : > { %v7414_v3 = vpack.c.bf16 %v1257_v57, %v1256_v56  ;;  %v1189_v4 = vmul.f32 %v5390_v1, %v7291_v48  ;;  %v1101_v5 = vpop.f32.mrb[17].mxu0  ;;  %5099 = vmatpush3.bf16.msra.mxu0 %v6003_v45  ;;  %5583 = vmatpush3.bf16.msra.mxu1 %v6003_v45  ;;  %v7436_v18 = vsel %vm7331_vm7, %v1596_v60, 0  ;;  %v7463_v60 = vsel %vm7325_vm6, 0, %v1452_v27  ;;  %v6011_v27 = vld [vmem:[#allocation13 + $0x38] sm:$0xff]  }
 0x30a   : > { %v7419_v9 = vpack.c.bf16 %v1255_v0, %v1254_v62  ;;  %v1187_v10 = vmul.f32 %v7291_v48, %v1101_v5  ;;  %v5391_v12 = vpop.f32.mrb[18].mxu0  ;;  %v7428_v14 = vsel %vm7331_vm7, %v1594_v63, 0  ;;  %5100 = vmatprep.subr.bf16.mxu0 %v6004_v55  ;;  %5576 = vmatprep.subr.bf16.mxu1 %v6004_v55  ;;  %v6009_v62 = vld [vmem:[#allocation13 + $0x30] sm:$0xff]   ;;  %v1456_v5 = vrot.slane %v1454_v51, 7 }
 0x30b   : > { %v1228_v2 = vadd.f32 %v7293_v50, %v1189_v4  ;;  %v1190_v16 = vmul.f32 %v5391_v12, %v7291_v48  ;;  %v1104_v17 = vpop.f32.mrb[19].mxu0  ;;  %1948 = vmatmul.mubr.bf16.gmra.mrb[16].mxu1 %v7424_v13  ;;  %5452 = vmatprep.mubr.bf16.mxu0 %v7428_v14  ;;  %v1478_v20 = vshll.u32 %v7414_v3, 16  ;;  %v1475_v30 = vshrl.u32 %v7414_v3, 16 }
 0x30c   : > { %v1226_v21 = vadd.f32 %v7293_v50, %v1187_v10  ;;  %v1188_v23 = vmul.f32 %v7291_v48, %v1104_v17  ;;  %1955 = vmatprep.mubr.bf16.mxu1 %v7335_v41  ;;  %5453 = vmatmul.mubr.bf16.gmra.mrb[40].mxu0 %v7436_v18  ;;  %v1471_v24 = vshll.u32 %v7419_v9, 16  ;;  %v1468_v35 = vshrl.u32 %v7419_v9, 16 }
 0x30d   : > { %v1229_v26 = vadd.f32 %v7293_v50, %v1190_v16  ;;  %v1599_v31 = vrot.slane %v1478_v20, 1  ;;  %5101 = vmatpush3.bf16.msra.mxu0 %v6005_v8  ;;  %5584 = vmatpush3.bf16.msra.mxu1 %v6005_v8  ;;  %v1260_v42 = vmax.f32 %v1228_v2, 0.0 }
 0x30e   : > { %v1227_v34 = vadd.f32 %v7293_v50, %v1188_v23  ;;  %v1597_v38 = vrot.slane %v1471_v24, 1  ;;  %5102 = vmatprep.subr.bf16.mxu0 %v6006_v15  ;;  %5577 = vmatprep.subr.bf16.mxu1 %v6006_v15  ;;  %v1258_v45 = vmax.f32 %v1226_v21, 0.0 }
 0x30f   : > { %v1261_v59 = vmax.f32 %v1229_v26, 0.0  ;;  %v1600_v44 = vor.u32 %v1599_v31, %v1475_v30 }
 0x310   : > { %v1259_v46 = vmax.f32 %v1227_v34, 0.0  ;;  %v5394_v49 = vpop.f32.mrb[20].mxu0  ;;  %v1598_v54 = vor.u32 %v1597_v38, %v1468_v35 }
 0x311   : > { %v7458_v55 = vpack.c.bf16 %v1261_v59, %v1260_v42  ;;  %v1193_v56 = vmul.f32 %v5394_v49, %v7291_v48  ;;  %v1117_v57 = vpop.f32.mrb[21].mxu0  ;;  %5103 = vmatpush3.bf16.msra.mxu0 %v6007_v32  ;;  %5585 = vmatpush3.bf16.msra.mxu1 %v6007_v32  ;;  %v7480_v15 = vsel %vm7331_vm7, %v1600_v44, 0  ;;  %v1459_v32 = vor.u32 %v1457_v40, %v1456_v5  ;;  %v6019_v42 = vld [vmem:[#allocation13 + $0x1c0] sm:$0xff]  }
 0x312   : > { %v7465_v0 = vpack.c.bf16 %v1259_v46, %v1258_v45  ;;  %v1191_v1 = vmul.f32 %v7291_v48, %v1117_v57  ;;  %v5395_v63 = vpop.f32.mrb[22].mxu0  ;;  %v7470_v4 = vsel %vm7331_vm7, %v1598_v54, 0  ;;  %5104 = vmatprep.subr.bf16.mxu0 %v6008_v39  ;;  %5578 = vmatprep.subr.bf16.mxu1 %v6008_v39  ;;  %v7498_v39 = vld [vmem:[#allocation13 + $0x80] sm:$0xff]  }
 0x313   : > { %v1232_v8 = vadd.f32 %v7293_v50, %v1193_v56  ;;  %v1194_v10 = vmul.f32 %v5395_v63, %v7291_v48  ;;  %v1120_v12 = vpop.f32.mrb[23].mxu0  ;;  %1956 = vmatmul.mubr.bf16.gmra.mrb[20].mxu1 %v7463_v60  ;;  %5456 = vmatprep.mubr.bf16.mxu0 %v7470_v4  ;;  %v8872_v2 = vshll.u32 %v7458_v55, 16  ;;  %v8873_v23 = vshrl.u32 %v7458_v55, 16 }
 0x314   : > { %v1230_v51 = vadd.f32 %v7293_v50, %v1191_v1  ;;  %v1192_v16 = vmul.f32 %v7291_v48, %v1120_v12  ;;  %1963 = vmatprep.mubr.bf16.mxu1 %v7379_v25  ;;  %5457 = vmatmul.mubr.bf16.gmra.mrb[44].mxu0 %v7480_v15  ;;  %v1485_v17 = vshll.u32 %v7465_v0, 16  ;;  %v1482_v34 = vshrl.u32 %v7465_v0, 16 }
 0x315   : > { %v1233_v21 = vadd.f32 %v7293_v50, %v1194_v10  ;;  %v1603_v26 = vrot.slane %v8872_v2, 1  ;;  %5105 = vmatpush3.bf16.msra.mxu0 %v6009_v62  ;;  %5586 = vmatpush3.bf16.msra.mxu1 %v6009_v62  ;;  %v1264_v59 = vmax.f32 %v1232_v8, 0.0  ;;  %v8875_v56 = vshll.u32 %v7410_v61, 16 }
 0x316   : > { %v1231_v31 = vadd.f32 %v7293_v50, %v1192_v16  ;;  %v1601_v38 = vrot.slane %v1485_v17, 1  ;;  %5106 = vmatprep.subr.bf16.mxu0 %v6010_v6  ;;  %5579 = vmatprep.subr.bf16.mxu1 %v6010_v6  ;;  %v1262_v46 = vmax.f32 %v1230_v51, 0.0  ;;  %v1463_v63 = vrot.slane %v1461_v43, 7 }
 0x317   : > { %v1265_v44 = vmax.f32 %v1233_v21, 0.0  ;;  %v1604_v45 = vor.u32 %v1603_v26, %v8873_v23  ;;  %v7515_v10 = vsel %vm7325_vm6, 0, %v1459_v32 }
 0x318   : > { %v1263_v49 = vmax.f32 %v1231_v31, 0.0  ;;  %v5398_v54 = vpop.f32.mrb[24].mxu0  ;;  %v1602_v40 = vor.u32 %v1601_v38, %v1482_v34  ;;  %v1583_v38 = vrot.slane %v8875_v56, 1 }
 0x319   : > { %v7505_v57 = vpack.c.bf16 %v1265_v44, %v1264_v59  ;;  %v1197_v62 = vmul.f32 %v5398_v54, %v7291_v48  ;;  %v1133_v1 = vpop.f32.mrb[25].mxu0  ;;  %5107 = vmatpush3.bf16.msra.mxu0 %v6011_v27  ;;  %5587 = vmatpush3.bf16.msra.mxu1 %v6011_v27  ;;  %v7528_v21 = vsel %vm7331_vm7, %v1604_v45, 0  ;;  %v1466_v59 = vor.u32 %v1464_v37, %v1463_v63 }
 0x31a   : > { %v7510_v5 = vpack.c.bf16 %v1263_v49, %v1262_v46  ;;  %v1195_v6 = vmul.f32 %v7291_v48, %v1133_v1  ;;  %v5399_v8 = vpop.f32.mrb[26].mxu0  ;;  %v7519_v12 = vsel %vm7331_vm7, %v1602_v40, 0  ;;  %5476 = vmatprep.subr.bf16.mxu0 %v7498_v39  ;;  %5228 = vmatprep.subr.bf16.mxu1 %v6019_v42  ;;  %v1419_v40 = vshrl.u32 %v7410_v61, 16 }
 0x31b   : > { %v1236_v43 = vadd.f32 %v7293_v50, %v1197_v62  ;;  %v1198_v51 = vmul.f32 %v5399_v8, %v7291_v48  ;;  %v1136_v16 = vpop.f32.mrb[27].mxu0  ;;  %1964 = vmatmul.mubr.bf16.gmra.mrb[24].mxu1 %v7515_v10  ;;  %5460 = vmatprep.mubr.bf16.mxu0 %v7519_v12  ;;  %v8868_v26 = vshll.u32 %v7505_v57, 16  ;;  %v8870_v44 = vshrl.u32 %v7505_v57, 16 }
 0x31c   : > { %v1234_v27 = vadd.f32 %v7293_v50, %v1195_v6  ;;  %v1196_v31 = vmul.f32 %v7291_v48, %v1136_v16  ;;  %1971 = vmatprep.mubr.bf16.mxu1 %v7372_v19  ;;  %5461 = vmatmul.mubr.bf16.gmra.mrb[48].mxu0 %v7528_v21  ;;  %v8869_v32 = vshll.u32 %v7510_v5, 16  ;;  %v8871_v49 = vshrl.u32 %v7510_v5, 16 }
 0x31d   : > { %v1237_v42 = vadd.f32 %v7293_v50, %v1198_v51  ;;  %v1607_v45 = vrot.slane %v8868_v26, 1  ;;  %v1268_v62 = vmax.f32 %v1236_v43, 0.0  ;;  %v7555_v16 = vor.u32 %v1583_v38, %v1419_v40 }
 0x31e   : > { %v1235_v46 = vadd.f32 %v7293_v50, %v1196_v31  ;;  %v1605_v54 = vrot.slane %v8869_v32, 1  ;;  %v1266_v37 = vmax.f32 %v1234_v27, 0.0  ;;  %v7562_v43 = vsel %vm7325_vm6, 0, %v1466_v59 }
 0x31f   : > { %v1269_v1 = vmax.f32 %v1237_v42, 0.0  ;;  %v1608_v6 = vor.u32 %v1607_v45, %v8870_v44  ;;  %v1470_v38 = vrot.slane %v1468_v35, 7 }
 0x320   : > { %v1267_v63 = vmax.f32 %v1235_v46, 0.0  ;;  %v5402_v8 = vpop.f32.mrb[28].mxu0  ;;  %v1606_v51 = vor.u32 %v1605_v54, %v8871_v49 }
 0x321   : > { %v7557_v31 = vpack.c.bf16 %v1269_v1, %v1268_v62  ;;  %v1201_v26 = vmul.f32 %v5402_v8, %v7291_v48  ;;  %v1149_v32 = vpop.f32.mrb[29].mxu0 }
 0x322   : > { %v7564_v42 = vpack.c.bf16 %v1267_v63, %v1266_v37  ;;  %v1199_v27 = vmul.f32 %v7291_v48, %v1149_v32  ;;  %v5403_v45 = vpop.f32.mrb[30].mxu0  ;;  %v7569_v46 = vsel %vm7331_vm7, %v1606_v51, 0  ;;  %v7579_v32 = vsel %vm7331_vm7, %v1608_v6, 0 }
 0x323   : > { %v1240_v54 = vadd.f32 %v7293_v50, %v1201_v26  ;;  %v1202_v62 = vmul.f32 %v5403_v45, %v7291_v48  ;;  %v1152_v1 = vpop.f32.mrb[31].mxu0  ;;  %1972 = vmatmul.mubr.bf16.gmra.mrb[28].mxu1 %v7562_v43  ;;  %5464 = vmatprep.mubr.bf16.mxu0 %v7569_v46  ;;  %v8874_v59 = vshll.u32 %v7557_v31, 16  ;;  %v1517_v8 = vshrl.u32 %v7557_v31, 16 }
 0x324   : > { %v1238_v37 = vadd.f32 %v7293_v50, %v1199_v27  ;;  %v1200_v63 = vmul.f32 %v7291_v48, %v1152_v1  ;;  %1979 = vmatprep.mubr.bf16.mxu1 %v7419_v9  ;;  %5465 = vmatmul.mubr.bf16.gmra.mrb[52].mxu0 %v7579_v32  ;;  %v1513_v35 = vshll.u32 %v7564_v42, 16  ;;  %v1473_v27 = vor.u32 %v1471_v24, %v1470_v38 }
 0x325   : > { %v1241_v26 = vadd.f32 %v7293_v50, %v1202_v62  ;;  %v1611_v6 = vrot.slane %v8874_v59, 1  ;;  %v1510_v45 = vshrl.u32 %v7564_v42, 16  ;;  %v1272_v44 = vmax.f32 %v1240_v54, 0.0 }
 0x326   : > { %v1239_v51 = vadd.f32 %v7293_v50, %v1200_v63  ;;  %v1609_v1 = vrot.slane %v1513_v35, 1  ;;  %v1270_v2 = vmax.f32 %v1238_v37, 0.0  ;;  %v7607_v24 = vsel %vm7325_vm6, 0, %v1473_v27 }
 0x327   : > { %v1273_v49 = vmax.f32 %v1241_v26, 0.0  ;;  %v1612_v62 = vor.u32 %v1611_v6, %v1517_v8  ;;  %v1477_v54 = vrot.slane %v1475_v30, 7 }
 0x328   : > { %v1271_v23 = vmax.f32 %v1239_v51, 0.0  ;;  %v1610_v59 = vor.u32 %v1609_v1, %v1510_v45 }
 0x329   : > { %v7601_v56 = vpack.c.bf16 %v1273_v49, %v1272_v44  ;;  %v7619_v44 = vsel %vm7331_vm7, %v1612_v62, 0 }
 0x32a   : > { %v7603_v63 = vpack.c.bf16 %v1271_v23, %v1270_v2  ;;  %v7611_v38 = vsel %vm7331_vm7, %v1610_v59, 0  ;;  %v1480_v59 = vor.u32 %v1478_v20, %v1477_v54  ;;  %v1484_v20 = vrot.slane %v1482_v34, 7 }
 0x32b   : > { %1980 = vmatmul.mubr.bf16.gmra.mrb[32].mxu1 %v7607_v24  ;;  %5468 = vmatprep.mubr.bf16.mxu0 %v7611_v38  ;;  %v8876_v2 = vshll.u32 %v7601_v56, 16  ;;  %v8877_v49 = vshrl.u32 %v7601_v56, 16  ;;  %v1421_v54 = vrot.slane %v1419_v40, 7  ;;  %v6013_v40 = vld [vmem:[#allocation13 + $0x88] sm:$0xff]  }
 0x32c   : > { %1987 = vmatprep.mubr.bf16.mxu1 %v7414_v3  ;;  %5469 = vmatmul.mubr.bf16.gmra.mrb[56].mxu0 %v7619_v44  ;;  %v8878_v23 = vshll.u32 %v7603_v63, 16  ;;  %v8879_v37 = vshrl.u32 %v7603_v63, 16  ;;  %v7639_v27 = vsel %vm7325_vm6, 0, %v1480_v59  ;;  %v1487_v34 = vor.u32 %v1485_v17, %v1484_v20  ;;  %v6014_v20 = vld [vmem:[#allocation13 + $0x90] sm:$0xff]  }
 0x32d   : > { %v1615_v30 = vrot.slane %v8876_v2, 1 }
 0x32e   : > { %v1613_v26 = vrot.slane %v8878_v23, 1 }
 0x32f   : > { %v1616_v6 = vor.u32 %v1615_v30, %v8877_v49  ;;  %v8955_v30 = vshll.u32 %v7410_v61, 16 }
 0x330   : > { %v1614_v51 = vor.u32 %v1613_v26, %v8879_v37  ;;  %v7664_v26 = vsel %vm7325_vm6, 0, %v1487_v34  ;;  %v8958_v34 = vshrl.u32 %v7510_v5, 16 }
 0x331   : > { %v7651_v62 = vsel %vm7331_vm7, %v1616_v6, 0  ;;  %v1424_v59 = vor.u32 %v8955_v30, %v1421_v54  ;;  %v8956_v6 = vshrl.u32 %v7458_v55, 16 }
 0x332   : > { %v7643_v1 = vsel %vm7331_vm7, %v1614_v51, 0  ;;  %v1498_v30 = vrot.slane %v8958_v34, 7 }
 0x333   : > { %1988 = vmatmul.mubr.bf16.gmra.mrb[36].mxu1 %v7639_v27  ;;  %5472 = vmatprep.mubr.bf16.mxu0 %v7643_v1  ;;  %v1491_v51 = vrot.slane %v8956_v6, 7  ;;  %v1565_v2 = vsel %vm7325_vm6, 0, %v1424_v59  ;;  %v6015_v59 = vld [vmem:[#allocation13 + $0x98] sm:$0xff]   ;;  %v6016_v6 = vld [vmem:[#allocation13 + $0xa0] sm:$0xff]  }
 0x334   : > { %1995 = vmatprep.mubr.bf16.mxu1 %v7465_v0  ;;  %5473 = vmatmul.mubr.bf16.gmra.mrb[60].mxu0 %v7651_v62 }
 0x335   : > { %2397 = vmatprep.mubr.bf16.mxu0 %v7410_v61  ;;  %v8957_v61 = vshll.u32 %v7458_v55, 16 }
 0x337   : > { %v1494_v17 = vor.u32 %v8957_v61, %v1491_v51 }
 0x339   : > { %v7678_v54 = vsel %vm7325_vm6, 0, %v1494_v17 }
 0x33b   : > { %1996 = vmatmul.mubr.bf16.gmra.mrb[40].mxu1 %v7664_v26 }
 0x33c   : > { %2003 = vmatprep.mubr.bf16.mxu1 %v7458_v55  ;;  %2398 = vmatmul.mubr.bf16.vlgmr.msra.gmra.mrb[64].mxu0 %v1565_v2 }
 0x33d   : > { %5477 = vmatpush3.bf16.msra.mxu0 %v7498_v39  ;;  %2405 = vmatprep.mubr.bf16.mxu0 %v7307_v11  ;;  %v1401_v11 = vpop.f32.mrb[4].mxu1  ;;  %v8959_v39 = vshll.u32 %v7510_v5, 16 }
 0x33e   : > { %5478 = vmatprep.subr.bf16.mxu0 %v6013_v40  ;;  %v1408_v51 = vmul.f32 %v7291_v48, %v1401_v11 }
 0x33f   : > { %v1501_v2 = vor.u32 %v8959_v39, %v1498_v30 }
 0x340   : > { %v1410_v61 = vadd.f32 %v7293_v50, %v1408_v51 }
 0x341   : > { %5479 = vmatpush3.bf16.msra.mxu0 %v6013_v40  ;;  %v5426_v40 = vpop.f32.mrb[5].mxu1  ;;  %v7692_v17 = vsel %vm7325_vm6, 0, %v1501_v2  ;;  %v8961_v2 = vshll.u32 %v7505_v57, 16 }
 0x342   : > { %5480 = vmatprep.subr.bf16.mxu0 %v6014_v20  ;;  %v1404_v30 = vpop.f32.mrb[6].mxu1  ;;  %v1412_v11 = vmax.f32 %v1410_v61, 0.0  ;;  %v6018_v40 = vld [vmem:[#allocation13 + $0xb0] sm:$0xff]   ;;  %v6022_v61 = vld [vmem:[#allocation13 + $0xb8] sm:$0xff]  }
 0x343   : > { %2004 = vmatmul.mubr.bf16.gmra.mrb[44].mxu1 %v7678_v54  ;;  %v1409_v39 = vmul.f32 %v7291_v48, %v1404_v30  ;;  %v1512_v48 = vrot.slane %v1510_v45, 7 }
 0x344   : > { %2011 = vmatprep.mubr.bf16.mxu1 %v7510_v5  ;;  %2406 = vmatmul.mubr.bf16.gmra.mrb[68].mxu0 %v7344_v52  ;;  %v8960_v52 = vshrl.u32 %v7505_v57, 16  ;;  %v1415_v49 = vmul.f32 0.0, %v1412_v11  ;;  %v8963_v11 = vshrl.u32 %v7603_v63, 16 }
 0x345   : > { %2413 = vmatprep.mubr.bf16.mxu0 %v7303_v7  ;;  %5481 = vmatpush3.bf16.msra.mxu0 %v6014_v20  ;;  %v6017_v20 = vld [vmem:[#allocation13 + $0xa8] sm:$0xff]  }
 0x346   : > { %5482 = vmatprep.subr.bf16.mxu0 %v6015_v59  ;;  %v1505_v34 = vrot.slane %v8960_v52, 7  ;;  %v1411_v52 = vadd.f32 %v7293_v50, %v1409_v39  ;;  %v8964_v39 = vshll.u32 %v7603_v63, 16 }
 0x348   : > { %v1508_v51 = vor.u32 %v8961_v2, %v1505_v34  ;;  %v1413_v23 = vmax.f32 %v1411_v52, 0.0  ;;  %v1515_v34 = vor.u32 %v1513_v35, %v1512_v48  ;;  %v8962_v35 = vshll.u32 %v7557_v31, 16 }
 0x349   : > { %5483 = vmatpush3.bf16.msra.mxu0 %v6015_v59  ;;  %v5427_v59 = vpop.f32.mrb[7].mxu1  ;;  %v8966_v52 = vshll.u32 %v7601_v56, 16 }
 0x34a   : > { %5484 = vmatprep.subr.bf16.mxu0 %v6016_v6  ;;  %v7706_v37 = vsel %vm7325_vm6, 0, %v1508_v51  ;;  %v7722_v45 = vsel %vm7325_vm6, 0, %v1515_v34  ;;  %v8965_v51 = vshrl.u32 %v7601_v56, 16  ;;  %v6021_v34 = vld [vmem:[#allocation13 + $0x1c8] sm:$0xff]  }
 0x34b   : > { %2012 = vmatmul.mubr.bf16.gmra.mrb[48].mxu1 %v7692_v17 }
 0x34c   : > { %2019 = vmatprep.mubr.bf16.mxu1 %v7505_v57  ;;  %2414 = vmatmul.mubr.bf16.gmra.mrb[72].mxu0 %v7377_v22 }
 0x34d   : > { %2421 = vmatprep.mubr.bf16.mxu0 %v7339_v47  ;;  %5485 = vmatpush3.bf16.msra.mxu0 %v6016_v6  ;;  %v1416_v6 = vmul.f32 0.0, %v1413_v23  ;;  %v1519_v23 = vrot.slane %v1517_v8, 7  ;;  %v1526_v8 = vrot.slane %v8963_v11, 7  ;;  %v6026_v11 = vld [vmem:[#allocation13 + $0x1d8] sm:$0xff]  }
 0x34e   : > { %5486 = vmatprep.subr.bf16.mxu0 %v6017_v20 }
 0x34f   : > { %v7713_v50 = vpack.c.bf16 %v1416_v6, %v1415_v49  ;;  %v1522_v49 = vor.u32 %v8962_v35, %v1519_v23  ;;  %v1529_v59 = vor.u32 %v8964_v39, %v1526_v8  ;;  %v6020_v6 = vld [vmem:[#allocation13 + $0x180] sm:$0xff]   ;;  %v6023_v23 = vld [vmem:[#allocation13 + $0x188] sm:$0xff]   ;;  %v6024_v35 = vld [vmem:[#allocation13 + $0x1d0] sm:$0xff]  }
 0x350   : > { %v6027_v8 = vld [vmem:[#allocation13 + $0x198] sm:$0xff]   ;;  %v6028_v39 = vld [vmem:[#allocation13 + $0x1e0] sm:$0xff]  }
 0x351   : > { %5487 = vmatpush3.bf16.msra.mxu0 %v6017_v20  ;;  %v7718_v20 = vld [vmem:[#allocation13 + $0x200] sm:$0xff]   ;;  %v7735_v30 = vsel %vm7325_vm6, 0, %v1522_v49  ;;  %v7747_v2 = vsel %vm7325_vm6, 0, %v1529_v59  ;;  %v6025_v49 = vld [vmem:[#allocation13 + $0x190] sm:$0xff]  }
 0x352   : > { %5488 = vmatprep.subr.bf16.mxu0 %v6018_v40  ;;  %v6030_v59 = vld [vmem:[#allocation13 + $0x1a0] sm:$0xff]  }
 0x353   : > { %2020 = vmatmul.mubr.bf16.gmra.mrb[52].mxu1 %v7706_v37 }
 0x354   : > { %2027 = vmatprep.mubr.bf16.mxu1 %v7564_v42  ;;  %2422 = vmatmul.mubr.bf16.gmra.mrb[76].mxu0 %v7424_v13 }
 0x355   : > { %2429 = vmatprep.mubr.bf16.mxu0 %v7335_v41  ;;  %5489 = vmatpush3.bf16.msra.mxu0 %v6018_v40  ;;  %v1533_v40 = vrot.slane %v8965_v51, 7  ;;  %v6031_v51 = vld [vmem:[#allocation13 + $0x1e8] sm:$0xff]  }
 0x356   : > { %5490 = vmatprep.subr.bf16.mxu0 %v6022_v61 }
 0x357   : > { %v1536_v48 = vor.u32 %v8966_v52, %v1533_v40  ;;  %v1640_v40 = vsel %vm7331_vm7, %v7555_v16, 0  ;;  %v6032_v52 = vld [vmem:[#allocation13 + $0x1a8] sm:$0xff]   ;;  %v6037_v16 = vld [vmem:[#allocation13 + $0x1b8] sm:$0xff]  }
 0x359   : > { %5491 = vmatpush3.bf16.msra.mxu0 %v6022_v61  ;;  %v7759_v61 = vsel %vm7325_vm6, 0, %v1536_v48  ;;  %v6033_v48 = vld [vmem:[#allocation13 + $0x1f0] sm:$0xff]  }
 0x35a   : > { %5524 = vmatprep.subr.bf16.mxu0 %v7718_v20 }
 0x35b   : > { %2028 = vmatmul.mubr.bf16.gmra.mrb[56].mxu1 %v7722_v45 }
 0x35c   : > { %2035 = vmatprep.mubr.bf16.mxu1 %v7557_v31  ;;  %2430 = vmatmul.mubr.bf16.gmra.mrb[80].mxu0 %v7463_v60 }
 0x35d   : > { %2437 = vmatprep.mubr.bf16.mxu0 %v7379_v25 }
 0x363   : > { %2036 = vmatmul.mubr.bf16.gmra.mrb[60].mxu1 %v7735_v30 }
 0x364   : > { %2043 = vmatprep.mubr.bf16.mxu1 %v7603_v63  ;;  %2438 = vmatmul.mubr.bf16.gmra.mrb[84].mxu0 %v7515_v10 }
 0x365   : > { %2445 = vmatprep.mubr.bf16.mxu0 %v7372_v19 }
 0x36b   : > { %2044 = vmatmul.mubr.bf16.gmra.mrb[64].mxu1 %v7747_v2 }
 0x36c   : > { %2051 = vmatprep.mubr.bf16.mxu1 %v7601_v56  ;;  %2446 = vmatmul.mubr.bf16.gmra.mrb[88].mxu0 %v7562_v43 }
 0x36d   : > { %2453 = vmatprep.mubr.bf16.mxu0 %v7419_v9 }
 0x373   : > { %2052 = vmatmul.mubr.bf16.gmra.mrb[68].mxu1 %v7759_v61 }
 0x374   : > { %2454 = vmatmul.mubr.bf16.gmra.mrb[92].mxu0 %v7607_v24  ;;  %2485 = vmatprep.mubr.bf16.mxu1 %v7510_v5 }
 0x375   : > { %2461 = vmatprep.mubr.bf16.mxu0 %v7414_v3 }
 0x37b   : > { %2486 = vmatmul.mubr.bf16.vlgmr.msra.gmra.mrb[72].mxu1 %v7692_v17 }
 0x37c   : > { %2462 = vmatmul.mubr.bf16.gmra.mrb[96].mxu0 %v7639_v27  ;;  %2493 = vmatprep.mubr.bf16.mxu1 %v7505_v57 }
 0x37d   : > { %2469 = vmatprep.mubr.bf16.mxu0 %v7465_v0  ;;  %5229 = vmatpush3.bf16.msra.mxu1 %v6020_v6  ;;  %v6034_v6 = vld [vmem:[#allocation13 + $0x208] sm:$0xff]  }
 0x37e   : > { %5230 = vmatprep.subr.bf16.mxu1 %v6021_v34  ;;  %v6035_v34 = vld [vmem:[#allocation13 + $0x1b0] sm:$0xff]  }
 0x381   : > { %5231 = vmatpush3.bf16.msra.mxu1 %v6023_v23  ;;  %v6036_v23 = vld [vmem:[#allocation13 + $0x1f8] sm:$0xff]  }
 0x382   : > { %5232 = vmatprep.subr.bf16.mxu1 %v6024_v35  ;;  %v6038_v35 = vld [vmem:[#allocation13 + $0x210] sm:$0xff]  }
 0x383   : > { %2494 = vmatmul.mubr.bf16.gmra.mrb[76].mxu1 %v7706_v37 }
 0x384   : > { %2470 = vmatmul.mubr.bf16.gmra.mrb[100].mxu0 %v7664_v26  ;;  %2501 = vmatprep.mubr.bf16.mxu1 %v7564_v42 }
 0x385   : > { %2477 = vmatprep.mubr.bf16.mxu0 %v7458_v55  ;;  %5233 = vmatpush3.bf16.msra.mxu1 %v6025_v49  ;;  %v6039_v49 = vld [vmem:[#allocation13 + $0x218] sm:$0xff]  }
 0x386   : > { %5234 = vmatprep.subr.bf16.mxu1 %v6026_v11  ;;  %v6042_v11 = vld [vmem:[#allocation13 + $0x230] sm:$0xff]  }
 0x389   : > { %5235 = vmatpush3.bf16.msra.mxu1 %v6027_v8 }
 0x38a   : > { %5236 = vmatprep.subr.bf16.mxu1 %v6028_v39 }
 0x38b   : > { %2502 = vmatmul.mubr.bf16.gmra.mrb[80].mxu1 %v7722_v45 }
 0x38c   : > { %2478 = vmatmul.mubr.bf16.gmra.mrb[104].mxu0 %v7678_v54  ;;  %2509 = vmatprep.mubr.bf16.mxu1 %v7557_v31 }
 0x38d   : > { %5492 = vmatprep.mubr.bf16.mxu0 %v1640_v40  ;;  %5237 = vmatpush3.bf16.msra.mxu1 %v6030_v59 }
 0x38e   : > { %5238 = vmatprep.subr.bf16.mxu1 %v6031_v51 }
 0x391   : > { %5239 = vmatpush3.bf16.msra.mxu1 %v6032_v52 }
 0x392   : > { %5240 = vmatprep.subr.bf16.mxu1 %v6033_v48 }
 0x393   : > { %2510 = vmatmul.mubr.bf16.gmra.mrb[84].mxu1 %v7735_v30 }
 0x394   : > { %2517 = vmatprep.mubr.bf16.mxu1 %v7603_v63  ;;  %5493 = vmatmul.mubr.bf16.vlgmr.msra.gmra.mrb[32].mxu0 %v7348_v53  ;;  %v6040_v53 = vld [vmem:[#allocation13 + $0x220] sm:$0xff]  }
 0x395   : > { %5525 = vmatpush3.bf16.msra.mxu0 %v7718_v20  ;;  %5496 = vmatprep.mubr.bf16.mxu0 %v7356_v58  ;;  %v6041_v20 = vld [vmem:[#allocation13 + $0x228] sm:$0xff]  }
 0x396   : > { %5526 = vmatprep.subr.bf16.mxu0 %v6034_v6  ;;  %5241 = vmatpush3.bf16.msra.mxu1 %v6035_v34 }
 0x397   : > { %5242 = vmatprep.subr.bf16.mxu1 %v6036_v23 }
 0x399   : > { %5527 = vmatpush3.bf16.msra.mxu0 %v6034_v6 }
 0x39a   : > { %5243 = vmatpush3.bf16.msra.mxu1 %v6037_v16  ;;  %5528 = vmatprep.subr.bf16.mxu0 %v6038_v35 }
 0x39b   : > { %2518 = vmatmul.mubr.bf16.gmra.mrb[88].mxu1 %v7747_v2 }
 0x39c   : > { %5497 = vmatmul.mubr.bf16.gmra.mrb[36].mxu0 %v7384_v28  ;;  %2912 = vmatprep.mubr.bf16.mxu1 %v7303_v7  ;;  %v6043_v7 = vld [vmem:[#allocation13 + $0x238] sm:$0xff]  }
 0x39d   : > { %5500 = vmatprep.mubr.bf16.mxu0 %v7392_v36  ;;  %5529 = vmatpush3.bf16.msra.mxu0 %v6038_v35 }
 0x39e   : > { %5530 = vmatprep.subr.bf16.mxu0 %v6039_v49 }
 0x3a1   : > { %5531 = vmatpush3.bf16.msra.mxu0 %v6039_v49 }
 0x3a2   : > { %5532 = vmatprep.subr.bf16.mxu0 %v6040_v53 }
 0x3a3   : > { %2913 = vmatmul.mubr.bf16.vlgmr.msra.gmra.mrb[92].mxu1 %v7377_v22  ;;  %v6046_v22 = vld [vmem:[#allocation17 + $0x4] ss:$8 sps:$4 sm:$0xff]  }
 0x3a4   : > { %5501 = vmatmul.mubr.bf16.gmra.mrb[40].mxu0 %v7428_v14  ;;  %2920 = vmatprep.mubr.bf16.mxu1 %v7339_v47  ;;  %v6044_v47 = vld [vmem:[#allocation17] ss:$8 sps:$4 sm:$0xff]  }
 0x3a5   : > { %5504 = vmatprep.mubr.bf16.mxu0 %v7436_v18  ;;  %5533 = vmatpush3.bf16.msra.mxu0 %v6040_v53  ;;  %v6061_v53 = vld [vmem:[#allocation22 + $0x4] ss:$8 sps:$4 sm:$0xff]  }
 0x3a6   : > { %5534 = vmatprep.subr.bf16.mxu0 %v6041_v20  ;;  %3456 = vmatprep.subr.bf16.mxu1 %v6046_v22 }
 0x3a7   : > { %3457 = vmatpush1.bf16.msra.mxu1 %v6044_v47 }
 0x3a9   : > { %5535 = vmatpush3.bf16.msra.mxu0 %v6041_v20 }
 0x3aa   : > { %5536 = vmatprep.subr.bf16.mxu0 %v6042_v11 }
 0x3ab   : > { %2921 = vmatmul.mubr.bf16.gmra.mrb[96].mxu1 %v7424_v13 }
 0x3ac   : > { %5505 = vmatmul.mubr.bf16.gmra.mrb[44].mxu0 %v7470_v4  ;;  %2928 = vmatprep.mubr.bf16.mxu1 %v7335_v41  ;;  %v6047_v41 = vld [vmem:[#allocation17 + $0x10] ss:$8 sps:$4 sm:$0xff]  }
 0x3ad   : > { %5508 = vmatprep.mubr.bf16.mxu0 %v7480_v15  ;;  %5537 = vmatpush3.bf16.msra.mxu0 %v6042_v11 }
 0x3ae   : > { %5538 = vmatprep.subr.bf16.mxu0 %v6043_v7 }
 0x3b1   : > { %5539 = vmatpush3.bf16.msra.mxu0 %v6043_v7 }
 0x3b2   : > { %3913 = vmatprep.subr.bf16.mxu0 %v6061_v53 }
 0x3b3   : > { %2929 = vmatmul.mubr.bf16.gmra.mrb[100].mxu1 %v7463_v60 }
 0x3b4   : > { %5509 = vmatmul.mubr.bf16.gmra.mrb[48].mxu0 %v7519_v12  ;;  %2936 = vmatprep.mubr.bf16.mxu1 %v7379_v25  ;;  %v6049_v25 = vld [vmem:[#allocation17 + $0x14] ss:$8 sps:$4 sm:$0xff]  }
 0x3b5   : > { %5512 = vmatprep.mubr.bf16.mxu0 %v7528_v21  ;;  %3458 = vmatprep.subr.bf16.mxu1 %v6049_v25 }
 0x3b6   : > { %3459 = vmatpush1.bf16.msra.mxu1 %v6047_v41 }
 0x3bb   : > { %2937 = vmatmul.mubr.bf16.gmra.mrb[104].mxu1 %v7515_v10 }
 0x3bc   : > { %5513 = vmatmul.mubr.bf16.gmra.mrb[52].mxu0 %v7569_v46  ;;  %2944 = vmatprep.mubr.bf16.mxu1 %v7372_v19 }
 0x3bd   : > { %5516 = vmatprep.mubr.bf16.mxu0 %v7579_v32 }
 0x3c3   : > { %2945 = vmatmul.mubr.bf16.gmra.mrb[108].mxu1 %v7562_v43 }
 0x3c4   : > { %5517 = vmatmul.mubr.bf16.gmra.mrb[56].mxu0 %v7611_v38  ;;  %2952 = vmatprep.mubr.bf16.mxu1 %v7419_v9 }
 0x3c5   : > { %5520 = vmatprep.mubr.bf16.mxu0 %v7619_v44 }
 0x3cb   : > { %2953 = vmatmul.mubr.bf16.gmra.mrb[112].mxu1 %v7607_v24  ;;  %v6050_v24 = vld [vmem:[#allocation17 + $0x20] ss:$8 sps:$4 sm:$0xff]  }
 0x3cc   : > { %5521 = vmatmul.mubr.bf16.gmra.mrb[60].mxu0 %v7643_v1  ;;  %2960 = vmatprep.mubr.bf16.mxu1 %v7414_v3  ;;  %v6052_v3 = vld [vmem:[#allocation17 + $0x24] ss:$8 sps:$4 sm:$0xff]  }
 0x3cd   : > { %5540 = vmatprep.mubr.bf16.mxu0 %v7356_v58  ;;  %3460 = vmatprep.subr.bf16.mxu1 %v6052_v3 }
 0x3ce   : > { %v4972_v19 = vpop.f32.mrb[8].mxu1  ;;  %3461 = vmatpush1.bf16.msra.mxu1 %v6050_v24 }
 0x3cf   : > { %v4973_v13 = vpop.f32.mrb[9].mxu1 }
 0x3d0   : > { %v7812_v60 = vadd.f32 %v4973_v13, %v4972_v19  ;;  %v4975_v10 = vpop.f32.mrb[10].mxu1  ;;  %v6062_v13 = vld [vmem:[#allocation17 + $0x50] ss:$8 sps:$4 sm:$0xff]  }
 0x3d1   : > { %v4976_v9 = vpop.f32.mrb[11].mxu1 }
 0x3d2   : > { %v7814_v43 = vadd.f32 %v4976_v9, %v4975_v10  ;;  %v6064_v10 = vld [vmem:[#allocation17 + $0x54] ss:$8 sps:$4 sm:$0xff]   ;;  %v6067_v9 = vld [vmem:[#allocation22 + $0x14] ss:$8 sps:$4 sm:$0xff]  }
 0x3d3   : > { %2961 = vmatmul.mubr.bf16.gmra.mrb[116].mxu1 %v7639_v27 }
 0x3d4   : > { %2968 = vmatprep.mubr.bf16.mxu1 %v7465_v0  ;;  %5541 = vmatmul.mubr.bf16.vlgmr.msra.gmra.mrb[32].mxu0 %v7384_v28 }
 0x3d5   : > { %5544 = vmatprep.mubr.bf16.mxu0 %v7392_v36 }
 0x3d6   : > { %v4978_v8 = vpop.f32.mrb[12].mxu1 }
 0x3d7   : > { %v4979_v58 = vpop.f32.mrb[13].mxu1 }
 0x3d8   : > { %v7820_v39 = vadd.f32 %v4979_v58, %v4978_v8  ;;  %v4981_v59 = vpop.f32.mrb[14].mxu1 }
 0x3d9   : > { %v4982_v51 = vpop.f32.mrb[15].mxu1 }
 0x3da   : > { %v7822_v40 = vadd.f32 %v4982_v51, %v4981_v59 }
 0x3db   : > { %2969 = vmatmul.mubr.bf16.gmra.mrb[120].mxu1 %v7664_v26 }
 0x3dc   : > { %2976 = vmatprep.mubr.bf16.mxu1 %v7458_v55  ;;  %5545 = vmatmul.mubr.bf16.gmra.mrb[36].mxu0 %v7428_v14  ;;  %v6053_v55 = vld [vmem:[#allocation17 + $0x30] ss:$8 sps:$4 sm:$0xff]   ;;  %v6055_v14 = vld [vmem:[#allocation17 + $0x34] ss:$8 sps:$4 sm:$0xff]  }
 0x3dd   : > { %5548 = vmatprep.mubr.bf16.mxu0 %v7436_v18  ;;  %3462 = vmatprep.subr.bf16.mxu1 %v6055_v14 }
 0x3de   : > { %v4984_v28 = vpop.f32.mrb[16].mxu1  ;;  %3463 = vmatpush1.bf16.msra.mxu1 %v6053_v55 }
 0x3df   : > { %v4985_v36 = vpop.f32.mrb[17].mxu1 }
 0x3e0   : > { %v7828_v0 = vadd.f32 %v4985_v36, %v4984_v28  ;;  %v4987_v27 = vpop.f32.mrb[18].mxu1 }
 0x3e1   : > { %v4988_v52 = vpop.f32.mrb[19].mxu1 }
 0x3e2   : > { %v7830_v48 = vadd.f32 %v4988_v52, %v4987_v27 }
 0x3e3   : > { %2977 = vmatmul.mubr.bf16.gmra.mrb[124].mxu1 %v7678_v54 }
 0x3e4   : > { %2984 = vmatprep.mubr.bf16.mxu1 %v7510_v5  ;;  %5549 = vmatmul.mubr.bf16.gmra.mrb[40].mxu0 %v7470_v4 }
 0x3e5   : > { %5552 = vmatprep.mubr.bf16.mxu0 %v7480_v15 }
 0x3e6   : > { %v4990_v26 = vpop.f32.mrb[20].mxu1 }
 0x3e7   : > { %v4991_v18 = vpop.f32.mrb[21].mxu1 }
 0x3e8   : > { %v7836_v6 = vadd.f32 %v4991_v18, %v4990_v26  ;;  %v4993_v34 = vpop.f32.mrb[22].mxu1 }
 0x3e9   : > { %v4994_v23 = vpop.f32.mrb[23].mxu1 }
 0x3ea   : > { %v7838_v16 = vadd.f32 %v4994_v23, %v4993_v34  ;;  %v6068_v34 = vld [vmem:[#allocation17 + $0x60] ss:$8 sps:$4 sm:$0xff]  }
 0x3eb   : > { %2985 = vmatmul.mubr.bf16.gmra.mrb[128].mxu1 %v7692_v17  ;;  %v6056_v17 = vld [vmem:[#allocation17 + $0x40] ss:$8 sps:$4 sm:$0xff]  }
 0x3ec   : > { %2992 = vmatprep.mubr.bf16.mxu1 %v7505_v57  ;;  %5553 = vmatmul.mubr.bf16.gmra.mrb[44].mxu0 %v7519_v12  ;;  %v6058_v57 = vld [vmem:[#allocation17 + $0x44] ss:$8 sps:$4 sm:$0xff]  }
 0x3ed   : > { %5556 = vmatprep.mubr.bf16.mxu0 %v7528_v21  ;;  %3464 = vmatprep.subr.bf16.mxu1 %v6058_v57  ;;  %v6059_v21 = vld [vmem:[#allocation22] ss:$8 sps:$4 sm:$0xff]  }
 0x3ee   : > { %v4996_v4 = vpop.f32.mrb[24].mxu1  ;;  %3465 = vmatpush1.bf16.msra.mxu1 %v6056_v17  ;;  %3914 = vmatpush1.bf16.msra.mxu0 %v6059_v21  ;;  %v6073_v17 = vld [vmem:[#allocation22 + $0x24] ss:$8 sps:$4 sm:$0xff]  }
 0x3ef   : > { %v4997_v15 = vpop.f32.mrb[25].mxu1  ;;  %3466 = vmatprep.subr.bf16.mxu1 %v6064_v10  ;;  %3915 = vmatprep.subr.bf16.mxu0 %v6067_v9 }
 0x3f0   : > { %v7844_v5 = vadd.f32 %v4997_v15, %v4996_v4  ;;  %v4999_v54 = vpop.f32.mrb[26].mxu1 }
 0x3f1   : > { %v5000_v35 = vpop.f32.mrb[27].mxu1 }
 0x3f2   : > { %v7846_v49 = vadd.f32 %v5000_v35, %v4999_v54  ;;  %3467 = vmatpush1.bf16.msra.mxu1 %v6062_v13  ;;  %v6071_v35 = vld [vmem:[#allocation22 + $0x20] ss:$8 sps:$4 sm:$0xff]  }
 0x3f3   : > { %2993 = vmatmul.mubr.bf16.gmra.mrb[132].mxu1 %v7706_v37  ;;  %3468 = vmatprep.subr.bf16.mxu1 %v6070_v33 }
 0x3f4   : > { %3000 = vmatprep.mubr.bf16.mxu1 %v7564_v42  ;;  %5557 = vmatmul.mubr.bf16.gmra.mrb[48].mxu0 %v7569_v46 }
 0x3f5   : > { %5560 = vmatprep.mubr.bf16.mxu0 %v7579_v32  ;;  %v1541_v32 = vshll.u32 %v7713_v50, 16 }
 0x3f6   : > { %v5002_v12 = vpop.f32.mrb[28].mxu1  ;;  %3469 = vmatpush1.bf16.msra.mxu1 %v6068_v34 }
 0x3f7   : > { %v5003_v20 = vpop.f32.mrb[29].mxu1 }
 0x3f8   : > { %v7852_v11 = vadd.f32 %v5003_v20, %v5002_v12  ;;  %v5005_v7 = vpop.f32.mrb[30].mxu1 }
 0x3f9   : > { %v5006_v47 = vpop.f32.mrb[31].mxu1 }
 0x3fa   : > { %v7854_v37 = vadd.f32 %v5006_v47, %v5005_v7 }
 0x3fb   : > { %3001 = vmatmul.mubr.bf16.gmra.mrb[136].mxu1 %v7722_v45  ;;  %v1617_v45 = vrot.slane %v1541_v32, 1 }
 0x3fc   : > { %3008 = vmatprep.mubr.bf16.mxu1 %v7557_v31  ;;  %5561 = vmatmul.mubr.bf16.gmra.mrb[52].mxu0 %v7611_v38  ;;  %v1538_v31 = vshrl.u32 %v7713_v50, 16 }
 0x3fd   : > { %5564 = vmatprep.mubr.bf16.mxu0 %v7619_v44  ;;  %v6065_v44 = vld [vmem:[#allocation22 + $0x10] ss:$8 sps:$4 sm:$0xff]  }
 0x3fe   : > { %v5008_v42 = vpop.f32.mrb[32].mxu1  ;;  %v1618_v3 = vor.u32 %v1617_v45, %v1538_v31  ;;  %3916 = vmatpush1.bf16.msra.mxu0 %v6065_v44 }
 0x3ff   : > { %v5009_v46 = vpop.f32.mrb[33].mxu1  ;;  %3917 = vmatprep.subr.bf16.mxu0 %v6073_v17 }
 0x400   : > { %v7861_v22 = vadd.f32 %v5009_v46, %v5008_v42  ;;  %v5011_v41 = vpop.f32.mrb[34].mxu1 }
 0x401   : > { %v5012_v25 = vpop.f32.mrb[35].mxu1 }
 0x402   : > { %v7863_v19 = vadd.f32 %v5012_v25, %v5011_v41  ;;  %3918 = vmatpush1.bf16.msra.mxu0 %v6071_v35 }
 0x403   : > { %3009 = vmatmul.mubr.bf16.gmra.mrb[140].mxu1 %v7735_v30 }
 0x404   : > { %3016 = vmatprep.mubr.bf16.mxu1 %v7603_v63  ;;  %5565 = vmatmul.mubr.bf16.gmra.mrb[56].mxu0 %v7643_v1  ;;  %v1657_v1 = vsel %vm7331_vm7, %v1618_v3, 0  ;;  %v6076_v3 = vld [vmem:[#allocation17 + $0x74] ss:$8 sps:$4 sm:$0xff]  }
 0x405   : > { %5568 = vmatprep.mubr.bf16.mxu0 %v7651_v62  ;;  %3470 = vmatprep.subr.bf16.mxu1 %v6076_v3 }
 0x406   : > { %v5014_v38 = vpop.f32.mrb[36].mxu1 }
 0x407   : > { %v5015_v24 = vpop.f32.mrb[37].mxu1 }
 0x408   : > { %v7870_v8 = vadd.f32 %v5015_v24, %v5014_v38  ;;  %v5017_v58 = vpop.f32.mrb[38].mxu1 }
 0x409   : > { %v5018_v30 = vpop.f32.mrb[39].mxu1 }
 0x40a   : > { %v7872_v63 = vadd.f32 %v5018_v30, %v5017_v58 }
 0x40b   : > { %3017 = vmatmul.mubr.bf16.gmra.mrb[144].mxu1 %v7747_v2  ;;  %v1540_v2 = vrot.slane %v1538_v31, 7 }
 0x40c   : > { %3024 = vmatprep.mubr.bf16.mxu1 %v7601_v56  ;;  %5569 = vmatmul.mubr.bf16.gmra.mrb[60].mxu0 %v1657_v1 }
 0x40d   : > { %v1543_v54 = vor.u32 %v1541_v32, %v1540_v2 }
 0x40e   : > { %v5020_v62 = vpop.f32.mrb[40].mxu1 }
 0x40f   : > { %v5021_v59 = vpop.f32.mrb[41].mxu1  ;;  %v5108_v51 = vpop.f32.mrb[64].mxu0  ;;  %v1582_v47 = vsel %vm7325_vm6, 0, %v1543_v54 }
 0x410   : > { %v7878_v28 = vadd.f32 %v5021_v59, %v5020_v62  ;;  %v5023_v36 = vpop.f32.mrb[42].mxu1  ;;  %v5109_v27 = vpop.f32.mrb[65].mxu0  ;;  %v6077_v62 = vld [vmem:[#allocation22 + $0x30] ss:$8 sps:$4 sm:$0xff]   ;;  %v6079_v59 = vld [vmem:[#allocation22 + $0x34] ss:$8 sps:$4 sm:$0xff]  }
 0x411   : > { %v5110_v52 = vadd.f32 %v5109_v27, %v5108_v51  ;;  %v5024_v55 = vpop.f32.mrb[43].mxu1  ;;  %v5111_v14 = vpop.f32.mrb[66].mxu0  ;;  %3919 = vmatprep.subr.bf16.mxu0 %v6079_v59 }
 0x412   : > { %v7880_v26 = vadd.f32 %v5024_v55, %v5023_v36  ;;  %v5112_v18 = vpop.f32.mrb[67].mxu0  ;;  %3920 = vmatpush1.bf16.msra.mxu0 %v6077_v62 }
 0x413   : > { %v7883_v23 = vadd.f32 %v5110_v52, %v7812_v60  ;;  %v5113_v56 = vadd.f32 %v5112_v18, %v5111_v14  ;;  %3025 = vmatmul.mubr.bf16.gmra.mrb[148].mxu1 %v7759_v61 }
 0x414   : > { %3032 = vmatprep.mubr.bf16.mxu1 %v7713_v50 }
 0x415   : > { %v7888_v4 = vadd.f32 %v5113_v56, %v7814_v43 }
 0x416   : > { %v5026_v15 = vpop.f32.mrb[44].mxu1 }
 0x417   : > { %v5027_v57 = vpop.f32.mrb[45].mxu1  ;;  %v5114_v12 = vpop.f32.mrb[68].mxu0 }
 0x418   : > { %v7890_v21 = vadd.f32 %v5027_v57, %v5026_v15  ;;  %v5029_v60 = vpop.f32.mrb[46].mxu1  ;;  %v5115_v53 = vpop.f32.mrb[69].mxu0 }
 0x419   : > { %v5116_v20 = vadd.f32 %v5115_v53, %v5114_v12  ;;  %v5030_v61 = vpop.f32.mrb[47].mxu1  ;;  %v5117_v7 = vpop.f32.mrb[70].mxu0 }
 0x41a   : > { %v7892_v50 = vadd.f32 %v5030_v61, %v5029_v60  ;;  %v5118_v43 = vpop.f32.mrb[71].mxu0 }
 0x41b   : > { %v7897_v42 = vadd.f32 %v5116_v20, %v7820_v39  ;;  %v5119_v46 = vadd.f32 %v5118_v43, %v5117_v7  ;;  %3033 = vmatmul.mubr.bf16.gmra.mrb[152].mxu1 %v1582_v47  ;;  %v6074_v39 = vld [vmem:[#allocation17 + $0x70] ss:$8 sps:$4 sm:$0xff]  }
 0x41c   : > { %3471 = vmatpush1.bf16.msra.mxu1 %v6074_v39 }
 0x41d   : > { %v7900_v32 = vadd.f32 %v5119_v46, %v7822_v40 }
 0x41e   : > { %v5032_v41 = vpop.f32.mrb[48].mxu1 }
 0x41f   : > { %v5033_v25 = vpop.f32.mrb[49].mxu1  ;;  %v5120_v13 = vpop.f32.mrb[72].mxu0 }
 0x420   : > { %v7902_v10 = vadd.f32 %v5033_v25, %v5032_v41  ;;  %v5035_v45 = vpop.f32.mrb[50].mxu1  ;;  %v5121_v31 = vpop.f32.mrb[73].mxu0 }
 0x421   : > { %v5122_v38 = vadd.f32 %v5121_v31, %v5120_v13  ;;  %v5036_v44 = vpop.f32.mrb[51].mxu1  ;;  %v5123_v9 = vpop.f32.mrb[74].mxu0 }
 0x422   : > { %v7904_v29 = vadd.f32 %v5036_v44, %v5035_v45  ;;  %v5124_v24 = vpop.f32.mrb[75].mxu0 }
 0x423   : > { %v7907_v58 = vadd.f32 %v5122_v38, %v7828_v0  ;;  %v5125_v40 = vadd.f32 %v5124_v24, %v5123_v9  ;;  %v6655_v9 = vmov 0  }
 0x424   : > { %3945 = vmatprep.mubr.bf16.mxu0 %v6655_v9  ;;  %3488 = vmatprep.mubr.bf16.mxu1 %v6655_v9 }
 0x425   : > { %v7910_v30 = vadd.f32 %v5125_v40, %v7830_v48 }
 0x426   : > { %v5038_v1 = vpop.f32.mrb[52].mxu1 }
 0x427   : > { %v5039_v51 = vpop.f32.mrb[53].mxu1  ;;  %v5126_v36 = vpop.f32.mrb[76].mxu0 }
 0x428   : > { %v7912_v27 = vadd.f32 %v5039_v51, %v5038_v1  ;;  %v5041_v52 = vpop.f32.mrb[54].mxu1  ;;  %v5127_v55 = vpop.f32.mrb[77].mxu0 }
 0x429   : > { %v5128_v14 = vadd.f32 %v5127_v55, %v5126_v36  ;;  %v5042_v18 = vpop.f32.mrb[55].mxu1  ;;  %v5129_v0 = vpop.f32.mrb[78].mxu0 }
 0x42a   : > { %v7914_v2 = vadd.f32 %v5042_v18, %v5041_v52  ;;  %v5130_v34 = vpop.f32.mrb[79].mxu0 }
 0x42b   : > { %v7917_v48 = vadd.f32 %v5128_v14, %v7836_v6  ;;  %v5131_v33 = vadd.f32 %v5130_v34, %v5129_v0  ;;  %v6081_v34 = vld [vmem:[%s7221_s2 + $0x8] sm:$0xff]  }
 0x42d   : > { %v7920_v56 = vadd.f32 %v5131_v33, %v7838_v16 }
 0x42e   : > { %v5044_v15 = vpop.f32.mrb[56].mxu1 }
 0x42f   : > { %v5045_v54 = vpop.f32.mrb[57].mxu1  ;;  %v5132_v35 = vpop.f32.mrb[80].mxu0 }
 0x430   : > { %v7922_v17 = vadd.f32 %v5045_v54, %v5044_v15  ;;  %v5047_v57 = vpop.f32.mrb[58].mxu1  ;;  %v5133_v12 = vpop.f32.mrb[81].mxu0 }
 0x431   : > { %v5134_v60 = vadd.f32 %v5133_v12, %v5132_v35  ;;  %v5048_v53 = vpop.f32.mrb[59].mxu1  ;;  %v5135_v20 = vpop.f32.mrb[82].mxu0 }
 0x432   : > { %v7924_v61 = vadd.f32 %v5048_v53, %v5047_v57  ;;  %v5136_v7 = vpop.f32.mrb[83].mxu0 }
 0x433   : > { %v7927_v6 = vadd.f32 %v5134_v60, %v7844_v5  ;;  %v5137_v43 = vadd.f32 %v5136_v7, %v5135_v20 }
 0x435   : > { %v7930_v16 = vadd.f32 %v5137_v43, %v7846_v49  ;;  %v6080_v49 = vld [vmem:[%s7221_s2] sm:$0xff]  }
 0x436   : > { %v5050_v47 = vpop.f32.mrb[60].mxu1  ;;  %4899 = vmatmul.mubr.msk.bf16.vlgmr.msra.gmra.mrb[108].mxu0 %vm954_vm1, %v6080_v49 }
 0x437   : > { %v5051_v46 = vpop.f32.mrb[61].mxu1  ;;  %v5138_v41 = vpop.f32.mrb[84].mxu0  ;;  %3955 = vmatprep.mubr.bf16.mxu0 %v6655_v9 }
 0x438   : > { %v7932_v25 = vadd.f32 %v5051_v46, %v5050_v47  ;;  %v5053_v13 = vpop.f32.mrb[62].mxu1  ;;  %v5139_v45 = vpop.f32.mrb[85].mxu0  ;;  %v6082_v46 = vld [vmem:[%s7221_s2 + $0x10] sm:$0xff]  }
 0x439   : > { %v5140_v31 = vadd.f32 %v5139_v45, %v5138_v41  ;;  %v5054_v38 = vpop.f32.mrb[63].mxu1  ;;  %v5141_v44 = vpop.f32.mrb[86].mxu0 }
 0x43a   : > { %v7936_v5 = vadd.f32 %v5054_v38, %v5053_v13  ;;  %v5142_v24 = vpop.f32.mrb[87].mxu0 }
 0x43b   : > { %v7941_v39 = vadd.f32 %v5140_v31, %v7852_v11  ;;  %v5143_v3 = vadd.f32 %v5142_v24, %v5141_v44 }
 0x43d   : > { %v7945_v40 = vadd.f32 %v5143_v3, %v7854_v37 }
 0x43e   : > { %v5056_v1 = vpop.f32.mrb[64].mxu1  ;;  %4900 = vmatmul.mubr.msk.bf16.gmra.mrb[112].mxu0 %vm954_vm1, %v6081_v34 }
 0x43f   : > { %v5057_v62 = vpop.f32.mrb[65].mxu1  ;;  %v5144_v59 = vpop.f32.mrb[88].mxu0  ;;  %3965 = vmatprep.mubr.bf16.mxu0 %v6655_v9 }
 0x440   : > { %v7947_v51 = vadd.f32 %v5057_v62, %v5056_v1  ;;  %v5059_v36 = vpop.f32.mrb[66].mxu1  ;;  %v5145_v52 = vpop.f32.mrb[89].mxu0 }
 0x441   : > { %v5146_v55 = vadd.f32 %v5145_v52, %v5144_v59  ;;  %v5060_v14 = vpop.f32.mrb[67].mxu1  ;;  %v5147_v18 = vpop.f32.mrb[90].mxu0  ;;  %v6083_v52 = vld [vmem:[%s7221_s2 + $0x18] sm:$0xff]  }
 0x442   : > { %v7949_v0 = vadd.f32 %v5060_v14, %v5059_v36  ;;  %v5148_v11 = vpop.f32.mrb[91].mxu0 }
 0x443   : > { %v7954_v37 = vadd.f32 %v5146_v55, %v7861_v22  ;;  %v5149_v33 = vadd.f32 %v5148_v11, %v5147_v18 }
 0x445   : > { %v7958_v15 = vadd.f32 %v5149_v33, %v7863_v19 }
 0x446   : > { %v5062_v54 = vpop.f32.mrb[68].mxu1  ;;  %4901 = vmatmul.mubr.msk.bf16.gmra.mrb[116].mxu0 %vm954_vm1, %v6082_v46 }
 0x447   : > { %v5063_v35 = vpop.f32.mrb[69].mxu1  ;;  %v5150_v57 = vpop.f32.mrb[92].mxu0  ;;  %3975 = vmatprep.mubr.bf16.mxu0 %v6655_v9 }
 0x448   : > { %v7960_v12 = vadd.f32 %v5063_v35, %v5062_v54  ;;  %v5065_v60 = vpop.f32.mrb[70].mxu1  ;;  %v5151_v53 = vpop.f32.mrb[93].mxu0 }
 0x449   : > { %v5152_v20 = vadd.f32 %v5151_v53, %v5150_v57  ;;  %v5066_v7 = vpop.f32.mrb[71].mxu1  ;;  %v5153_v43 = vpop.f32.mrb[94].mxu0 }
 0x44a   : > { %v7962_v47 = vadd.f32 %v5066_v7, %v5065_v60  ;;  %v5154_v22 = vpop.f32.mrb[95].mxu0 }
 0x44b   : > { %v7967_v41 = vadd.f32 %v5152_v20, %v7870_v8  ;;  %v5155_v19 = vadd.f32 %v5154_v22, %v5153_v43  ;;  %v6084_v43 = vld [vmem:[%s7221_s2 + $0x20] sm:$0xff]  }
 0x44d   : > { %v7971_v13 = vadd.f32 %v5155_v19, %v7872_v63 }
 0x44e   : > { %v5174_v45 = vpop.f32.mrb[72].mxu1  ;;  %4902 = vmatmul.mubr.msk.bf16.gmra.mrb[120].mxu0 %vm954_vm1, %v6083_v52 }
 0x44f   : > { %v5156_v31 = vpop.f32.mrb[96].mxu0  ;;  %v5175_v38 = vpop.f32.mrb[73].mxu1  ;;  %3985 = vmatprep.mubr.bf16.mxu0 %v6655_v9 }
 0x450   : > { %v5176_v44 = vadd.f32 %v5175_v38, %v5174_v45  ;;  %v5157_v24 = vpop.f32.mrb[97].mxu0  ;;  %v5177_v49 = vpop.f32.mrb[74].mxu1 }
 0x451   : > { %v5158_v3 = vadd.f32 %v5157_v24, %v5156_v31  ;;  %v5159_v1 = vpop.f32.mrb[98].mxu0  ;;  %v5178_v62 = vpop.f32.mrb[75].mxu1 }
 0x452   : > { %v7974_v59 = vadd.f32 %v5176_v44, %v7912_v27  ;;  %v5179_v8 = vadd.f32 %v5178_v62, %v5177_v49  ;;  %v5160_v36 = vpop.f32.mrb[99].mxu0 }
 0x453   : > { %v7979_v63 = vadd.f32 %v5158_v3, %v7878_v28  ;;  %v5161_v55 = vadd.f32 %v5160_v36, %v5159_v1 }
 0x454   : > { %v7983_v14 = vadd.f32 %v5179_v8, %v7914_v2 }
 0x455   : > { %v7986_v18 = vadd.f32 %v5161_v55, %v7880_v26 }
 0x456   : > { %v5180_v27 = vpop.f32.mrb[76].mxu1  ;;  %4903 = vmatmul.mubr.msk.bf16.gmra.mrb[124].mxu0 %vm954_vm1, %v6084_v43 }
 0x457   : > { %v5162_v11 = vpop.f32.mrb[100].mxu0  ;;  %v5181_v34 = vpop.f32.mrb[77].mxu1  ;;  %3995 = vmatprep.mubr.bf16.mxu0 %v6655_v9 }
 0x458   : > { %v5182_v33 = vadd.f32 %v5181_v34, %v5180_v27  ;;  %v5163_v54 = vpop.f32.mrb[101].mxu0  ;;  %v5183_v35 = vpop.f32.mrb[78].mxu1 }
 0x459   : > { %v5164_v57 = vadd.f32 %v5163_v54, %v5162_v11  ;;  %v5165_v60 = vpop.f32.mrb[102].mxu0  ;;  %v5184_v28 = vpop.f32.mrb[79].mxu1  ;;  %v6086_v54 = vld [vmem:[%s7221_s2 + $0x30] sm:$0xff]  }
 0x45a   : > { %v7989_v53 = vadd.f32 %v5182_v33, %v7922_v17  ;;  %v5185_v20 = vadd.f32 %v5184_v28, %v5183_v35  ;;  %v5166_v7 = vpop.f32.mrb[103].mxu0 }
 0x45b   : > { %v7994_v26 = vadd.f32 %v5164_v57, %v7890_v21  ;;  %v5167_v2 = vadd.f32 %v5166_v7, %v5165_v60  ;;  %v6087_v7 = vld [vmem:[%s7221_s2 + $0x38] sm:$0xff]  }
 0x45c   : > { %v7998_v22 = vadd.f32 %v5185_v20, %v7924_v61  ;;  %v6085_v61 = vld [vmem:[%s7221_s2 + $0x28] sm:$0xff]  }
 0x45d   : > { %v8001_v46 = vadd.f32 %v5167_v2, %v7892_v50 }
 0x45e   : > { %v5186_v17 = vpop.f32.mrb[80].mxu1  ;;  %4904 = vmatmul.mubr.msk.bf16.gmra.mrb[128].mxu0 %vm954_vm1, %v6085_v61 }
 0x45f   : > { %v5168_v19 = vpop.f32.mrb[104].mxu0  ;;  %v5187_v45 = vpop.f32.mrb[81].mxu1  ;;  %4005 = vmatprep.mubr.bf16.mxu0 %v6655_v9 }
 0x460   : > { %v5188_v31 = vadd.f32 %v5187_v45, %v5186_v17  ;;  %v5169_v38 = vpop.f32.mrb[105].mxu0  ;;  %v5189_v44 = vpop.f32.mrb[82].mxu1 }
 0x461   : > { %v5170_v24 = vadd.f32 %v5169_v38, %v5168_v19  ;;  %v5171_v49 = vpop.f32.mrb[106].mxu0  ;;  %v5190_v21 = vpop.f32.mrb[83].mxu1 }
 0x462   : > { %v8004_v3 = vadd.f32 %v5188_v31, %v7932_v25  ;;  %v5191_v1 = vadd.f32 %v5190_v21, %v5189_v44  ;;  %v5172_v62 = vpop.f32.mrb[107].mxu0 }
 0x463   : > { %v8009_v50 = vadd.f32 %v5170_v24, %v7902_v10  ;;  %v5173_v8 = vadd.f32 %v5172_v62, %v5171_v49 }
 0x464   : > { %v8013_v36 = vadd.f32 %v5191_v1, %v7936_v5 }
 0x465   : > { %v8016_v52 = vadd.f32 %v5173_v8, %v7904_v29  ;;  %v6089_v8 = vld [vmem:[%s7221_s2 + $0x48] sm:$0xff]  }
 0x466   : > { %v5192_v25 = vpop.f32.mrb[84].mxu1  ;;  %4905 = vmatmul.mubr.msk.bf16.gmra.mrb[132].mxu0 %vm954_vm1, %v6086_v54  ;;  %v6090_v54 = vld [vmem:[%s7221_s2 + $0x50] sm:$0xff]  }
 0x467   : > { %v5193_v55 = vpop.f32.mrb[85].mxu1  ;;  %4015 = vmatprep.mubr.bf16.mxu0 %v6655_v9 }
 0x468   : > { %v5194_v27 = vadd.f32 %v5193_v55, %v5192_v25  ;;  %v5195_v11 = vpop.f32.mrb[86].mxu1 }
 0x469   : > { %v5196_v34 = vpop.f32.mrb[87].mxu1 }
 0x46a   : > { %v8019_v33 = vadd.f32 %v5194_v27, %v7947_v51  ;;  %v5197_v10 = vadd.f32 %v5196_v34, %v5195_v11 }
 0x46c   : > { %v8025_v5 = vadd.f32 %v5197_v10, %v7949_v0 }
 0x46e   : > { %v5198_v29 = vpop.f32.mrb[88].mxu1  ;;  %4906 = vmatmul.mubr.msk.bf16.gmra.mrb[136].mxu0 %vm954_vm1, %v6087_v7  ;;  %v6091_v7 = vld [vmem:[%s7221_s2 + $0x58] sm:$0xff]  }
 0x46f   : > { %v5199_v35 = vpop.f32.mrb[89].mxu1  ;;  %4025 = vmatprep.mubr.bf16.mxu0 %v6655_v9 }
 0x470   : > { %v5200_v57 = vadd.f32 %v5199_v35, %v5198_v29  ;;  %v5201_v60 = vpop.f32.mrb[90].mxu1 }
 0x471   : > { %v5202_v28 = vpop.f32.mrb[91].mxu1 }
 0x472   : > { %v8028_v20 = vadd.f32 %v5200_v57, %v7960_v12  ;;  %v5203_v51 = vadd.f32 %v5202_v28, %v5201_v60  ;;  %v6088_v12 = vld [vmem:[%s7221_s2 + $0x40] sm:$0xff]  }
 0x474   : > { %v8034_v43 = vadd.f32 %v5203_v51, %v7962_v47 }
 0x476   : > { %v5244_v0 = vpop.f32.mrb[92].mxu1  ;;  %4907 = vmatmul.mubr.msk.bf16.gmra.mrb[140].mxu0 %vm954_vm1, %v6088_v12  ;;  %v6092_v12 = vld [vmem:[%s7221_s2 + $0x60] sm:$0xff]  }
 0x477   : > { %v5245_v2 = vpop.f32.mrb[93].mxu1  ;;  %4035 = vmatprep.mubr.bf16.mxu0 %v6655_v9 }
 0x478   : > { %v5246_v17 = vadd.f32 %v5245_v2, %v5244_v0  ;;  %v5247_v19 = vpop.f32.mrb[94].mxu1 }
 0x479   : > { %v5248_v45 = vpop.f32.mrb[95].mxu1 }
 0x47a   : > { %v5249_v31 = vadd.f32 %v5248_v45, %v5247_v19  ;;  %v8037_v38 = vadd.f32 %v7883_v23, %v5246_v17 }
 0x47c   : > { %v8043_v44 = vadd.f32 %v7888_v4, %v5249_v31 }
 0x47e   : > { %v5250_v47 = vpop.f32.mrb[96].mxu1  ;;  %4908 = vmatmul.mubr.msk.bf16.gmra.mrb[144].mxu0 %vm954_vm1, %v6089_v8  ;;  %v6093_v8 = vld [vmem:[%s7221_s2 + $0x68] sm:$0xff]  }
 0x47f   : > { %v5251_v24 = vpop.f32.mrb[97].mxu1  ;;  %4045 = vmatprep.mubr.bf16.mxu0 %v6655_v9 }
 0x480   : > { %v5252_v49 = vadd.f32 %v5251_v24, %v5250_v47  ;;  %v5253_v21 = vpop.f32.mrb[98].mxu1 }
 0x481   : > { %v5254_v1 = vpop.f32.mrb[99].mxu1 }
 0x482   : > { %v5255_v62 = vadd.f32 %v5254_v1, %v5253_v21  ;;  %v5589_v61 = vadd.f32 %v7897_v42, %v5252_v49 }
 0x484   : > { %v5595_v23 = vadd.f32 %v7900_v32, %v5255_v62 }
 0x486   : > { %v5256_v25 = vpop.f32.mrb[100].mxu1  ;;  %4909 = vmatmul.mubr.msk.bf16.gmra.mrb[148].mxu0 %vm954_vm1, %v6090_v54 }
 0x487   : > { %v5257_v55 = vpop.f32.mrb[101].mxu1  ;;  %4055 = vmatprep.mubr.bf16.mxu0 %v6655_v9 }
 0x488   : > { %v5258_v4 = vadd.f32 %v5257_v55, %v5256_v25  ;;  %v5259_v27 = vpop.f32.mrb[102].mxu1 }
 0x489   : > { %v5260_v11 = vpop.f32.mrb[103].mxu1 }
 0x48a   : > { %v5261_v34 = vadd.f32 %v5260_v11, %v5259_v27  ;;  %v8051_v10 = vadd.f32 %v7907_v58, %v5258_v4  ;;  %v8084_v4 = vld [vmem:[#allocation14] ss:$0 sm:$0xff] }
 0x48c   : > { %v8057_v42 = vadd.f32 %v7910_v30, %v5261_v34 }
 0x48e   : > { %v5262_v29 = vpop.f32.mrb[104].mxu1  ;;  %4910 = vmatmul.mubr.msk.bf16.gmra.mrb[152].mxu0 %vm954_vm1, %v6091_v7 }
 0x48f   : > { %v5263_v32 = vpop.f32.mrb[105].mxu1  ;;  %4065 = vmatprep.mubr.bf16.mxu0 %v6655_v9 }
 0x490   : > { %v5264_v35 = vadd.f32 %v5263_v32, %v5262_v29  ;;  %v5265_v57 = vpop.f32.mrb[106].mxu1 }
 0x491   : > { %v5266_v60 = vpop.f32.mrb[107].mxu1 }
 0x492   : > { %v5267_v28 = vadd.f32 %v5266_v60, %v5265_v57  ;;  %v5601_v51 = vadd.f32 %v7917_v48, %v5264_v35 }
 0x494   : > { %v8064_v58 = vadd.f32 %v7920_v56, %v5267_v28 }
 0x496   : > { %v5268_v0 = vpop.f32.mrb[108].mxu1  ;;  %4911 = vmatmul.mubr.msk.bf16.gmra.mrb[156].mxu0 %vm954_vm1, %v6092_v12 }
 0x497   : > { %v5269_v30 = vpop.f32.mrb[109].mxu1  ;;  %4075 = vmatprep.mubr.bf16.mxu0 %v6655_v9 }
 0x498   : > { %v5270_v2 = vadd.f32 %v5269_v30, %v5268_v0  ;;  %v5271_v17 = vpop.f32.mrb[110].mxu1  ;;  %v6094_v0 = vld [vmem:[%s7221_s2 + $0x70] sm:$0xff]  }
 0x499   : > { %v5272_v19 = vpop.f32.mrb[111].mxu1 }
 0x49a   : > { %v5273_v45 = vadd.f32 %v5272_v19, %v5271_v17  ;;  %v8067_v31 = vadd.f32 %v7927_v6, %v5270_v2 }
 0x49c   : > { %v8073_v48 = vadd.f32 %v7930_v16, %v5273_v45 }
 0x49e   : > { %v5274_v56 = vpop.f32.mrb[112].mxu1  ;;  %4912 = vmatmul.mubr.msk.bf16.gmra.mrb[160].mxu0 %vm954_vm1, %v6093_v8 }
 0x49f   : > { %v5275_v47 = vpop.f32.mrb[113].mxu1  ;;  %4085 = vmatprep.mubr.bf16.mxu0 %v6655_v9 }
 0x4a0   : > { %v5276_v24 = vadd.f32 %v5275_v47, %v5274_v56  ;;  %v5277_v49 = vpop.f32.mrb[114].mxu1 }
 0x4a1   : > { %v5278_v21 = vpop.f32.mrb[115].mxu1 }
 0x4a2   : > { %v5279_v1 = vadd.f32 %v5278_v21, %v5277_v49  ;;  %v8076_v62 = vadd.f32 %v7941_v39, %v5276_v24  ;;  %v8086_v39 = vld [vmem:[#allocation16] ss:$0 sm:$0xff] }
 0x4a4   : > { %v8082_v6 = vadd.f32 %v7945_v40, %v5279_v1 }
 0x4a6   : > { %v5280_v25 = vpop.f32.mrb[116].mxu1  ;;  %4913 = vmatmul.mubr.msk.bf16.gmra.mrb[164].mxu0 %vm954_vm1, %v6094_v0 }
 0x4a7   : > { %v5281_v16 = vpop.f32.mrb[117].mxu1  ;;  %v5542_v55 = vpop.f32.mrb[32].mxu0  ;;  %4095 = vmatprep.mubr.bf16.mxu0 %v6655_v9 }
 0x4a8   : > { %v5282_v27 = vadd.f32 %v5281_v16, %v5280_v25  ;;  %v5590_v11 = vadd.f32 %v5589_v61, %v5542_v55  ;;  %v5283_v34 = vpop.f32.mrb[118].mxu1  ;;  %v3075_v54 = vpop.f32.mrb[33].mxu0 }
 0x4a9   : > { %v5593_v29 = vadd.f32 %v8037_v38, %v3075_v54  ;;  %v5284_v32 = vpop.f32.mrb[119].mxu1  ;;  %v5543_v35 = vpop.f32.mrb[34].mxu0 }
 0x4aa   : > { %v3243_v57 = vmul.f32 %v5590_v11, %v8084_v4  ;;  %v5285_v40 = vadd.f32 %v5284_v32, %v5283_v34  ;;  %v5596_v60 = vadd.f32 %v5595_v23, %v5543_v35  ;;  %v3078_v28 = vpop.f32.mrb[35].mxu0  ;;  %v8091_v7 = vadd.f32 %v7954_v37, %v5282_v27  ;;  %v6095_v35 = vld [vmem:[%s7221_s2 + $0x78] sm:$0xff]  }
 0x4ab   : > { %v3241_v61 = vmul.f32 %v5593_v29, %v8084_v4  ;;  %v5599_v30 = vadd.f32 %v8043_v44, %v3078_v28 }
 0x4ac   : > { %v3282_v38 = vadd.f32 %v8086_v39, %v3243_v57  ;;  %v3244_v2 = vmul.f32 %v5596_v60, %v8084_v4  ;;  %v8101_v17 = vadd.f32 %v7958_v15, %v5285_v40 }
 0x4ad   : > { %v3280_v23 = vadd.f32 %v8086_v39, %v3241_v61  ;;  %v3242_v37 = vmul.f32 %v5599_v30, %v8084_v4 }
 0x4ae   : > { %v3283_v19 = vadd.f32 %v8086_v39, %v3244_v2  ;;  %v5286_v45 = vpop.f32.mrb[120].mxu1  ;;  %v3314_v47 = vmax.f32 %v3282_v38, 0.0  ;;  %4914 = vmatmul.mubr.msk.bf16.gmra.mrb[168].mxu0 %vm954_vm1, %v6095_v35 }
 0x4af   : > { %v3281_v12 = vadd.f32 %v8086_v39, %v3242_v37  ;;  %v5287_v56 = vpop.f32.mrb[121].mxu1  ;;  %v5546_v44 = vpop.f32.mrb[36].mxu0  ;;  %v3312_v15 = vmax.f32 %v3280_v23, 0.0 }
 0x4b0   : > { %v3315_v24 = vmax.f32 %v3283_v19, 0.0  ;;  %v5288_v49 = vadd.f32 %v5287_v56, %v5286_v45  ;;  %v5602_v21 = vadd.f32 %v5601_v51, %v5546_v44  ;;  %v5289_v1 = vpop.f32.mrb[122].mxu1  ;;  %v3091_v8 = vpop.f32.mrb[37].mxu0 }
 0x4b1   : > { %v3313_v25 = vmax.f32 %v3281_v12, 0.0  ;;  %v5605_v16 = vadd.f32 %v8051_v10, %v3091_v8  ;;  %v5290_v55 = vpop.f32.mrb[123].mxu1  ;;  %v5547_v27 = vpop.f32.mrb[38].mxu0 }
 0x4b2   : > { %v3247_v11 = vmul.f32 %v5602_v21, %v8084_v4  ;;  %v5291_v34 = vadd.f32 %v5290_v55, %v5289_v1  ;;  %v5608_v54 = vadd.f32 %v8064_v58, %v5547_v27  ;;  %v3094_v29 = vpop.f32.mrb[39].mxu0  ;;  %v3345_v32 = vpack.c.bf16 %v3315_v24, %v3314_v47 }
 0x4b3   : > { %v3344_v57 = vpack.c.bf16 %v3313_v25, %v3312_v15  ;;  %v3245_v51 = vmul.f32 %v5605_v16, %v8084_v4  ;;  %v5611_v40 = vadd.f32 %v8057_v42, %v3094_v29  ;;  %v5625_v60 = vadd.f32 %v7967_v41, %v5288_v49 }
 0x4b4   : > { %v3248_v10 = vmul.f32 %v5608_v54, %v8084_v4  ;;  %v5631_v28 = vadd.f32 %v7971_v13, %v5291_v34  ;;  %v3286_v0 = vadd.f32 %v8086_v39, %v3247_v11 }
 0x4b5   : > { %v3284_v58 = vadd.f32 %v8086_v39, %v3245_v51  ;;  %v3246_v61 = vmul.f32 %v5611_v40, %v8084_v4  ;;  %3489 = vmatmul.mubr.bf16.vlgmr.msra.gmra.mrb[156].mxu1 %v3344_v57 }
 0x4b6   : > { %v3287_v30 = vadd.f32 %v8086_v39, %v3248_v10  ;;  %v5292_v38 = vpop.f32.mrb[124].mxu1  ;;  %3498 = vmatprep.mubr.bf16.mxu1 %v6655_v9  ;;  %v3318_v12 = vmax.f32 %v3286_v0, 0.0 }
 0x4b7   : > { %v3285_v42 = vadd.f32 %v8086_v39, %v3246_v61  ;;  %v5293_v2 = vpop.f32.mrb[125].mxu1  ;;  %v5550_v41 = vpop.f32.mrb[40].mxu0  ;;  %v3316_v56 = vmax.f32 %v3284_v58, 0.0 }
 0x4b8   : > { %v3319_v23 = vmax.f32 %v3287_v30, 0.0  ;;  %v5294_v37 = vadd.f32 %v5293_v2, %v5292_v38  ;;  %v5614_v13 = vadd.f32 %v8076_v62, %v5550_v41  ;;  %v5295_v19 = vpop.f32.mrb[126].mxu1  ;;  %v3107_v45 = vpop.f32.mrb[41].mxu0 }
 0x4b9   : > { %v3317_v44 = vmax.f32 %v3285_v42, 0.0  ;;  %v5617_v47 = vadd.f32 %v8067_v31, %v3107_v45  ;;  %v5296_v24 = vpop.f32.mrb[127].mxu1  ;;  %v5551_v49 = vpop.f32.mrb[42].mxu0 }
 0x4ba   : > { %v3251_v21 = vmul.f32 %v5614_v13, %v8084_v4  ;;  %v5297_v1 = vadd.f32 %v5296_v24, %v5295_v19  ;;  %v5620_v8 = vadd.f32 %v8082_v6, %v5551_v49  ;;  %v3110_v15 = vpop.f32.mrb[43].mxu0  ;;  %v5640_v25 = vadd.f32 %v7979_v63, %v5294_v37 }
 0x4bb   : > { %v3249_v16 = vmul.f32 %v5617_v47, %v8084_v4  ;;  %v5623_v62 = vadd.f32 %v8073_v48, %v3110_v15  ;;  %v3346_v55 = vpack.c.bf16 %v3317_v44, %v3316_v56  ;;  %v8130_v27 = vpack.c.bf16 %v3319_v23, %v3318_v12 }
 0x4bc   : > { %v3252_v11 = vmul.f32 %v5620_v8, %v8084_v4  ;;  %v5646_v31 = vadd.f32 %v7986_v18, %v5297_v1  ;;  %v3290_v34 = vadd.f32 %v8086_v39, %v3251_v21 }
 0x4bd   : > { %v3288_v54 = vadd.f32 %v8086_v39, %v3249_v16  ;;  %v3250_v6 = vmul.f32 %v5623_v62, %v8084_v4  ;;  %3499 = vmatmul.mubr.bf16.gmra.mrb[160].mxu1 %v3345_v32 }
 0x4be   : > { %v3291_v63 = vadd.f32 %v8086_v39, %v3252_v11  ;;  %v5298_v29 = vpop.f32.mrb[128].mxu1  ;;  %3508 = vmatprep.mubr.bf16.mxu1 %v6655_v9  ;;  %v3322_v58 = vmax.f32 %v3290_v34, 0.0 }
 0x4bf   : > { %v3289_v48 = vadd.f32 %v8086_v39, %v3250_v6  ;;  %v5299_v35 = vpop.f32.mrb[129].mxu1  ;;  %v5554_v57 = vpop.f32.mrb[44].mxu0  ;;  %v3320_v61 = vmax.f32 %v3288_v54, 0.0 }
 0x4c0   : > { %v3323_v51 = vmax.f32 %v3291_v63, 0.0  ;;  %v5300_v40 = vadd.f32 %v5299_v35, %v5298_v29  ;;  %v5626_v10 = vadd.f32 %v5625_v60, %v5554_v57  ;;  %v5301_v18 = vpop.f32.mrb[130].mxu1  ;;  %v3123_v0 = vpop.f32.mrb[45].mxu0 }
 0x4c1   : > { %v3321_v30 = vmax.f32 %v3289_v48, 0.0  ;;  %v5629_v38 = vadd.f32 %v8091_v7, %v3123_v0  ;;  %v5302_v32 = vpop.f32.mrb[131].mxu1  ;;  %v5555_v42 = vpop.f32.mrb[46].mxu0 }
 0x4c2   : > { %v3255_v2 = vmul.f32 %v5626_v10, %v8084_v4  ;;  %v5303_v41 = vadd.f32 %v5302_v32, %v5301_v18  ;;  %v5632_v23 = vadd.f32 %v5631_v28, %v5555_v42  ;;  %v3126_v37 = vpop.f32.mrb[47].mxu0  ;;  %v5637_v13 = vadd.f32 %v7994_v26, %v5300_v40 }
 0x4c3   : > { %v3253_v19 = vmul.f32 %v5629_v38, %v8084_v4  ;;  %v5635_v60 = vadd.f32 %v8101_v17, %v3126_v37  ;;  %v8145_v45 = vpack.c.bf16 %v3321_v30, %v3320_v61  ;;  %v8147_v12 = vpack.c.bf16 %v3323_v51, %v3322_v58 }
 0x4c4   : > { %v3256_v56 = vmul.f32 %v5632_v23, %v8084_v4  ;;  %v5643_v7 = vadd.f32 %v8001_v46, %v5303_v41  ;;  %v3294_v44 = vadd.f32 %v8086_v39, %v3255_v2 }
 0x4c5   : > { %v3292_v47 = vadd.f32 %v8086_v39, %v3253_v19  ;;  %v3254_v28 = vmul.f32 %v5635_v60, %v8084_v4  ;;  %3509 = vmatmul.mubr.bf16.gmra.mrb[164].mxu1 %v3346_v55 }
 0x4c6   : > { %v3295_v26 = vadd.f32 %v8086_v39, %v3256_v56  ;;  %v5304_v24 = vpop.f32.mrb[132].mxu1  ;;  %3518 = vmatprep.mubr.bf16.mxu1 %v6655_v9  ;;  %v3326_v62 = vmax.f32 %v3294_v44, 0.0 }
 0x4c7   : > { %v3293_v17 = vadd.f32 %v8086_v39, %v3254_v28  ;;  %v5305_v49 = vpop.f32.mrb[133].mxu1  ;;  %v5558_v21 = vpop.f32.mrb[48].mxu0  ;;  %v3324_v11 = vmax.f32 %v3292_v47, 0.0 }
 0x4c8   : > { %v3327_v1 = vmax.f32 %v3295_v26, 0.0  ;;  %v5306_v8 = vadd.f32 %v5305_v49, %v5304_v24  ;;  %v5638_v15 = vadd.f32 %v5637_v13, %v5558_v21  ;;  %v5307_v46 = vpop.f32.mrb[134].mxu1  ;;  %v3139_v16 = vpop.f32.mrb[49].mxu0 }
 0x4c9   : > { %v3325_v34 = vmax.f32 %v3293_v17, 0.0  ;;  %v5641_v54 = vadd.f32 %v5640_v25, %v3139_v16  ;;  %v5308_v6 = vpop.f32.mrb[135].mxu1  ;;  %v5559_v55 = vpop.f32.mrb[50].mxu0 }
 0x4ca   : > { %v3259_v63 = vmul.f32 %v5638_v15, %v8084_v4  ;;  %v5309_v29 = vadd.f32 %v5308_v6, %v5307_v46  ;;  %v5644_v48 = vadd.f32 %v5643_v7, %v5559_v55  ;;  %v3142_v35 = vpop.f32.mrb[51].mxu0  ;;  %v5652_v57 = vadd.f32 %v8009_v50, %v5306_v8 }
 0x4cb   : > { %v3257_v51 = vmul.f32 %v5641_v54, %v8084_v4  ;;  %v5647_v40 = vadd.f32 %v5646_v31, %v3142_v35  ;;  %v8160_v10 = vpack.c.bf16 %v3325_v34, %v3324_v11  ;;  %v8162_v18 = vpack.c.bf16 %v3327_v1, %v3326_v62 }
 0x4cc   : > { %v3298_v0 = vadd.f32 %v8086_v39, %v3259_v63  ;;  %v3260_v25 = vmul.f32 %v5644_v48, %v8084_v4  ;;  %v5658_v58 = vadd.f32 %v8016_v52, %v5309_v29 }
 0x4cd   : > { %v3296_v61 = vadd.f32 %v8086_v39, %v3257_v51  ;;  %v3258_v30 = vmul.f32 %v5647_v40, %v8084_v4  ;;  %3519 = vmatmul.mubr.bf16.gmra.mrb[168].mxu1 %v8130_v27 }
 0x4ce   : > { %v3299_v50 = vadd.f32 %v8086_v39, %v3260_v25  ;;  %v5310_v38 = vpop.f32.mrb[136].mxu1  ;;  %3528 = vmatprep.mubr.bf16.mxu1 %v6655_v9  ;;  %v3330_v2 = vmax.f32 %v3298_v0, 0.0 }
 0x4cf   : > { %v3297_v31 = vadd.f32 %v8086_v39, %v3258_v30  ;;  %v5311_v32 = vpop.f32.mrb[137].mxu1  ;;  %v5562_v42 = vpop.f32.mrb[52].mxu0  ;;  %v3328_v13 = vmax.f32 %v3296_v61, 0.0 }
 0x4d0   : > { %v3331_v41 = vmax.f32 %v3299_v50, 0.0  ;;  %v5312_v23 = vadd.f32 %v5311_v32, %v5310_v38  ;;  %v5313_v37 = vpop.f32.mrb[138].mxu1  ;;  %v3155_v52 = vpop.f32.mrb[53].mxu0 }
 0x4d1   : > { %v3329_v19 = vmax.f32 %v3297_v31, 0.0  ;;  %v5653_v60 = vadd.f32 %v5652_v57, %v3155_v52  ;;  %v5314_v56 = vpop.f32.mrb[139].mxu1  ;;  %v5563_v7 = vpop.f32.mrb[54].mxu0 }
 0x4d2   : > { %v5649_v27 = vadd.f32 %v7974_v59, %v5312_v23  ;;  %v5315_v44 = vadd.f32 %v5314_v56, %v5313_v37  ;;  %v3158_v47 = vpop.f32.mrb[55].mxu0  ;;  %v8174_v28 = vpack.c.bf16 %v3331_v41, %v3330_v2 }
 0x4d3   : > { %v3261_v26 = vmul.f32 %v5653_v60, %v8084_v4  ;;  %v5659_v24 = vadd.f32 %v5658_v58, %v3158_v47  ;;  %v8177_v17 = vpack.c.bf16 %v3329_v19, %v3328_v13 }
 0x4d4   : > { %v5650_v49 = vadd.f32 %v5649_v27, %v5562_v42  ;;  %v5655_v21 = vadd.f32 %v7983_v14, %v5315_v44 }
 0x4d5   : > { %v3300_v1 = vadd.f32 %v8086_v39, %v3261_v26  ;;  %v3262_v8 = vmul.f32 %v5659_v24, %v8084_v4  ;;  %3529 = vmatmul.mubr.bf16.gmra.mrb[172].mxu1 %v8145_v45 }
 0x4d6   : > { %v3263_v59 = vmul.f32 %v5650_v49, %v8084_v4  ;;  %v5656_v15 = vadd.f32 %v5655_v21, %v5563_v7  ;;  %v5316_v46 = vpop.f32.mrb[140].mxu1  ;;  %3538 = vmatprep.mubr.bf16.mxu1 %v6655_v9 }
 0x4d7   : > { %v3301_v16 = vadd.f32 %v8086_v39, %v3262_v8  ;;  %v5317_v62 = vpop.f32.mrb[141].mxu1  ;;  %v5566_v11 = vpop.f32.mrb[56].mxu0  ;;  %v3332_v63 = vmax.f32 %v3300_v1, 0.0 }
 0x4d8   : > { %v3302_v34 = vadd.f32 %v8086_v39, %v3263_v59  ;;  %v3264_v14 = vmul.f32 %v5656_v15, %v8084_v4  ;;  %v5318_v54 = vadd.f32 %v5317_v62, %v5316_v46  ;;  %v5319_v6 = vpop.f32.mrb[142].mxu1  ;;  %v3171_v55 = vpop.f32.mrb[57].mxu0 }
 0x4d9   : > { %v3333_v29 = vmax.f32 %v3301_v16, 0.0  ;;  %v5320_v45 = vpop.f32.mrb[143].mxu1  ;;  %v5567_v48 = vpop.f32.mrb[58].mxu0 }
 0x4da   : > { %v3303_v35 = vadd.f32 %v8086_v39, %v3264_v14  ;;  %v5664_v57 = vadd.f32 %v7989_v53, %v5318_v54  ;;  %v5321_v51 = vadd.f32 %v5320_v45, %v5319_v6  ;;  %v3174_v40 = vpop.f32.mrb[59].mxu0  ;;  %v3334_v25 = vmax.f32 %v3302_v34, 0.0 }
 0x4db   : > { %v8190_v0 = vpack.c.bf16 %v3333_v29, %v3332_v63 }
 0x4dc   : > { %v3335_v58 = vmax.f32 %v3303_v35, 0.0  ;;  %v5665_v61 = vadd.f32 %v5664_v57, %v3171_v55  ;;  %v5670_v30 = vadd.f32 %v7998_v22, %v5321_v51 }
 0x4dd   : > { %3539 = vmatmul.mubr.bf16.gmra.mrb[176].mxu1 %v8147_v12 }
 0x4de   : > { %v3265_v50 = vmul.f32 %v5665_v61, %v8084_v4  ;;  %v5671_v38 = vadd.f32 %v5670_v30, %v3174_v40  ;;  %v5322_v31 = vpop.f32.mrb[144].mxu1  ;;  %3548 = vmatprep.mubr.bf16.mxu1 %v6655_v9  ;;  %v8196_v32 = vpack.c.bf16 %v3335_v58, %v3334_v25 }
 0x4df   : > { %v5323_v53 = vpop.f32.mrb[145].mxu1  ;;  %v5570_v42 = vpop.f32.mrb[60].mxu0 }
 0x4e0   : > { %v3304_v2 = vadd.f32 %v8086_v39, %v3265_v50  ;;  %v3266_v41 = vmul.f32 %v5671_v38, %v8084_v4  ;;  %v5324_v23 = vadd.f32 %v5323_v53, %v5322_v31  ;;  %v5325_v37 = vpop.f32.mrb[146].mxu1  ;;  %v3187_v52 = vpop.f32.mrb[61].mxu0 }
 0x4e1   : > { %v5326_v22 = vpop.f32.mrb[147].mxu1  ;;  %v5571_v13 = vpop.f32.mrb[62].mxu0 }
 0x4e2   : > { %v3305_v12 = vadd.f32 %v8086_v39, %v3266_v41  ;;  %v5661_v19 = vadd.f32 %v8004_v3, %v5324_v23  ;;  %v5327_v60 = vadd.f32 %v5326_v22, %v5325_v37  ;;  %v3190_v56 = vpop.f32.mrb[63].mxu0  ;;  %v3336_v7 = vmax.f32 %v3304_v2, 0.0 }
 0x4e4   : > { %v3337_v27 = vmax.f32 %v3305_v12, 0.0  ;;  %v5662_v44 = vadd.f32 %v5661_v19, %v5566_v11  ;;  %v5667_v47 = vadd.f32 %v8013_v36, %v5327_v60 }
 0x4e5   : > { %3549 = vmatmul.mubr.bf16.gmra.mrb[180].mxu1 %v8160_v10 }
 0x4e6   : > { %v3267_v26 = vmul.f32 %v5662_v44, %v8084_v4  ;;  %v5668_v24 = vadd.f32 %v5667_v47, %v5567_v48  ;;  %v5328_v49 = vpop.f32.mrb[148].mxu1  ;;  %3558 = vmatprep.mubr.bf16.mxu1 %v6655_v9  ;;  %v3356_v21 = vpack.c.bf16 %v3337_v27, %v3336_v7 }
 0x4e7   : > { %v5329_v1 = vpop.f32.mrb[149].mxu1 }
 0x4e8   : > { %v3268_v8 = vmul.f32 %v5668_v24, %v8084_v4  ;;  %v5330_v3 = vadd.f32 %v5329_v1, %v5328_v49  ;;  %v5331_v59 = vpop.f32.mrb[150].mxu1  ;;  %v3306_v15 = vadd.f32 %v8086_v39, %v3267_v26 }
 0x4e9   : > { %v5332_v46 = vpop.f32.mrb[151].mxu1 }
 0x4ea   : > { %v5676_v16 = vadd.f32 %v8019_v33, %v5330_v3  ;;  %v5333_v36 = vadd.f32 %v5332_v46, %v5331_v59  ;;  %v3307_v10 = vadd.f32 %v8086_v39, %v3268_v8  ;;  %v3338_v34 = vmax.f32 %v3306_v15, 0.0 }
 0x4ec   : > { %v5677_v62 = vadd.f32 %v5676_v16, %v3187_v52  ;;  %v5682_v11 = vadd.f32 %v8025_v5, %v5333_v36  ;;  %v3339_v14 = vmax.f32 %v3307_v10, 0.0 }
 0x4ed   : > { %3559 = vmatmul.mubr.bf16.gmra.mrb[184].mxu1 %v8162_v18 }
 0x4ee   : > { %v3269_v54 = vmul.f32 %v5677_v62, %v8084_v4  ;;  %v5683_v6 = vadd.f32 %v5682_v11, %v3190_v56  ;;  %v5334_v55 = vpop.f32.mrb[152].mxu1  ;;  %3568 = vmatprep.mubr.bf16.mxu1 %v6655_v9  ;;  %v3357_v63 = vpack.c.bf16 %v3339_v14, %v3338_v34 }
 0x4ef   : > { %v5335_v29 = vpop.f32.mrb[153].mxu1 }
 0x4f0   : > { %v3270_v33 = vmul.f32 %v5683_v6, %v8084_v4  ;;  %v5336_v45 = vadd.f32 %v5335_v29, %v5334_v55  ;;  %v5337_v48 = vpop.f32.mrb[154].mxu1  ;;  %v3308_v35 = vadd.f32 %v8086_v39, %v3269_v54 }
 0x4f1   : > { %v5338_v57 = vpop.f32.mrb[155].mxu1 }
 0x4f2   : > { %v5673_v5 = vadd.f32 %v8028_v20, %v5336_v45  ;;  %v5339_v51 = vadd.f32 %v5338_v57, %v5337_v48  ;;  %v3309_v18 = vadd.f32 %v8086_v39, %v3270_v33  ;;  %v3340_v58 = vmax.f32 %v3308_v35, 0.0 }
 0x4f4   : > { %v5674_v40 = vadd.f32 %v5673_v5, %v5570_v42  ;;  %v5679_v25 = vadd.f32 %v8034_v43, %v5339_v51  ;;  %v3341_v61 = vmax.f32 %v3309_v18, 0.0 }
 0x4f5   : > { %3569 = vmatmul.mubr.bf16.gmra.mrb[188].mxu1 %v8177_v17 }
 0x4f6   : > { %v3271_v30 = vmul.f32 %v5674_v40, %v8084_v4  ;;  %v5680_v50 = vadd.f32 %v5679_v25, %v5571_v13  ;;  %3578 = vmatprep.mubr.bf16.mxu1 %v6655_v9  ;;  %v3358_v38 = vpack.c.bf16 %v3341_v61, %v3340_v58 }
 0x4f8   : > { %v3272_v31 = vmul.f32 %v5680_v50, %v8084_v4  ;;  %v3310_v20 = vadd.f32 %v8086_v39, %v3271_v30  ;;  %v3651_v30 = vlaneseq }
 0x4fa   : > { %v3311_v53 = vadd.f32 %v8086_v39, %v3272_v31  ;;  %v3342_v2 = vmax.f32 %v3310_v20, 0.0 }
 0x4fc   : > { %v3343_v42 = vmax.f32 %v3311_v53, 0.0 }
 0x4fd   : > { %3579 = vmatmul.mubr.bf16.gmra.mrb[192].mxu1 %v8174_v28 }
 0x4fe   : > { %3588 = vmatprep.mubr.bf16.mxu1 %v6655_v9  ;;  %v3359_v43 = vpack.c.bf16 %v3343_v42, %v3342_v2  ;;  %v4106_v2 = vld [vmem:[#allocation23] sm:$0x3] }
 0x505   : > { %3589 = vmatmul.mubr.bf16.gmra.mrb[196].mxu1 %v8190_v0 }
 0x506   : > { %3598 = vmatprep.mubr.bf16.mxu1 %v6655_v9 }
 0x509   : > { %v8230_v17 = vpop.f32.mrb[108].mxu0 }
 0x50a   : > { %v8233_v4 = vpop.f32.mrb[109].mxu0 }
 0x50b   : > { %v8235_v39 = vpop.f32.mrb[110].mxu0 }
 0x50c   : > { %v8237_v41 = vpop.f32.mrb[111].mxu0 }
 0x50d   : > { %3599 = vmatmul.mubr.bf16.gmra.mrb[200].mxu1 %v8196_v32 }
 0x50e   : > { %3608 = vmatprep.mubr.bf16.mxu1 %v6655_v9 }
 0x511   : > { %v8239_v28 = vpop.f32.mrb[112].mxu0 }
 0x512   : > { %v8242_v0 = vpop.f32.mrb[113].mxu0 }
 0x513   : > { %v8244_v23 = vpop.f32.mrb[114].mxu0 }
 0x514   : > { %v8246_v32 = vpop.f32.mrb[115].mxu0 }
 0x515   : > { %3609 = vmatmul.mubr.bf16.gmra.mrb[204].mxu1 %v3356_v21 }
 0x516   : > { %3618 = vmatprep.mubr.bf16.mxu1 %v6655_v9 }
 0x519   : > { %v8248_v37 = vpop.f32.mrb[116].mxu0 }
 0x51a   : > { %v8251_v52 = vpop.f32.mrb[117].mxu0 }
 0x51b   : > { %v8253_v22 = vpop.f32.mrb[118].mxu0 }
 0x51c   : > { %v8255_v13 = vpop.f32.mrb[119].mxu0 }
 0x51d   : > { %3619 = vmatmul.mubr.bf16.gmra.mrb[208].mxu1 %v3357_v63 }
 0x51e   : > { %3628 = vmatprep.mubr.bf16.mxu1 %v6655_v9 }
 0x521   : > { %v8257_v12 = vpop.f32.mrb[120].mxu0 }
 0x522   : > { %v8260_v19 = vpop.f32.mrb[121].mxu0 }
 0x523   : > { %v8262_v60 = vpop.f32.mrb[122].mxu0 }
 0x524   : > { %v8264_v56 = vpop.f32.mrb[123].mxu0 }
 0x525   : > { %3629 = vmatmul.mubr.bf16.gmra.mrb[212].mxu1 %v3358_v38  ;;  %v3652_v38 = vshrl.u32 %v3651_v30, 7 }
 0x526   : > { %3638 = vmatprep.mubr.bf16.mxu1 %v6655_v9 }
 0x527   : > { %v3657_v42 = vsub.s32 1, %v3652_v38 }
 0x529   : > { %v8266_v7 = vpop.f32.mrb[124].mxu0 }
 0x52a   : > { %v8268_v27 = vpop.f32.mrb[125].mxu0 }
 0x52b   : > { %v8270_v44 = vpop.f32.mrb[126].mxu0 }
 0x52c   : > { %v8272_v47 = vpop.f32.mrb[127].mxu0 }
 0x52d   : > { %3639 = vmatmul.mubr.bf16.gmra.mrb[216].mxu1 %v3359_v43 }
 0x531   : > { %v8274_v26 = vpop.f32.mrb[128].mxu0 }
 0x532   : > { %v8276_v24 = vpop.f32.mrb[129].mxu0 }
 0x533   : > { %v8278_v9 = vpop.f32.mrb[130].mxu0 }
 0x534   : > { %v8280_v49 = vpop.f32.mrb[131].mxu0 }
 0x539   : > { %v8282_v21 = vpop.f32.mrb[132].mxu0 }
 0x53a   : > { %v8284_v1 = vpop.f32.mrb[133].mxu0 }
 0x53b   : > { %v8286_v8 = vpop.f32.mrb[134].mxu0 }
 0x53c   : > { %v8288_v3 = vpop.f32.mrb[135].mxu0 }
 0x541   : > { %v8290_v59 = vpop.f32.mrb[136].mxu0 }
 0x542   : > { %v8292_v15 = vpop.f32.mrb[137].mxu0 }
 0x543   : > { %v8294_v46 = vpop.f32.mrb[138].mxu0 }
 0x544   : > { %v8296_v16 = vpop.f32.mrb[139].mxu0 }
 0x549   : > { %v8298_v36 = vpop.f32.mrb[140].mxu0 }
 0x54a   : > { %v8300_v10 = vpop.f32.mrb[141].mxu0 }
 0x54b   : > { %v8302_v62 = vpop.f32.mrb[142].mxu0 }
 0x54c   : > { %v8304_v11 = vpop.f32.mrb[143].mxu0 }
 0x551   : > { %v8306_v34 = vpop.f32.mrb[144].mxu0 }
 0x552   : > { %v8308_v14 = vpop.f32.mrb[145].mxu0 }
 0x553   : > { %v8310_v54 = vpop.f32.mrb[146].mxu0 }
 0x554   : > { %8967 = vst [vmem:[#allocation42_spill] sm:$0xff] %v8310_v54  ;;  %v8312_v6 = vpop.f32.mrb[147].mxu0 }
 0x555   : > { %8968 = vst [vmem:[#allocation43_spill] sm:$0xff] %v8312_v6 }
 0x559   : > { %v8314_v55 = vpop.f32.mrb[148].mxu0 }
 0x55a   : > { %8969 = vst [vmem:[#allocation44_spill] sm:$0xff] %v8314_v55  ;;  %v8316_v63 = vpop.f32.mrb[149].mxu0 }
 0x55b   : > { %8970 = vst [vmem:[#allocation45_spill] sm:$0xff] %v8316_v63  ;;  %v8318_v29 = vpop.f32.mrb[150].mxu0 }
 0x55c   : > { %8971 = vst [vmem:[#allocation46_spill] sm:$0xff] %v8318_v29  ;;  %v8320_v33 = vpop.f32.mrb[151].mxu0 }
 0x55d   : > { %8972 = vst [vmem:[#allocation47_spill] sm:$0xff] %v8320_v33 }
 0x561   : > { %v8322_v45 = vpop.f32.mrb[152].mxu0 }
 0x562   : > { %8973 = vst [vmem:[#allocation48_spill] sm:$0xff] %v8322_v45  ;;  %v8324_v48 = vpop.f32.mrb[153].mxu0 }
 0x563   : > { %8974 = vst [vmem:[#allocation49_spill] sm:$0xff] %v8324_v48  ;;  %v8326_v35 = vpop.f32.mrb[154].mxu0 }
 0x564   : > { %8975 = vst [vmem:[#allocation50_spill] sm:$0xff] %v8326_v35  ;;  %v8328_v57 = vpop.f32.mrb[155].mxu0 }
 0x565   : > { %8976 = vst [vmem:[#allocation51_spill] sm:$0xff] %v8328_v57 }
 0x569   : > { %v8330_v5 = vpop.f32.mrb[156].mxu0 }
 0x56a   : > { %8977 = vst [vmem:[#allocation52_spill] sm:$0xff] %v8330_v5  ;;  %v8332_v51 = vpop.f32.mrb[157].mxu0 }
 0x56b   : > { %8978 = vst [vmem:[#allocation53_spill] sm:$0xff] %v8332_v51  ;;  %v8334_v18 = vpop.f32.mrb[158].mxu0  ;;  %v8356_v51 = vrot.slane %v4106_v2, %v3657_v42 }
 0x56c   : > { %8979 = vst [vmem:[#allocation54_spill] sm:$0xff] %v8334_v18  ;;  %v8336_v40 = vpop.f32.mrb[159].mxu0 }
 0x56d   : > { %8980 = vst [vmem:[#allocation55_spill] sm:$0xff] %v8336_v40  ;;  %v3653_v40 = vsub.s32 0, %v3652_v38 }
 0x56f   : > { %v8354_v18 = vrot.slane %v4106_v2, %v3653_v40  ;;  %v4119_v2 = vmul.f32 %v8356_v51, %v8233_v4 }
 0x571   : > { %v8338_v25 = vpop.f32.mrb[160].mxu0  ;;  %v4120_v4 = vmul.f32 %v8354_v18, %v8235_v39 }
 0x572   : > { %8981 = vst [vmem:[#allocation56_spill] sm:$0xff] %v8338_v25  ;;  %v8340_v58 = vpop.f32.mrb[161].mxu0  ;;  %v3649_v25 = vld [vmem:[#allocation19] sm:$0x3] }
 0x573   : > { %8982 = vst [vmem:[#allocation57_spill] sm:$0xff] %v8340_v58  ;;  %v8342_v61 = vpop.f32.mrb[162].mxu0  ;;  %v4182_v58 = vld [vmem:[#allocation25] sm:$0x3] }
 0x574   : > { %8983 = vst [vmem:[#allocation58_spill] sm:$0xff] %v8342_v61  ;;  %v8344_v50 = vpop.f32.mrb[163].mxu0  ;;  %v3725_v61 = vld [vmem:[#allocation20] sm:$0x3]  ;;  %v8376_v35 = vrot.slane %v4182_v58, %v3657_v42 }
 0x575   : > { %8984 = vst [vmem:[#allocation59_spill] sm:$0xff] %v8344_v50  ;;  %v8358_v50 = vrot.slane %v3649_v25, %v3653_v40  ;;  %v8370_v38 = vrot.slane %v3725_v61, %v3653_v40 }
 0x579   : > { %v8346_v31 = vpop.f32.mrb[164].mxu0 }
 0x57a   : > { %8985 = vst [vmem:[#allocation60_spill] sm:$0xff] %v8346_v31  ;;  %v8348_v20 = vpop.f32.mrb[165].mxu0  ;;  %v8362_v31 = vrot.slane %v3649_v25, %v3657_v42  ;;  %v8378_v25 = vrot.slane %v3725_v61, %v3657_v42  ;;  %v4195_v61 = vadd.f32 %v8376_v35, %v4119_v2 }
 0x57b   : > { %8986 = vst [vmem:[#allocation61_spill] sm:$0xff] %v8348_v20  ;;  %v8350_v53 = vpop.f32.mrb[166].mxu0 }
 0x57c   : > { %8987 = vst [vmem:[#allocation62_spill] sm:$0xff] %v8350_v53  ;;  %v8352_v43 = vpop.f32.mrb[167].mxu0  ;;  %v4118_v53 = vmul.f32 %v8354_v18, %v8230_v17 }
 0x57d   : > { %8988 = vst [vmem:[#allocation63_spill] sm:$0xff] %v8352_v43  ;;  %v8368_v43 = vrot.slane %v4182_v58, %v3653_v40 }
 0x57f   : > { %v4194_v45 = vadd.f32 %v8368_v43, %v4118_v53  ;;  %v4196_v2 = vadd.f32 %v8368_v43, %v4120_v4  ;;  %v4124_v4 = vmul.f32 %v8354_v18, %v8244_v23 }
 0x581   : > { %v8360_v30 = vpop.f32.mrb[168].mxu0 }
 0x582   : > { %8989 = vst [vmem:[#allocation64_spill] sm:$0xff] %v8360_v30  ;;  %v8364_v20 = vpop.f32.mrb[169].mxu0 }
 0x583   : > { %8990 = vst [vmem:[#allocation65_spill] sm:$0xff] %v8364_v20  ;;  %v8372_v5 = vpop.f32.mrb[170].mxu0 }
 0x584   : > { %8991 = vst [vmem:[#allocation66_spill] sm:$0xff] %v8372_v5  ;;  %v8380_v30 = vpop.f32.mrb[171].mxu0 }
 0x585   : > { %8992 = vst [vmem:[#allocation67_spill] sm:$0xff] %v8380_v30 }
 0x588   : > { %v3490_v57 = vpop.f32.mrb[156].mxu1 }
 0x589   : > { %v3661_v20 = vmul.f32 %v8358_v50, %v3490_v57  ;;  %v3492_v17 = vpop.f32.mrb[157].mxu1  ;;  %v4121_v57 = vmul.f32 %v8356_v51, %v8237_v41 }
 0x58a   : > { %v3662_v48 = vmul.f32 %v8362_v31, %v3492_v17  ;;  %v3494_v40 = vpop.f32.mrb[158].mxu1 }
 0x58b   : > { %v3737_v5 = vadd.f32 %v8370_v38, %v3661_v20  ;;  %v3663_v58 = vmul.f32 %v8358_v50, %v3494_v40  ;;  %v3496_v33 = vpop.f32.mrb[159].mxu1  ;;  %v4122_v20 = vmul.f32 %v8354_v18, %v8239_v28  ;;  %v4197_v55 = vadd.f32 %v8376_v35, %v4121_v57 }
 0x58c   : > { %v3738_v42 = vadd.f32 %v8378_v25, %v3662_v48  ;;  %v3664_v17 = vmul.f32 %v8362_v31, %v3496_v33  ;;  %v4123_v33 = vmul.f32 %v8356_v51, %v8242_v0 }
 0x58d   : > { %v3801_v30 = vmax.f32 %v3737_v5, 0.0  ;;  %v3739_v53 = vadd.f32 %v8370_v38, %v3663_v58  ;;  %v4198_v54 = vadd.f32 %v8368_v43, %v4122_v20 }
 0x58e   : > { %v3802_v39 = vmax.f32 %v3738_v42, 0.0  ;;  %v3740_v40 = vadd.f32 %v8378_v25, %v3664_v17  ;;  %v4199_v23 = vadd.f32 %v8376_v35, %v4123_v33 }
 0x58f   : > { %v4258_v29 = vadd.f32 %v4194_v45, %v3801_v30  ;;  %v3803_v63 = vmax.f32 %v3739_v53, 0.0 }
 0x590   : > { %v4259_v48 = vadd.f32 %v4195_v61, %v3802_v39  ;;  %v3804_v41 = vmax.f32 %v3740_v40, 0.0  ;;  %v3500_v6 = vpop.f32.mrb[160].mxu1 }
 0x591   : > { %v4322_v5 = vmax.f32 %v4258_v29, 0.0  ;;  %v4260_v58 = vadd.f32 %v4196_v2, %v3803_v63  ;;  %v3665_v28 = vmul.f32 %v8358_v50, %v3500_v6  ;;  %v3502_v42 = vpop.f32.mrb[161].mxu1  ;;  %v4126_v2 = vmul.f32 %v8354_v18, %v8248_v37 }
 0x592   : > { %v4323_v17 = vmax.f32 %v4259_v48, 0.0  ;;  %v4261_v45 = vadd.f32 %v4197_v55, %v3804_v41  ;;  %v3666_v30 = vmul.f32 %v8362_v31, %v3502_v42  ;;  %v3504_v61 = vpop.f32.mrb[162].mxu1  ;;  %v4125_v55 = vmul.f32 %v8356_v51, %v8246_v32 }
 0x593   : > { %4386 = vst [vmem:[%s8408_s30] sm:$0xff] %v4322_v5  ;;  %v4324_v0 = vmax.f32 %v4260_v58, 0.0  ;;  %v3741_v63 = vadd.f32 %v8370_v38, %v3665_v28  ;;  %v3667_v6 = vmul.f32 %v8358_v50, %v3504_v61  ;;  %v3506_v29 = vpop.f32.mrb[163].mxu1  ;;  %v4200_v5 = vadd.f32 %v8368_v43, %v4124_v4 }
 0x594   : > { %4387 = vst [vmem:[%s8408_s30 + $0x8] sm:$0xff] %v4323_v17  ;;  %v4325_v57 = vmax.f32 %v4261_v45, 0.0  ;;  %v3742_v53 = vadd.f32 %v8378_v25, %v3666_v30  ;;  %v3668_v20 = vmul.f32 %v8362_v31, %v3506_v29  ;;  %v4201_v28 = vadd.f32 %v8376_v35, %v4125_v55 }
 0x595   : > { %4388 = vst [vmem:[%s8408_s30 + $0x10] sm:$0xff] %v4324_v0  ;;  %v3805_v39 = vmax.f32 %v3741_v63, 0.0  ;;  %v3743_v40 = vadd.f32 %v8370_v38, %v3667_v6  ;;  %v4127_v45 = vmul.f32 %v8356_v51, %v8251_v52  ;;  %v4202_v61 = vadd.f32 %v8368_v43, %v4126_v2 }
 0x596   : > { %4389 = vst [vmem:[%s8408_s30 + $0x18] sm:$0xff] %v4325_v57  ;;  %v3806_v48 = vmax.f32 %v3742_v53, 0.0  ;;  %v3744_v32 = vadd.f32 %v8378_v25, %v3668_v20  ;;  %v4128_v55 = vmul.f32 %v8354_v18, %v8253_v22  ;;  %v4129_v53 = vmul.f32 %v8356_v51, %v8255_v13 }
 0x597   : > { %v4262_v41 = vadd.f32 %v4198_v54, %v3805_v39  ;;  %v3807_v58 = vmax.f32 %v3743_v40, 0.0  ;;  %v4203_v40 = vadd.f32 %v8376_v35, %v4127_v45 }
 0x598   : > { %v4263_v33 = vadd.f32 %v4199_v23, %v3806_v48  ;;  %v3808_v42 = vmax.f32 %v3744_v32, 0.0  ;;  %v3510_v17 = vpop.f32.mrb[164].mxu1 }
 0x599   : > { %v4326_v30 = vmax.f32 %v4262_v41, 0.0  ;;  %v4264_v37 = vadd.f32 %v4200_v5, %v3807_v58  ;;  %v3669_v0 = vmul.f32 %v8358_v50, %v3510_v17  ;;  %v3512_v54 = vpop.f32.mrb[165].mxu1  ;;  %v4130_v41 = vmul.f32 %v8354_v18, %v8257_v12 }
 0x59a   : > { %v4327_v63 = vmax.f32 %v4263_v33, 0.0  ;;  %v4265_v4 = vadd.f32 %v4201_v28, %v3808_v42  ;;  %v3670_v6 = vmul.f32 %v8362_v31, %v3512_v54  ;;  %v3514_v29 = vpop.f32.mrb[166].mxu1  ;;  %v4204_v33 = vadd.f32 %v8368_v43, %v4128_v55 }
 0x59b   : > { %4390 = vst [vmem:[%s8408_s30 + $0x20] sm:$0xff] %v4326_v30  ;;  %v4328_v52 = vmax.f32 %v4264_v37, 0.0  ;;  %v3745_v57 = vadd.f32 %v8370_v38, %v3669_v0  ;;  %v3671_v23 = vmul.f32 %v8358_v50, %v3514_v29  ;;  %v3516_v20 = vpop.f32.mrb[167].mxu1  ;;  %v4205_v17 = vadd.f32 %v8376_v35, %v4129_v53 }
 0x59c   : > { %4391 = vst [vmem:[%s8408_s30 + $0x28] sm:$0xff] %v4327_v63  ;;  %v4329_v39 = vmax.f32 %v4265_v4, 0.0  ;;  %v3746_v2 = vadd.f32 %v8378_v25, %v3670_v6  ;;  %v3672_v22 = vmul.f32 %v8362_v31, %v3516_v20  ;;  %v4131_v37 = vmul.f32 %v8356_v51, %v8260_v19 }
 0x59d   : > { %4392 = vst [vmem:[%s8408_s30 + $0x30] sm:$0xff] %v4328_v52  ;;  %v3809_v48 = vmax.f32 %v3745_v57, 0.0  ;;  %v3747_v32 = vadd.f32 %v8370_v38, %v3671_v23  ;;  %v4206_v54 = vadd.f32 %v8368_v43, %v4130_v41  ;;  %v4132_v29 = vmul.f32 %v8354_v18, %v8262_v60 }
 0x59e   : > { %4393 = vst [vmem:[%s8408_s30 + $0x38] sm:$0xff] %v4329_v39  ;;  %v3810_v5 = vmax.f32 %v3746_v2, 0.0  ;;  %v3748_v13 = vadd.f32 %v8378_v25, %v3672_v22  ;;  %v4133_v53 = vmul.f32 %v8356_v51, %v8264_v56 }
 0x59f   : > { %v4266_v58 = vadd.f32 %v4202_v61, %v3809_v48  ;;  %v3811_v28 = vmax.f32 %v3747_v32, 0.0  ;;  %v4134_v32 = vmul.f32 %v8354_v18, %v8266_v7 }
 0x5a0   : > { %v4267_v42 = vadd.f32 %v4203_v40, %v3810_v5  ;;  %v3812_v45 = vmax.f32 %v3748_v13, 0.0  ;;  %v3520_v30 = vpop.f32.mrb[168].mxu1  ;;  %v4207_v40 = vadd.f32 %v8376_v35, %v4131_v37  ;;  %v4208_v13 = vadd.f32 %v8368_v43, %v4132_v29 }
 0x5a1   : > { %v4330_v0 = vmax.f32 %v4266_v58, 0.0  ;;  %v4268_v12 = vadd.f32 %v4204_v33, %v3811_v28  ;;  %v3673_v63 = vmul.f32 %v8358_v50, %v3520_v30  ;;  %v3522_v61 = vpop.f32.mrb[169].mxu1  ;;  %v4209_v28 = vadd.f32 %v8376_v35, %v4133_v53 }
 0x5a2   : > { %v4331_v4 = vmax.f32 %v4267_v42, 0.0  ;;  %v4269_v6 = vadd.f32 %v4205_v17, %v3812_v45  ;;  %v3674_v55 = vmul.f32 %v8362_v31, %v3522_v61  ;;  %v3524_v52 = vpop.f32.mrb[170].mxu1  ;;  %v4135_v45 = vmul.f32 %v8356_v51, %v8268_v27 }
 0x5a3   : > { %4394 = vst [vmem:[%s8408_s30 + $0x40] sm:$0xff] %v4330_v0  ;;  %v4332_v19 = vmax.f32 %v4268_v12, 0.0  ;;  %v3749_v57 = vadd.f32 %v8370_v38, %v3673_v63  ;;  %v3675_v23 = vmul.f32 %v8358_v50, %v3524_v52  ;;  %v3526_v20 = vpop.f32.mrb[171].mxu1  ;;  %v4210_v37 = vadd.f32 %v8368_v43, %v4134_v32 }
 0x5a4   : > { %4395 = vst [vmem:[%s8408_s30 + $0x48] sm:$0xff] %v4331_v4  ;;  %v4333_v39 = vmax.f32 %v4269_v6, 0.0  ;;  %v3750_v2 = vadd.f32 %v8378_v25, %v3674_v55  ;;  %v3676_v60 = vmul.f32 %v8362_v31, %v3526_v20  ;;  %v4136_v4 = vmul.f32 %v8354_v18, %v8270_v44 }
 0x5a5   : > { %4396 = vst [vmem:[%s8408_s30 + $0x50] sm:$0xff] %v4332_v19  ;;  %v3813_v22 = vmax.f32 %v3749_v57, 0.0  ;;  %v3751_v48 = vadd.f32 %v8370_v38, %v3675_v23  ;;  %v4137_v52 = vmul.f32 %v8356_v51, %v8272_v47  ;;  %v4211_v23 = vadd.f32 %v8376_v35, %v4135_v45 }
 0x5a6   : > { %4397 = vst [vmem:[%s8408_s30 + $0x58] sm:$0xff] %v4333_v39  ;;  %v3814_v41 = vmax.f32 %v3750_v2, 0.0  ;;  %v3752_v56 = vadd.f32 %v8378_v25, %v3676_v60 }
 0x5a7   : > { %v4270_v5 = vadd.f32 %v4206_v54, %v3813_v22  ;;  %v3815_v58 = vmax.f32 %v3751_v48, 0.0  ;;  %v4212_v22 = vadd.f32 %v8368_v43, %v4136_v4 }
 0x5a8   : > { %v4271_v33 = vadd.f32 %v4207_v40, %v3814_v41  ;;  %v3816_v42 = vmax.f32 %v3752_v56, 0.0  ;;  %v3530_v17 = vpop.f32.mrb[172].mxu1  ;;  %v4138_v40 = vmul.f32 %v8354_v18, %v8274_v26  ;;  %v4213_v41 = vadd.f32 %v8376_v35, %v4137_v52 }
 0x5a9   : > { %v4334_v30 = vmax.f32 %v4270_v5, 0.0  ;;  %v4272_v7 = vadd.f32 %v4208_v13, %v3815_v58  ;;  %v3677_v0 = vmul.f32 %v8358_v50, %v3530_v17  ;;  %v3532_v12 = vpop.f32.mrb[173].mxu1  ;;  %v4139_v13 = vmul.f32 %v8356_v51, %v8276_v24 }
 0x5aa   : > { %v4335_v54 = vmax.f32 %v4271_v33, 0.0  ;;  %v4273_v63 = vadd.f32 %v4209_v28, %v3816_v42  ;;  %v3678_v61 = vmul.f32 %v8362_v31, %v3532_v12  ;;  %v3534_v6 = vpop.f32.mrb[174].mxu1  ;;  %v4214_v33 = vadd.f32 %v8368_v43, %v4138_v40 }
 0x5ab   : > { %4398 = vst [vmem:[%s8408_s30 + $0x60] sm:$0xff] %v4334_v30  ;;  %v4336_v27 = vmax.f32 %v4272_v7, 0.0  ;;  %v3753_v55 = vadd.f32 %v8370_v38, %v3677_v0  ;;  %v3679_v29 = vmul.f32 %v8358_v50, %v3534_v6  ;;  %v3536_v19 = vpop.f32.mrb[175].mxu1  ;;  %v4140_v7 = vmul.f32 %v8354_v18, %v8278_v9 }
 0x5ac   : > { %4399 = vst [vmem:[%s8408_s30 + $0x68] sm:$0xff] %v4335_v54  ;;  %v4337_v57 = vmax.f32 %v4273_v63, 0.0  ;;  %v3754_v53 = vadd.f32 %v8378_v25, %v3678_v61  ;;  %v3680_v44 = vmul.f32 %v8362_v31, %v3536_v19  ;;  %v4141_v54 = vmul.f32 %v8356_v51, %v8280_v49 }
 0x5ad   : > { %4400 = vst [vmem:[%s8408_s30 + $0x70] sm:$0xff] %v4336_v27  ;;  %v3817_v20 = vmax.f32 %v3753_v55, 0.0  ;;  %v3755_v39 = vadd.f32 %v8370_v38, %v3679_v29  ;;  %v4215_v4 = vadd.f32 %v8376_v35, %v4139_v13  ;;  %v4142_v29 = vmul.f32 %v8354_v18, %v8282_v21 }
 0x5ae   : > { %4401 = vst [vmem:[%s8408_s30 + $0x78] sm:$0xff] %v4337_v57  ;;  %v3818_v2 = vmax.f32 %v3754_v53, 0.0  ;;  %v3756_v47 = vadd.f32 %v8378_v25, %v3680_v44  ;;  %v4216_v57 = vadd.f32 %v8368_v43, %v4140_v7  ;;  %v4217_v44 = vadd.f32 %v8376_v35, %v4141_v54 }
 0x5af   : > { %v4274_v60 = vadd.f32 %v4210_v37, %v3817_v20  ;;  %v3819_v48 = vmax.f32 %v3755_v39, 0.0  ;;  %v4143_v40 = vmul.f32 %v8356_v51, %v8284_v1  ;;  %v4146_v7 = vmul.f32 %v8354_v18, %v8290_v59 }
 0x5b0   : > { %v4275_v32 = vadd.f32 %v4211_v23, %v3818_v2  ;;  %v3820_v56 = vmax.f32 %v3756_v47, 0.0  ;;  %v3540_v5 = vpop.f32.mrb[176].mxu1  ;;  %v4218_v47 = vadd.f32 %v8368_v43, %v4142_v29 }
 0x5b1   : > { %v4338_v58 = vmax.f32 %v4274_v60, 0.0  ;;  %v4276_v26 = vadd.f32 %v4212_v22, %v3819_v48  ;;  %v3681_v28 = vmul.f32 %v8358_v50, %v3540_v5  ;;  %v3542_v42 = vpop.f32.mrb[177].mxu1 }
 0x5b2   : > { %v4339_v17 = vmax.f32 %v4275_v32, 0.0  ;;  %v4277_v45 = vadd.f32 %v4213_v41, %v3820_v56  ;;  %v3682_v30 = vmul.f32 %v8362_v31, %v3542_v42  ;;  %v3544_v37 = vpop.f32.mrb[178].mxu1  ;;  %v4144_v56 = vmul.f32 %v8354_v18, %v8286_v8 }
 0x5b3   : > { %4402 = vst [vmem:[%s8408_s30 + $0x80] sm:$0xff] %v4338_v58  ;;  %v4340_v24 = vmax.f32 %v4276_v26, 0.0  ;;  %v3757_v0 = vadd.f32 %v8370_v38, %v3681_v28  ;;  %v3683_v12 = vmul.f32 %v8358_v50, %v3544_v37  ;;  %v3546_v63 = vpop.f32.mrb[179].mxu1  ;;  %v4145_v26 = vmul.f32 %v8356_v51, %v8288_v3 }
 0x5b4   : > { %4403 = vst [vmem:[%s8408_s30 + $0x88] sm:$0xff] %v4339_v17  ;;  %v4341_v61 = vmax.f32 %v4277_v45, 0.0  ;;  %v3758_v6 = vadd.f32 %v8378_v25, %v3682_v30  ;;  %v3684_v9 = vmul.f32 %v8362_v31, %v3546_v63  ;;  %v4219_v42 = vadd.f32 %v8376_v35, %v4143_v40 }
 0x5b5   : > { %4404 = vst [vmem:[%s8408_s30 + $0x90] sm:$0xff] %v4340_v24  ;;  %v3821_v27 = vmax.f32 %v3757_v0, 0.0  ;;  %v3759_v55 = vadd.f32 %v8370_v38, %v3683_v12  ;;  %v4220_v0 = vadd.f32 %v8368_v43, %v4144_v56  ;;  %v4221_v63 = vadd.f32 %v8376_v35, %v4145_v26 }
 0x5b6   : > { %4405 = vst [vmem:[%s8408_s30 + $0x98] sm:$0xff] %v4341_v61  ;;  %v3822_v52 = vmax.f32 %v3758_v6, 0.0  ;;  %v3760_v49 = vadd.f32 %v8378_v25, %v3684_v9  ;;  %v4147_v6 = vmul.f32 %v8356_v51, %v8292_v15  ;;  %v4151_v26 = vmul.f32 %v8356_v51, %v8300_v10 }
 0x5b7   : > { %v4278_v19 = vadd.f32 %v4214_v33, %v3821_v27  ;;  %v3823_v23 = vmax.f32 %v3759_v55, 0.0  ;;  %v4222_v27 = vadd.f32 %v8368_v43, %v4146_v7  ;;  %v4152_v7 = vmul.f32 %v8354_v18, %v8302_v62 }
 0x5b8   : > { %v4279_v53 = vadd.f32 %v4215_v4, %v3822_v52  ;;  %v3824_v20 = vmax.f32 %v3760_v49, 0.0  ;;  %v3550_v39 = vpop.f32.mrb[180].mxu1 }
 0x5b9   : > { %v4342_v2 = vmax.f32 %v4278_v19, 0.0  ;;  %v4280_v21 = vadd.f32 %v4216_v57, %v3823_v23  ;;  %v3685_v60 = vmul.f32 %v8358_v50, %v3550_v39  ;;  %v3552_v22 = vpop.f32.mrb[181].mxu1  ;;  %v4148_v57 = vmul.f32 %v8354_v18, %v8294_v46 }
 0x5ba   : > { %v4343_v48 = vmax.f32 %v4279_v53, 0.0  ;;  %v4281_v32 = vadd.f32 %v4217_v44, %v3824_v20  ;;  %v3686_v41 = vmul.f32 %v8362_v31, %v3552_v22  ;;  %v3554_v5 = vpop.f32.mrb[182].mxu1  ;;  %v4149_v20 = vmul.f32 %v8356_v51, %v8296_v16 }
 0x5bb   : > { %4406 = vst [vmem:[%s8408_s30 + $0xa0] sm:$0xff] %v4342_v2  ;;  %v4344_v1 = vmax.f32 %v4280_v21, 0.0  ;;  %v3761_v13 = vadd.f32 %v8370_v38, %v3685_v60  ;;  %v3687_v58 = vmul.f32 %v8358_v50, %v3554_v5  ;;  %v3556_v33 = vpop.f32.mrb[183].mxu1  ;;  %v4223_v2 = vadd.f32 %v8376_v35, %v4147_v6 }
 0x5bc   : > { %4407 = vst [vmem:[%s8408_s30 + $0xa8] sm:$0xff] %v4343_v48  ;;  %v4345_v28 = vmax.f32 %v4281_v32, 0.0  ;;  %v3762_v17 = vadd.f32 %v8378_v25, %v3686_v41  ;;  %v3688_v8 = vmul.f32 %v8362_v31, %v3556_v33  ;;  %v4150_v22 = vmul.f32 %v8354_v18, %v8298_v36 }
 0x5bd   : > { %4408 = vst [vmem:[%s8408_s30 + $0xb0] sm:$0xff] %v4344_v1  ;;  %v3825_v45 = vmax.f32 %v3761_v13, 0.0  ;;  %v3763_v30 = vadd.f32 %v8370_v38, %v3687_v58  ;;  %v4224_v41 = vadd.f32 %v8368_v43, %v4148_v57  ;;  %v4225_v1 = vadd.f32 %v8376_v35, %v4149_v20 }
 0x5be   : > { %4409 = vst [vmem:[%s8408_s30 + $0xb8] sm:$0xff] %v4345_v28  ;;  %v3826_v37 = vmax.f32 %v3762_v17, 0.0  ;;  %v3764_v3 = vadd.f32 %v8378_v25, %v3688_v8  ;;  %v4226_v28 = vadd.f32 %v8368_v43, %v4150_v22 }
 0x5bf   : > { %v4282_v24 = vadd.f32 %v4218_v47, %v3825_v45  ;;  %v3827_v12 = vmax.f32 %v3763_v30, 0.0 }
 0x5c0   : > { %v4283_v54 = vadd.f32 %v4219_v42, %v3826_v37  ;;  %v3828_v61 = vmax.f32 %v3764_v3, 0.0  ;;  %v3560_v4 = vpop.f32.mrb[184].mxu1 }
 0x5c1   : > { %v4346_v9 = vmax.f32 %v4282_v24, 0.0  ;;  %v4284_v59 = vadd.f32 %v4220_v0, %v3827_v12  ;;  %v3689_v55 = vmul.f32 %v8358_v50, %v3560_v4  ;;  %v3562_v29 = vpop.f32.mrb[185].mxu1  ;;  %v4153_v0 = vmul.f32 %v8356_v51, %v8304_v11 }
 0x5c2   : > { %v4347_v52 = vmax.f32 %v4283_v54, 0.0  ;;  %v4285_v49 = vadd.f32 %v4221_v63, %v3828_v61  ;;  %v3690_v19 = vmul.f32 %v8362_v31, %v3562_v29  ;;  %v3564_v23 = vpop.f32.mrb[186].mxu1  ;;  %v4227_v63 = vadd.f32 %v8376_v35, %v4151_v26  ;;  %v8995_v26 = vld [vmem:[#allocation44_spill] sm:$0xff] }
 0x5c3   : > { %4410 = vst [vmem:[%s8408_s30 + $0xc0] sm:$0xff] %v4346_v9  ;;  %v4348_v15 = vmax.f32 %v4284_v59, 0.0  ;;  %v3765_v53 = vadd.f32 %v8370_v38, %v3689_v55  ;;  %v3691_v44 = vmul.f32 %v8358_v50, %v3564_v23  ;;  %v3566_v39 = vpop.f32.mrb[187].mxu1  ;;  %v4154_v9 = vmul.f32 %v8354_v18, %v8306_v34 }
 0x5c4   : > { %4411 = vst [vmem:[%s8408_s30 + $0xc8] sm:$0xff] %v4347_v52  ;;  %v4349_v40 = vmax.f32 %v4285_v49, 0.0  ;;  %v3766_v21 = vadd.f32 %v8378_v25, %v3690_v19  ;;  %v3692_v46 = vmul.f32 %v8362_v31, %v3566_v39  ;;  %v4228_v55 = vadd.f32 %v8368_v43, %v4152_v7 }
 0x5c5   : > { %4412 = vst [vmem:[%s8408_s30 + $0xd0] sm:$0xff] %v4348_v15  ;;  %v3829_v47 = vmax.f32 %v3765_v53, 0.0  ;;  %v3767_v60 = vadd.f32 %v8370_v38, %v3691_v44  ;;  %v4229_v49 = vadd.f32 %v8376_v35, %v4153_v0  ;;  %v4155_v23 = vmul.f32 %v8356_v51, %v8308_v14 }
 0x5c6   : > { %4413 = vst [vmem:[%s8408_s30 + $0xd8] sm:$0xff] %v4349_v40  ;;  %v3830_v48 = vmax.f32 %v3766_v21, 0.0  ;;  %v3768_v16 = vadd.f32 %v8378_v25, %v3692_v46  ;;  %v4230_v53 = vadd.f32 %v8368_v43, %v4154_v9  ;;  %v8993_v21 = vld [vmem:[#allocation42_spill] sm:$0xff] }
 0x5c7   : > { %v4286_v32 = vadd.f32 %v4222_v27, %v3829_v47  ;;  %v3831_v56 = vmax.f32 %v3767_v60, 0.0  ;;  %v4156_v46 = vmul.f32 %v8354_v18, %v8993_v21 }
 0x5c8   : > { %v4287_v5 = vadd.f32 %v4223_v2, %v3830_v48  ;;  %v3832_v13 = vmax.f32 %v3768_v16, 0.0  ;;  %v3570_v58 = vpop.f32.mrb[188].mxu1  ;;  %v8994_v48 = vld [vmem:[#allocation43_spill] sm:$0xff] }
 0x5c9   : > { %v4350_v33 = vmax.f32 %v4286_v32, 0.0  ;;  %v4288_v36 = vadd.f32 %v4224_v41, %v3831_v56  ;;  %v3693_v42 = vmul.f32 %v8358_v50, %v3570_v58  ;;  %v3572_v17 = vpop.f32.mrb[189].mxu1  ;;  %v4157_v16 = vmul.f32 %v8356_v51, %v8994_v48  ;;  %v9000_v48 = vld [vmem:[#allocation49_spill] sm:$0xff] }
 0x5ca   : > { %v4351_v8 = vmax.f32 %v4287_v5, 0.0  ;;  %v4289_v45 = vadd.f32 %v4225_v1, %v3832_v13  ;;  %v3694_v30 = vmul.f32 %v8362_v31, %v3572_v17  ;;  %v3574_v37 = vpop.f32.mrb[190].mxu1  ;;  %v4231_v56 = vadd.f32 %v8376_v35, %v4155_v23 }
 0x5cb   : > { %4414 = vst [vmem:[%s8408_s30 + $0xe0] sm:$0xff] %v4350_v33  ;;  %v4352_v10 = vmax.f32 %v4288_v36, 0.0  ;;  %v3769_v3 = vadd.f32 %v8370_v38, %v3693_v42  ;;  %v3695_v24 = vmul.f32 %v8358_v50, %v3574_v37  ;;  %v3576_v12 = vpop.f32.mrb[191].mxu1  ;;  %v4158_v33 = vmul.f32 %v8354_v18, %v8995_v26 }
 0x5cc   : > { %4415 = vst [vmem:[%s8408_s30 + $0xe8] sm:$0xff] %v4351_v8  ;;  %v4353_v54 = vmax.f32 %v4289_v45, 0.0  ;;  %v3770_v61 = vadd.f32 %v8378_v25, %v3694_v30  ;;  %v3696_v62 = vmul.f32 %v8362_v31, %v3576_v12  ;;  %v4232_v17 = vadd.f32 %v8368_v43, %v4156_v46 }
 0x5cd   : > { %4416 = vst [vmem:[%s8408_s30 + $0xf0] sm:$0xff] %v4352_v10  ;;  %v3833_v4 = vmax.f32 %v3769_v3, 0.0  ;;  %v3771_v6 = vadd.f32 %v8370_v38, %v3695_v24  ;;  %v4233_v30 = vadd.f32 %v8376_v35, %v4157_v16  ;;  %v8996_v10 = vld [vmem:[#allocation45_spill] sm:$0xff]  ;;  %v4234_v12 = vadd.f32 %v8368_v43, %v4158_v33  ;;  %v9001_v33 = vld [vmem:[#allocation50_spill] sm:$0xff] }
 0x5ce   : > { %4417 = vst [vmem:[%s8408_s30 + $0xf8] sm:$0xff] %v4353_v54  ;;  %v3834_v59 = vmax.f32 %v3770_v61, 0.0  ;;  %v3772_v11 = vadd.f32 %v8378_v25, %v3696_v62  ;;  %v4159_v3 = vmul.f32 %v8356_v51, %v8996_v10  ;;  %v4163_v16 = vmul.f32 %v8356_v51, %v9000_v48 }
 0x5cf   : > { %v4290_v27 = vadd.f32 %v4226_v28, %v3833_v4  ;;  %v3835_v29 = vmax.f32 %v3771_v6, 0.0  ;;  %v8997_v6 = vld [vmem:[#allocation46_spill] sm:$0xff] }
 0x5d0   : > { %v4291_v52 = vadd.f32 %v4227_v63, %v3834_v59  ;;  %v3836_v19 = vmax.f32 %v3772_v11, 0.0  ;;  %v3580_v57 = vpop.f32.mrb[192].mxu1  ;;  %v4160_v9 = vmul.f32 %v8354_v18, %v8997_v6  ;;  %v4239_v10 = vadd.f32 %v8376_v35, %v4163_v16 }
 0x5d1   : > { %v4354_v15 = vmax.f32 %v4290_v27, 0.0  ;;  %v4292_v34 = vadd.f32 %v4228_v55, %v3835_v29  ;;  %v3697_v44 = vmul.f32 %v8358_v50, %v3580_v57  ;;  %v3582_v20 = vpop.f32.mrb[193].mxu1  ;;  %v8998_v29 = vld [vmem:[#allocation47_spill] sm:$0xff]  ;;  %v4235_v57 = vadd.f32 %v8376_v35, %v4159_v3 }
 0x5d2   : > { %v4355_v39 = vmax.f32 %v4291_v52, 0.0  ;;  %v4293_v40 = vadd.f32 %v4229_v49, %v3836_v19  ;;  %v3698_v2 = vmul.f32 %v8362_v31, %v3582_v20  ;;  %v3584_v47 = vpop.f32.mrb[194].mxu1  ;;  %v4161_v52 = vmul.f32 %v8356_v51, %v8998_v29  ;;  %v9004_v29 = vld [vmem:[#allocation53_spill] sm:$0xff] }
 0x5d3   : > { %4418 = vst [vmem:[%s8408_s30 + $0x100] sm:$0xff] %v4354_v15  ;;  %v4356_v14 = vmax.f32 %v4292_v34, 0.0  ;;  %v3773_v60 = vadd.f32 %v8370_v38, %v3697_v44  ;;  %v3699_v22 = vmul.f32 %v8358_v50, %v3584_v47  ;;  %v3586_v32 = vpop.f32.mrb[195].mxu1  ;;  %v8999_v44 = vld [vmem:[#allocation48_spill] sm:$0xff]  ;;  %v4236_v21 = vadd.f32 %v8368_v43, %v4160_v9 }
 0x5d4   : > { %4419 = vst [vmem:[%s8408_s30 + $0x108] sm:$0xff] %v4355_v39  ;;  %v4357_v41 = vmax.f32 %v4293_v40, 0.0  ;;  %v3774_v5 = vadd.f32 %v8378_v25, %v3698_v2  ;;  %v3700_v1 = vmul.f32 %v8362_v31, %v3586_v32  ;;  %v4162_v20 = vmul.f32 %v8354_v18, %v8999_v44 }
 0x5d5   : > { %4420 = vst [vmem:[%s8408_s30 + $0x110] sm:$0xff] %v4356_v14  ;;  %v3837_v13 = vmax.f32 %v3773_v60, 0.0  ;;  %v3775_v58 = vadd.f32 %v8370_v38, %v3699_v22  ;;  %v4237_v14 = vadd.f32 %v8376_v35, %v4161_v52  ;;  %v4167_v52 = vmul.f32 %v8356_v51, %v9004_v29 }
 0x5d6   : > { %4421 = vst [vmem:[%s8408_s30 + $0x118] sm:$0xff] %v4357_v41  ;;  %v3838_v36 = vmax.f32 %v3774_v5, 0.0  ;;  %v3776_v28 = vadd.f32 %v8378_v25, %v3700_v1 }
 0x5d7   : > { %v4294_v42 = vadd.f32 %v4230_v53, %v3837_v13  ;;  %v3839_v8 = vmax.f32 %v3775_v58, 0.0  ;;  %v4243_v48 = vadd.f32 %v8376_v35, %v4167_v52 }
 0x5d8   : > { %v4295_v45 = vadd.f32 %v4231_v56, %v3838_v36  ;;  %v3840_v7 = vmax.f32 %v3776_v28, 0.0  ;;  %v3590_v37 = vpop.f32.mrb[196].mxu1  ;;  %v4238_v56 = vadd.f32 %v8368_v43, %v4162_v20  ;;  %v4164_v36 = vmul.f32 %v8354_v18, %v9001_v33  ;;  %v9005_v20 = vld [vmem:[#allocation54_spill] sm:$0xff] }
 0x5d9   : > { %v4358_v24 = vmax.f32 %v4294_v42, 0.0  ;;  %v4296_v0 = vadd.f32 %v4232_v17, %v3839_v8  ;;  %v3701_v54 = vmul.f32 %v8358_v50, %v3590_v37  ;;  %v3592_v63 = vpop.f32.mrb[197].mxu1 }
 0x5da   : > { %v4359_v61 = vmax.f32 %v4295_v45, 0.0  ;;  %v4297_v62 = vadd.f32 %v4233_v30, %v3840_v7  ;;  %v3702_v4 = vmul.f32 %v8362_v31, %v3592_v63  ;;  %v3594_v59 = vpop.f32.mrb[198].mxu1  ;;  %v9002_v45 = vld [vmem:[#allocation51_spill] sm:$0xff]  ;;  %v4240_v6 = vadd.f32 %v8368_v43, %v4164_v36 }
 0x5db   : > { %4422 = vst [vmem:[%s8408_s30 + $0x120] sm:$0xff] %v4358_v24  ;;  %v4360_v11 = vmax.f32 %v4296_v0, 0.0  ;;  %v3777_v27 = vadd.f32 %v8370_v38, %v3701_v54  ;;  %v3703_v55 = vmul.f32 %v8358_v50, %v3594_v59  ;;  %v3596_v49 = vpop.f32.mrb[199].mxu1  ;;  %v4165_v30 = vmul.f32 %v8356_v51, %v9002_v45  ;;  %v9003_v54 = vld [vmem:[#allocation52_spill] sm:$0xff]  ;;  %v9008_v45 = vld [vmem:[#allocation57_spill] sm:$0xff] }
 0x5dc   : > { %4423 = vst [vmem:[%s8408_s30 + $0x128] sm:$0xff] %v4359_v61  ;;  %v4361_v19 = vmax.f32 %v4297_v62, 0.0  ;;  %v3778_v23 = vadd.f32 %v8378_v25, %v3702_v4  ;;  %v3704_v15 = vmul.f32 %v8362_v31, %v3596_v49  ;;  %v4166_v63 = vmul.f32 %v8354_v18, %v9003_v54 }
 0x5dd   : > { %4424 = vst [vmem:[%s8408_s30 + $0x130] sm:$0xff] %v4360_v11  ;;  %v3841_v34 = vmax.f32 %v3777_v27, 0.0  ;;  %v3779_v53 = vadd.f32 %v8370_v38, %v3703_v55  ;;  %v4241_v11 = vadd.f32 %v8376_v35, %v4165_v30  ;;  %v4171_v30 = vmul.f32 %v8356_v51, %v9008_v45 }
 0x5de   : > { %4425 = vst [vmem:[%s8408_s30 + $0x138] sm:$0xff] %v4361_v19  ;;  %v3842_v39 = vmax.f32 %v3778_v23, 0.0  ;;  %v3780_v40 = vadd.f32 %v8378_v25, %v3704_v15 }
 0x5df   : > { %v4298_v2 = vadd.f32 %v4234_v12, %v3841_v34  ;;  %v3843_v46 = vmax.f32 %v3779_v53, 0.0  ;;  %v4247_v29 = vadd.f32 %v8376_v35, %v4171_v30 }
 0x5e0   : > { %v4299_v47 = vadd.f32 %v4235_v57, %v3842_v39  ;;  %v3844_v60 = vmax.f32 %v3780_v40, 0.0  ;;  %v3600_v22 = vpop.f32.mrb[200].mxu1  ;;  %v4242_v57 = vadd.f32 %v8368_v43, %v4166_v63  ;;  %v4168_v39 = vmul.f32 %v8354_v18, %v9005_v20  ;;  %v9009_v63 = vld [vmem:[#allocation58_spill] sm:$0xff] }
 0x5e1   : > { %v4362_v32 = vmax.f32 %v4298_v2, 0.0  ;;  %v4300_v41 = vadd.f32 %v4236_v21, %v3843_v46  ;;  %v3705_v5 = vmul.f32 %v8358_v50, %v3600_v22  ;;  %v3602_v1 = vpop.f32.mrb[201].mxu1 }
 0x5e2   : > { %v4363_v13 = vmax.f32 %v4299_v47, 0.0  ;;  %v4301_v58 = vadd.f32 %v4237_v14, %v3844_v60  ;;  %v3706_v26 = vmul.f32 %v8362_v31, %v3602_v1  ;;  %v3604_v28 = vpop.f32.mrb[202].mxu1  ;;  %v9006_v47 = vld [vmem:[#allocation55_spill] sm:$0xff]  ;;  %v4244_v33 = vadd.f32 %v8368_v43, %v4168_v39 }
 0x5e3   : > { %4426 = vst [vmem:[%s8408_s30 + $0x140] sm:$0xff] %v4362_v32  ;;  %v4364_v42 = vmax.f32 %v4300_v41, 0.0  ;;  %v3781_v17 = vadd.f32 %v8370_v38, %v3705_v5  ;;  %v3707_v8 = vmul.f32 %v8358_v50, %v3604_v28  ;;  %v3606_v7 = vpop.f32.mrb[203].mxu1  ;;  %v4169_v14 = vmul.f32 %v8356_v51, %v9006_v47  ;;  %v9007_v5 = vld [vmem:[#allocation56_spill] sm:$0xff]  ;;  %v9012_v47 = vld [vmem:[#allocation61_spill] sm:$0xff] }
 0x5e4   : > { %4427 = vst [vmem:[%s8408_s30 + $0x148] sm:$0xff] %v4363_v13  ;;  %v4365_v37 = vmax.f32 %v4301_v58, 0.0  ;;  %v3782_v3 = vadd.f32 %v8378_v25, %v3706_v26  ;;  %v3708_v24 = vmul.f32 %v8362_v31, %v3606_v7  ;;  %v4170_v1 = vmul.f32 %v8354_v18, %v9007_v5 }
 0x5e5   : > { %4428 = vst [vmem:[%s8408_s30 + $0x150] sm:$0xff] %v4364_v42  ;;  %v3845_v0 = vmax.f32 %v3781_v17, 0.0  ;;  %v3783_v12 = vadd.f32 %v8370_v38, %v3707_v8  ;;  %v4245_v42 = vadd.f32 %v8376_v35, %v4169_v14  ;;  %v4175_v14 = vmul.f32 %v8356_v51, %v9012_v47 }
 0x5e6   : > { %4429 = vst [vmem:[%s8408_s30 + $0x158] sm:$0xff] %v4365_v37  ;;  %v3846_v61 = vmax.f32 %v3782_v3, 0.0  ;;  %v3784_v62 = vadd.f32 %v8378_v25, %v3708_v24 }
 0x5e7   : > { %v4302_v4 = vadd.f32 %v4238_v56, %v3845_v0  ;;  %v3847_v9 = vmax.f32 %v3783_v12, 0.0  ;;  %v4251_v45 = vadd.f32 %v8376_v35, %v4175_v14 }
 0x5e8   : > { %v4303_v59 = vadd.f32 %v4239_v10, %v3846_v61  ;;  %v3848_v27 = vmax.f32 %v3784_v62, 0.0  ;;  %v3610_v55 = vpop.f32.mrb[204].mxu1  ;;  %v4246_v10 = vadd.f32 %v8368_v43, %v4170_v1  ;;  %v4172_v61 = vmul.f32 %v8354_v18, %v9009_v63  ;;  %v9013_v1 = vld [vmem:[#allocation62_spill] sm:$0xff] }
 0x5e9   : > { %v4366_v49 = vmax.f32 %v4302_v4, 0.0  ;;  %v4304_v19 = vadd.f32 %v4240_v6, %v3847_v9  ;;  %v3709_v23 = vmul.f32 %v8358_v50, %v3610_v55  ;;  %v3612_v15 = vpop.f32.mrb[205].mxu1 }
 0x5ea   : > { %v4367_v34 = vmax.f32 %v4303_v59, 0.0  ;;  %v4305_v53 = vadd.f32 %v4241_v11, %v3848_v27  ;;  %v3710_v44 = vmul.f32 %v8362_v31, %v3612_v15  ;;  %v3614_v40 = vpop.f32.mrb[206].mxu1  ;;  %v9010_v59 = vld [vmem:[#allocation59_spill] sm:$0xff]  ;;  %v4248_v20 = vadd.f32 %v8368_v43, %v4172_v61 }
 0x5eb   : > { %4430 = vst [vmem:[%s8408_s30 + $0x160] sm:$0xff] %v4366_v49  ;;  %v4368_v2 = vmax.f32 %v4304_v19, 0.0  ;;  %v3785_v21 = vadd.f32 %v8370_v38, %v3709_v23  ;;  %v3711_v46 = vmul.f32 %v8358_v50, %v3614_v40  ;;  %v3616_v60 = vpop.f32.mrb[207].mxu1  ;;  %v4173_v11 = vmul.f32 %v8356_v51, %v9010_v59  ;;  %v9011_v23 = vld [vmem:[#allocation60_spill] sm:$0xff]  ;;  %v9016_v59 = vld [vmem:[#allocation65_spill] sm:$0xff] }
 0x5ec   : > { %4431 = vst [vmem:[%s8408_s30 + $0x168] sm:$0xff] %v4367_v34  ;;  %v4369_v22 = vmax.f32 %v4305_v53, 0.0  ;;  %v3786_v16 = vadd.f32 %v8378_v25, %v3710_v44  ;;  %v3712_v32 = vmul.f32 %v8362_v31, %v3616_v60  ;;  %v4174_v15 = vmul.f32 %v8354_v18, %v9011_v23 }
 0x5ed   : > { %4432 = vst [vmem:[%s8408_s30 + $0x170] sm:$0xff] %v4368_v2  ;;  %v3849_v41 = vmax.f32 %v3785_v21, 0.0  ;;  %v3787_v56 = vadd.f32 %v8370_v38, %v3711_v46  ;;  %v4249_v2 = vadd.f32 %v8376_v35, %v4173_v11  ;;  %v4179_v11 = vmul.f32 %v8356_v51, %v9016_v59 }
 0x5ee   : > { %4433 = vst [vmem:[%s8408_s30 + $0x178] sm:$0xff] %v4369_v22  ;;  %v3850_v13 = vmax.f32 %v3786_v16, 0.0  ;;  %v3788_v58 = vadd.f32 %v8378_v25, %v3712_v32 }
 0x5ef   : > { %v4306_v26 = vadd.f32 %v4242_v57, %v3849_v41  ;;  %v3851_v36 = vmax.f32 %v3787_v56, 0.0  ;;  %v4255_v47 = vadd.f32 %v8376_v35, %v4179_v11 }
 0x5f0   : > { %v4307_v28 = vadd.f32 %v4243_v48, %v3850_v13  ;;  %v3852_v17 = vmax.f32 %v3788_v58, 0.0  ;;  %v3620_v8 = vpop.f32.mrb[208].mxu1  ;;  %v4250_v48 = vadd.f32 %v8368_v43, %v4174_v15  ;;  %v4176_v13 = vmul.f32 %v8354_v18, %v9013_v1  ;;  %v9017_v15 = vld [vmem:[#allocation66_spill] sm:$0xff] }
 0x5f1   : > { %v4370_v7 = vmax.f32 %v4306_v26, 0.0  ;;  %v4308_v37 = vadd.f32 %v4244_v33, %v3851_v36  ;;  %v3713_v3 = vmul.f32 %v8358_v50, %v3620_v8  ;;  %v3622_v24 = vpop.f32.mrb[209].mxu1 }
 0x5f2   : > { %v4371_v0 = vmax.f32 %v4307_v28, 0.0  ;;  %v4309_v12 = vadd.f32 %v4245_v42, %v3852_v17  ;;  %v3714_v54 = vmul.f32 %v8362_v31, %v3622_v24  ;;  %v3624_v62 = vpop.f32.mrb[210].mxu1  ;;  %v9014_v28 = vld [vmem:[#allocation63_spill] sm:$0xff]  ;;  %v4252_v63 = vadd.f32 %v8368_v43, %v4176_v13 }
 0x5f3   : > { %4434 = vst [vmem:[%s8408_s30 + $0x180] sm:$0xff] %v4370_v7  ;;  %v4372_v4 = vmax.f32 %v4308_v37, 0.0  ;;  %v3789_v6 = vadd.f32 %v8370_v38, %v3713_v3  ;;  %v3715_v9 = vmul.f32 %v8358_v50, %v3624_v62  ;;  %v3626_v27 = vpop.f32.mrb[211].mxu1  ;;  %v4177_v42 = vmul.f32 %v8356_v51, %v9014_v28  ;;  %v9015_v3 = vld [vmem:[#allocation64_spill] sm:$0xff] }
 0x5f4   : > { %4435 = vst [vmem:[%s8408_s30 + $0x188] sm:$0xff] %v4371_v0  ;;  %v4373_v55 = vmax.f32 %v4309_v12, 0.0  ;;  %v3790_v52 = vadd.f32 %v8378_v25, %v3714_v54  ;;  %v3716_v49 = vmul.f32 %v8362_v31, %v3626_v27  ;;  %v4178_v24 = vmul.f32 %v8354_v18, %v9015_v3 }
 0x5f5   : > { %4436 = vst [vmem:[%s8408_s30 + $0x190] sm:$0xff] %v4372_v4  ;;  %v3853_v19 = vmax.f32 %v3789_v6, 0.0  ;;  %v3791_v57 = vadd.f32 %v8370_v38, %v3715_v9  ;;  %v4253_v4 = vadd.f32 %v8376_v35, %v4177_v42 }
 0x5f6   : > { %4437 = vst [vmem:[%s8408_s30 + $0x198] sm:$0xff] %v4373_v55  ;;  %v3854_v34 = vmax.f32 %v3790_v52, 0.0  ;;  %v3792_v53 = vadd.f32 %v8378_v25, %v3716_v49 }
 0x5f7   : > { %v4310_v44 = vadd.f32 %v4246_v10, %v3853_v19  ;;  %v3855_v39 = vmax.f32 %v3791_v57, 0.0 }
 0x5f8   : > { %v4311_v40 = vadd.f32 %v4247_v29, %v3854_v34  ;;  %v3856_v21 = vmax.f32 %v3792_v53, 0.0  ;;  %v3630_v46 = vpop.f32.mrb[212].mxu1  ;;  %v4254_v29 = vadd.f32 %v8368_v43, %v4178_v24  ;;  %v4180_v34 = vmul.f32 %v8354_v18, %v9017_v15 }
 0x5f9   : > { %v4374_v60 = vmax.f32 %v4310_v44, 0.0  ;;  %v4312_v22 = vadd.f32 %v4248_v20, %v3855_v39  ;;  %v3717_v16 = vmul.f32 %v8358_v50, %v3630_v46  ;;  %v3632_v32 = vpop.f32.mrb[213].mxu1 }
 0x5fa   : > { %v4375_v41 = vmax.f32 %v4311_v40, 0.0  ;;  %v4313_v56 = vadd.f32 %v4249_v2, %v3856_v21  ;;  %v3718_v5 = vmul.f32 %v8362_v31, %v3632_v32  ;;  %v3634_v58 = vpop.f32.mrb[214].mxu1  ;;  %v9018_v40 = vld [vmem:[#allocation67_spill] sm:$0xff] }
 0x5fb   : > { %4438 = vst [vmem:[%s8408_s30 + $0x1a0] sm:$0xff] %v4374_v60  ;;  %v4376_v26 = vmax.f32 %v4312_v22, 0.0  ;;  %v3793_v33 = vadd.f32 %v8370_v38, %v3717_v16  ;;  %v3719_v36 = vmul.f32 %v8358_v50, %v3634_v58  ;;  %v3636_v17 = vpop.f32.mrb[215].mxu1  ;;  %v4181_v2 = vmul.f32 %v8356_v51, %v9018_v40 }
 0x5fc   : > { %4439 = vst [vmem:[%s8408_s30 + $0x1a8] sm:$0xff] %v4375_v41  ;;  %v4377_v8 = vmax.f32 %v4313_v56, 0.0  ;;  %v3794_v30 = vadd.f32 %v8378_v25, %v3718_v5  ;;  %v3720_v7 = vmul.f32 %v8362_v31, %v3636_v17  ;;  %v4256_v16 = vadd.f32 %v8368_v43, %v4180_v34 }
 0x5fd   : > { %4440 = vst [vmem:[%s8408_s30 + $0x1b0] sm:$0xff] %v4376_v26  ;;  %v3857_v37 = vmax.f32 %v3793_v33, 0.0  ;;  %v3795_v10 = vadd.f32 %v8370_v38, %v3719_v36  ;;  %v4257_v56 = vadd.f32 %v8376_v35, %v4181_v2 }
 0x5fe   : > { %4441 = vst [vmem:[%s8408_s30 + $0x1b8] sm:$0xff] %v4377_v8  ;;  %v3858_v0 = vmax.f32 %v3794_v30, 0.0  ;;  %v3796_v12 = vadd.f32 %v8378_v25, %v3720_v7 }
 0x5ff   : > { %v4314_v54 = vadd.f32 %v4250_v48, %v3857_v37  ;;  %v3859_v61 = vmax.f32 %v3795_v10, 0.0 }
 0x600   : > { %v4315_v62 = vadd.f32 %v4251_v45, %v3858_v0  ;;  %v3860_v6 = vmax.f32 %v3796_v12, 0.0  ;;  %v3640_v9 = vpop.f32.mrb[216].mxu1 }
 0x601   : > { %v4378_v27 = vmax.f32 %v4314_v54, 0.0  ;;  %v4316_v55 = vadd.f32 %v4252_v63, %v3859_v61  ;;  %v3721_v52 = vmul.f32 %v8358_v50, %v3640_v9  ;;  %v3642_v49 = vpop.f32.mrb[217].mxu1 }
 0x602   : > { %v4379_v19 = vmax.f32 %v4315_v62, 0.0  ;;  %v4317_v57 = vadd.f32 %v4253_v4, %v3860_v6  ;;  %v3722_v23 = vmul.f32 %v8362_v31, %v3642_v49  ;;  %v3644_v53 = vpop.f32.mrb[218].mxu1 }
 0x603   : > { %4442 = vst [vmem:[%s8408_s30 + $0x1c0] sm:$0xff] %v4378_v27  ;;  %v4380_v44 = vmax.f32 %v4316_v55, 0.0  ;;  %v3797_v20 = vadd.f32 %v8370_v38, %v3721_v52  ;;  %v3723_v39 = vmul.f32 %v8358_v50, %v3644_v53  ;;  %v3646_v21 = vpop.f32.mrb[219].mxu1 }
 0x604   : > { %4443 = vst [vmem:[%s8408_s30 + $0x1c8] sm:$0xff] %v4379_v19  ;;  %v4381_v46 = vmax.f32 %v4317_v57, 0.0  ;;  %v3798_v18 = vadd.f32 %v8378_v25, %v3722_v23  ;;  %v3724_v14 = vmul.f32 %v8362_v31, %v3646_v21 }
 0x605   : > { %4444 = vst [vmem:[%s8408_s30 + $0x1d0] sm:$0xff] %v4380_v44  ;;  %v3861_v60 = vmax.f32 %v3797_v20, 0.0  ;;  %v3799_v22 = vadd.f32 %v8370_v38, %v3723_v39 }
 0x606   : > { %4445 = vst [vmem:[%s8408_s30 + $0x1d8] sm:$0xff] %v4381_v46  ;;  %v3862_v50 = vmax.f32 %v3798_v18, 0.0  ;;  %v3800_v51 = vadd.f32 %v8378_v25, %v3724_v14 }
 0x607   : > { %v4318_v48 = vadd.f32 %v4254_v29, %v3861_v60  ;;  %v3863_v32 = vmax.f32 %v3799_v22, 0.0 }
 0x608   : > { %v4319_v41 = vadd.f32 %v4255_v47, %v3862_v50  ;;  %v3864_v31 = vmax.f32 %v3800_v51, 0.0 }
 0x609   : > { %v4382_v38 = vmax.f32 %v4318_v48, 0.0  ;;  %v4320_v5 = vadd.f32 %v4256_v16, %v3863_v32 }
 0x60a   : > { %v4383_v1 = vmax.f32 %v4319_v41, 0.0  ;;  %v4321_v13 = vadd.f32 %v4257_v56, %v3864_v31 }
 0x60b   : > { %4446 = vst [vmem:[%s8408_s30 + $0x1e0] sm:$0xff] %v4382_v38  ;;  %v4384_v25 = vmax.f32 %v4320_v5, 0.0 }
 0x60c   : > { %4447 = vst [vmem:[%s8408_s30 + $0x1e8] sm:$0xff] %v4383_v1  ;;  %v4385_v35 = vmax.f32 %v4321_v13, 0.0 }
 0x60d   : > { %4448 = vst [vmem:[%s8408_s30 + $0x1f0] sm:$0xff] %v4384_v25 }
 0x60e   : > { %4449 = vst [vmem:[%s8408_s30 + $0x1f8] sm:$0xff] %v4385_v35 }
 0x60f   : > { %6535 = shalt.err (!%p6532_p8)
}
 0x610   : > { %s6536_s4 = scalar_lea.hbm %s8767_s28, 8192  ;;  %s6540_s12 = scalar_lea.hbm %s9020_s26, 16384 }
 0x611   : > { %p6537_p12 = scmp.ne.s32.totalorder %s8767_s28, %s6536_s4  ;;  %p6541_p3 = scmp.lt.u32.totalorder %s8767_s28, %s9020_s26 }
 0x612   : > { %p6542_p5 = scmp.lt.u32.totalorder %s6540_s12, %s6536_s4  ;;  %p6544_p6 = scmp.lt.u32.totalorder %s6536_s4, %s8767_s28 }
 0x613   : > { %p6538_p9 = pnand %p6537_p12, %p9021_p0 }
 0x614   : > { %p6543_p11 = por %p6542_p5, %p6541_p3 }
 0x615   : > { %p6539_p10 = pneg %p6538_p9 }
 0x616   : > { %p6545_p7 = por %p6544_p6, %p6543_p11 }
 0x618   : > { %p6546_p1 = pnand %p6545_p7, %p6539_p10 }
 0x61a   : > { %6549 = shalt.err (!%p6546_p1)
}
 0x61b   : > { %s6657_s29 = smov 256   ;;  %s6658_s24 = smov 16  }
 0x61c   : > { %5802 = dma.vmem_to_hbm [thread:$0]  (%p9021_p0), %s8769_s8, 8192, %s8767_s28, %s4451_s14, %s6657_s29, %s6657_s29, %s6658_s24  }
 0x61d PF: > { %s4482_s30 = sand.u32 1, %s6612_s18   ;;  %p9022_p13 = scmp.ne.s32.totalorder %s8915_s25, 0 }
 0x61e   : > { %p9023_p2 = scmp.ge.s32.totalorder %s6632_s23, 2  ;;  %s4483_s22 = scalar_lea.sflag [#allocation4], %s4482_s30 }
 0x620   : > { %p5852_p4 = pnand %p9023_p2, %p9022_p13 }
 0x622   : > { %6607 = dma.done.wait (!%p5852_p4), %s4483_s22, 8192  }
 0x623   : > { %6609 = vsyncadd (!%p5852_p4), %s4483_s22, 4294959104  ;;  %s40_s23 = sadd.s32 1, %s6632_s23   ;;  %s9024_s16 = sld [smem:[#allocation36_spill]] }
 0x624   : > { %p37_p8 = scmp.ge.s32.totalorder %s40_s23, 4   ;;  %s9025_s20 = sld [smem:[#allocation41_spill]] }
 0x625   : > { %s9026_s21 = sld [smem:[#allocation38_spill]]  ;;  %s9027_s22 = sld [smem:[#allocation40_spill]] }
 0x626   : > { %s9028_s18 = smov %s6616_s19  ;;  %39 = sbr.rel (!%p37_p8) target bundleno = 31 (0x1f), region = 199 }
 0x629   : > { %s9029_s19 = smov %s9024_s16 }
 0x62d   :  { %4488 = vsyncpa [#allocation3], 1 }
 0x62e   :  { %4490 = vsyncpa [#allocation3 + $0x1], 1 }
 0x62f   :  { %4491 = vsyncpa [#allocation6], 1 }
 0x630   :  { %4493 = vsyncpa [#allocation6 + $0x1], 1 }
 0x631   :  { %4494 = vsyncpa [#allocation9], 1 }
 0x632   :  { %4495 = vsyncpa [#allocation12], 1 }
 0x633   :  { %4496 = vsyncpa [#allocation15], 1 }
 0x634   :  { %4497 = vsyncpa [#allocation18], 1 }
 0x635   :  { %4498 = vsyncpa [#allocation21], 1 }
 0x636   :  { %4499 = vsyncpa [#allocation24], 1 }
 0x637   :  { %4500 = vsyncpa [#allocation4], 1 }
 0x638   :  { %4502 = vsyncpa [#allocation4 + $0x1], 1 }

</bundles_post_ra>
